<compile_context>
chip_gen: v5e
topology: v5e:2x2
jax: 0.10.0
libtpu: 0.0.40
codegen_flags: <defaults>
</compile_context>

<pallas_src>
import functools

import jax
import jax.numpy as jnp
from jax.experimental import pallas as pl
from jax.experimental.pallas import tpu as pltpu


def _round_up(v: int, m: int) -> int:
    return (v + m - 1) // m * m


# ----------------------------------------------------------------------------
# Pass 1: stable descending rank of every element (tiled O(N^2) compare).
# ----------------------------------------------------------------------------
def _rank_kernel(xi_row_ref, xcol_ref, xi_col_ref, rank_ref, acc_ref, *,
                 tile, n_pad):
    ri = pl.program_id(0)
    xi = xi_row_ref[...]                       # (1, T)  x_i along lanes
    acc_ref[...] = jnp.zeros_like(acc_ref)     # lane-dense (1, T) accumulator

    n_strips = n_pad // tile
    for c in range(n_strips):                  # static; fully unrolled
        xj = xcol_ref[pl.ds(c * tile, tile), :]    # (T, 1) x_j down sublanes
        is_before = c < ri                          # strip entirely before tile?

        # Only one of the two branches runs at runtime -> one compare / element.
        @pl.when(is_before)
        def _():
            acc_ref[...] += jnp.sum((xj >= xi).astype(jnp.float32),
                                    axis=0, keepdims=True)

        @pl.when(c >= ri)
        def _():
            acc_ref[...] += jnp.sum((xj > xi).astype(jnp.float32),
                                    axis=0, keepdims=True)

    # Stable tie-break inside the diagonal tile: equal value, smaller local idx.
    xi_col = xi_col_ref[...]                   # (T, 1) same row tile, sublane form
    j_io = jax.lax.broadcasted_iota(jnp.int32, (tile, tile), 0)   # local j
    i_io = jax.lax.broadcasted_iota(jnp.int32, (tile, tile), 1)   # local i
    ties = jnp.logical_and(xi_col == xi, j_io < i_io)
    rank_ref[...] = acc_ref[...] + jnp.sum(ties.astype(jnp.float32),
                                           axis=0, keepdims=True)


# ----------------------------------------------------------------------------
# Pass 2: keep = rank < k, running prefix-count -> output slot, compact values.
# Single grid step; internal loop; constants hoisted; exact value scatter.
# ----------------------------------------------------------------------------
def _compact_kernel(xcol_ref, rankcol_ref, out_ref, *, k, tile, kp, n_pad):
    n_tiles = n_pad // tile

    # Constants built exactly once per invocation.
    r_io = jax.lax.broadcasted_iota(jnp.int32, (tile, tile), 0)
    c_io = jax.lax.broadcasted_iota(jnp.int32, (tile, tile), 1)
    strict_lower = (c_io < r_io).astype(jnp.float32)          # [a, b] = 1 iff b < a
    p_idx = jax.lax.broadcasted_iota(jnp.int32, (tile, kp), 1)  # output-slot lanes

    out_acc = jnp.zeros((1, kp), jnp.float32)
    base = jnp.zeros((1, 1), jnp.float32)      # kept count so far (carried value)
    for t in range(n_tiles):                   # static; fully unrolled
        xc = xcol_ref[pl.ds(t * tile, tile), :]       # (T, 1) values
        rk = rankcol_ref[pl.ds(t * tile, tile), :]    # (T, 1) ranks (exact ints)
        keep = rk < jnp.float32(k)                     # (T, 1)
        keep_f = keep.astype(jnp.float32)

        # Exclusive prefix count of kept elements within the tile: 0/1 matmul,
        # exact in f32 accumulation.
        excl = jnp.dot(strict_lower, keep_f,
                       preferred_element_type=jnp.float32)     # (T, 1)
        slot = jnp.where(keep, (excl + base).astype(jnp.int32), -1)   # (T, 1)

        # Exact scatter: each output lane gets its value from exactly one
        # element; all other contributions are exactly 0.0.  No value-carrying
        # matmul, so outputs are bit-exact copies of the inputs.
        contrib = jnp.where(slot == p_idx, xc, jnp.float32(0.0))      # (T, kp)
        out_acc = out_acc + jnp.sum(contrib, axis=0, keepdims=True)
        base = base + jnp.sum(keep_f, axis=0, keepdims=True)

    out_ref[...] = out_acc                     # lane-dense (1, K_pad) store


# ----------------------------------------------------------------------------
# Wrapper.
# ----------------------------------------------------------------------------
def largest_downscale(x: jax.Array, k: int, *, tile: int = 256) -> jax.Array:
    """Returns the k largest values of 1-D x, in original input order."""
    x = jnp.asarray(x, jnp.float32).reshape(-1)
    n = x.shape[0]
    if not 0 < k <= n:
        raise ValueError("k must satisfy 0 < k <= len(x)")
    assert n < (1 << 24) and k < (1 << 24), "exact-int-in-f32 requirement"
    assert tile % 128 == 0

    n_pad = _round_up(n, tile)                 # pad to the tile (no lcm inflation)
    k_pad = _round_up(k, 128)                  # lane-dense output block

    # -inf padding: padded slots rank >= n >= k (never selected) and genuine
    # -inf inputs still rank ahead of the padding.
    xp = jnp.full((n_pad,), -jnp.inf, jnp.float32).at[:n].set(x)
    x_row = xp.reshape(1, n_pad)
    x_col = xp.reshape(n_pad, 1)
    r_tiles = n_pad // tile

    # Pass 1: ranks.  Row-tile axis "parallel" (megacore on v7x); the full x
    # column (~n_pad*512 B in VMEM) stays resident across the whole grid.
    rank_row = pl.pallas_call(
        functools.partial(_rank_kernel, tile=tile, n_pad=n_pad),
        out_shape=jax.ShapeDtypeStruct((1, n_pad), jnp.float32),
        grid=(r_tiles,),
        in_specs=[
            pl.BlockSpec((1, tile), lambda ri: (0, ri)),     # row tile (lanes)
            pl.BlockSpec((n_pad, 1), lambda ri: (0, 0)),     # full x (sublanes)
            pl.BlockSpec((tile, 1), lambda ri: (ri, 0)),     # row tile (sublanes)
        ],
        out_specs=pl.BlockSpec((1, tile), lambda ri: (0, ri)),
        scratch_shapes=[pltpu.VMEM((1, tile), jnp.float32)],
        compiler_params=pltpu.CompilerParams(
            dimension_semantics=("parallel",)),
    )(x_row, x_col, x_col)

    rank_col = rank_row.reshape(n_pad, 1)      # free relayout between calls

    # Pass 2: keep / slot / compact.  One grid step; values + ranks resident;
    # running kept count carried as an in-trace value (no VMEM counter).
    out = pl.pallas_call(
        functools.partial(_compact_kernel, k=k, tile=tile, kp=k_pad,
                          n_pad=n_pad),
        out_shape=jax.ShapeDtypeStruct((1, k_pad), jnp.float32),
        grid=(1,),
        in_specs=[
            pl.BlockSpec((n_pad, 1), lambda i: (0, 0)),      # values (column)
            pl.BlockSpec((n_pad, 1), lambda i: (0, 0)),      # ranks (column)
        ],
        out_specs=pl.BlockSpec((1, k_pad), lambda i: (0, 0)),
        compiler_params=pltpu.CompilerParams(
            dimension_semantics=("arbitrary",)),
    )(x_col, rank_col)

    return out[0, :k]


def _reference(x: jax.Array, k: int) -> jax.Array:
    # Pure-JAX reference of the torch module: topk, then restore input order.
    vals, idx = jax.lax.top_k(x, k)
    return vals[jnp.argsort(idx)]


if __name__ == "__main__":
    # Small stand-in for the module default (dim=5000): length-1000 input, k=300.
    n, k = 1000, 300
    x = jax.random.normal(jax.random.PRNGKey(0), (n,), dtype=jnp.float32)

    out = jax.block_until_ready(largest_downscale(x, k))
    ref = _reference(x, k)

    assert out.shape == (k,)
    assert bool(jnp.allclose(out, ref, atol=1e-6, rtol=0)), "mismatch vs reference"

    print("KERNEL_OK")
</pallas_src>

<mosaic_0001>
module attributes {stable_mosaic.version = 11 : i64} {
  func.func @_rank_kernel(%arg0: i32, %arg1: memref<1x256xf32, #tpu.memory_space<vmem>>, %arg2: memref<1024x1xf32, #tpu.memory_space<vmem>>, %arg3: memref<256x1xf32, #tpu.memory_space<vmem>>, %arg4: memref<1x256xf32, #tpu.memory_space<vmem>>, %arg5: memref<1x256xf32, #tpu.memory_space<vmem>>) attributes {dimension_semantics = [#tpu.dimension_semantics<parallel>], iteration_bounds = array<i64: 4>, scalar_prefetch = 0 : i64, scratch_operands = 1 : i64, tpu.core_type = #tpu.core_type<tc>, window_params = [{transform_indices = @transform_0, window_bounds = array<i64: 1, 256>}, {pipeline_mode = #tpu.pipeline_mode<synchronous>, transform_indices = @transform_1, window_bounds = array<i64: 1024, 1>}, {transform_indices = @transform_2, window_bounds = array<i64: 256, 1>}, {transform_indices = @transform_3, window_bounds = array<i64: 1, 256>}]} {
    %c0 = arith.constant 0 : index
    %c0_0 = arith.constant 0 : index
    %0 = vector.load %arg1[%c0, %c0_0] : memref<1x256xf32, #tpu.memory_space<vmem>>, vector<1x256xf32>
    %cst = arith.constant 0.000000e+00 : f32
    %1 = vector.broadcast %cst : f32 to vector<1x256xf32>
    %c0_1 = arith.constant 0 : index
    %c0_2 = arith.constant 0 : index
    %2 = vector.load %arg5[%c0_1, %c0_2] : memref<1x256xf32, #tpu.memory_space<vmem>>, vector<1x256xf32>
    tpu.vector_store %arg5[%c0_1, %c0_2], %1 {strides = array<i32>} : memref<1x256xf32, #tpu.memory_space<vmem>>, vector<1x256xf32>,
    %c0_3 = arith.constant 0 : index
    %c0_4 = arith.constant 0 : index
    %3 = vector.load %arg2[%c0_3, %c0_4] : memref<1024x1xf32, #tpu.memory_space<vmem>>, vector<256x1xf32>
    %c0_i32 = arith.constant 0 : i32
    %4 = arith.cmpi sgt, %arg0, %c0_i32 : i32
    %5 = arith.extui %4 : i1 to i32
    %c0_i32_5 = arith.constant 0 : i32
    %6 = arith.cmpi ne, %5, %c0_i32_5 : i32
    scf.if %6 {
      %c0_27 = arith.constant 0 : index
      %c0_28 = arith.constant 0 : index
      %46 = vector.load %arg5[%c0_27, %c0_28] : memref<1x256xf32, #tpu.memory_space<vmem>>, vector<1x256xf32>
      %47 = vector.broadcast %3 : vector<256x1xf32> to vector<256x256xf32>
      %48 = vector.broadcast %0 : vector<1x256xf32> to vector<256x256xf32>
      %49 = arith.cmpf oge, %47, %48 : vector<256x256xf32>
      %50 = arith.extui %49 : vector<256x256xi1> to vector<256x256xi32>
      %51 = arith.sitofp %50 : vector<256x256xi32> to vector<256x256xf32>
      %cst_29 = arith.constant dense<0.000000e+00> : vector<256xf32>
      %52 = vector.multi_reduction <add>, %51, %cst_29 [0] : vector<256x256xf32> to vector<256xf32>
      %53 = vector.shape_cast %52 : vector<256xf32> to vector<1x256xf32>
      %54 = arith.addf %46, %53 : vector<1x256xf32>
      %c0_30 = arith.constant 0 : index
      %c0_31 = arith.constant 0 : index
      %55 = vector.load %arg5[%c0_30, %c0_31] : memref<1x256xf32, #tpu.memory_space<vmem>>, vector<1x256xf32>
      tpu.vector_store %arg5[%c0_30, %c0_31], %54 {strides = array<i32>} : memref<1x256xf32, #tpu.memory_space<vmem>>, vector<1x256xf32>,
    } else {
    }
    %c0_i32_6 = arith.constant 0 : i32
    %7 = arith.cmpi sle, %arg0, %c0_i32_6 : i32
    %8 = arith.extui %7 : i1 to i32
    %c0_i32_7 = arith.constant 0 : i32
    %9 = arith.cmpi ne, %8, %c0_i32_7 : i32
    scf.if %9 {
      %c0_27 = arith.constant 0 : index
      %c0_28 = arith.constant 0 : index
      %46 = vector.load %arg5[%c0_27, %c0_28] : memref<1x256xf32, #tpu.memory_space<vmem>>, vector<1x256xf32>
      %47 = vector.broadcast %3 : vector<256x1xf32> to vector<256x256xf32>
      %48 = vector.broadcast %0 : vector<1x256xf32> to vector<256x256xf32>
      %49 = arith.cmpf ogt, %47, %48 : vector<256x256xf32>
      %50 = arith.extui %49 : vector<256x256xi1> to vector<256x256xi32>
      %51 = arith.sitofp %50 : vector<256x256xi32> to vector<256x256xf32>
      %cst_29 = arith.constant dense<0.000000e+00> : vector<256xf32>
      %52 = vector.multi_reduction <add>, %51, %cst_29 [0] : vector<256x256xf32> to vector<256xf32>
      %53 = vector.shape_cast %52 : vector<256xf32> to vector<1x256xf32>
      %54 = arith.addf %46, %53 : vector<1x256xf32>
      %c0_30 = arith.constant 0 : index
      %c0_31 = arith.constant 0 : index
      %55 = vector.load %arg5[%c0_30, %c0_31] : memref<1x256xf32, #tpu.memory_space<vmem>>, vector<1x256xf32>
      tpu.vector_store %arg5[%c0_30, %c0_31], %54 {strides = array<i32>} : memref<1x256xf32, #tpu.memory_space<vmem>>, vector<1x256xf32>,
    } else {
    }
    %c256 = arith.constant 256 : index
    %c0_8 = arith.constant 0 : index
    %10 = vector.load %arg2[%c256, %c0_8] : memref<1024x1xf32, #tpu.memory_space<vmem>>, vector<256x1xf32>
    %c1_i32 = arith.constant 1 : i32
    %11 = arith.cmpi sgt, %arg0, %c1_i32 : i32
    %12 = arith.extui %11 : i1 to i32
    %c0_i32_9 = arith.constant 0 : i32
    %13 = arith.cmpi ne, %12, %c0_i32_9 : i32
    scf.if %13 {
      %c0_27 = arith.constant 0 : index
      %c0_28 = arith.constant 0 : index
      %46 = vector.load %arg5[%c0_27, %c0_28] : memref<1x256xf32, #tpu.memory_space<vmem>>, vector<1x256xf32>
      %47 = vector.broadcast %10 : vector<256x1xf32> to vector<256x256xf32>
      %48 = vector.broadcast %0 : vector<1x256xf32> to vector<256x256xf32>
      %49 = arith.cmpf oge, %47, %48 : vector<256x256xf32>
      %50 = arith.extui %49 : vector<256x256xi1> to vector<256x256xi32>
      %51 = arith.sitofp %50 : vector<256x256xi32> to vector<256x256xf32>
      %cst_29 = arith.constant dense<0.000000e+00> : vector<256xf32>
      %52 = vector.multi_reduction <add>, %51, %cst_29 [0] : vector<256x256xf32> to vector<256xf32>
      %53 = vector.shape_cast %52 : vector<256xf32> to vector<1x256xf32>
      %54 = arith.addf %46, %53 : vector<1x256xf32>
      %c0_30 = arith.constant 0 : index
      %c0_31 = arith.constant 0 : index
      %55 = vector.load %arg5[%c0_30, %c0_31] : memref<1x256xf32, #tpu.memory_space<vmem>>, vector<1x256xf32>
      tpu.vector_store %arg5[%c0_30, %c0_31], %54 {strides = array<i32>} : memref<1x256xf32, #tpu.memory_space<vmem>>, vector<1x256xf32>,
    } else {
    }
    %c1_i32_10 = arith.constant 1 : i32
    %14 = arith.cmpi sle, %arg0, %c1_i32_10 : i32
    %15 = arith.extui %14 : i1 to i32
    %c0_i32_11 = arith.constant 0 : i32
    %16 = arith.cmpi ne, %15, %c0_i32_11 : i32
    scf.if %16 {
      %c0_27 = arith.constant 0 : index
      %c0_28 = arith.constant 0 : index
      %46 = vector.load %arg5[%c0_27, %c0_28] : memref<1x256xf32, #tpu.memory_space<vmem>>, vector<1x256xf32>
      %47 = vector.broadcast %10 : vector<256x1xf32> to vector<256x256xf32>
      %48 = vector.broadcast %0 : vector<1x256xf32> to vector<256x256xf32>
      %49 = arith.cmpf ogt, %47, %48 : vector<256x256xf32>
      %50 = arith.extui %49 : vector<256x256xi1> to vector<256x256xi32>
      %51 = arith.sitofp %50 : vector<256x256xi32> to vector<256x256xf32>
      %cst_29 = arith.constant dense<0.000000e+00> : vector<256xf32>
      %52 = vector.multi_reduction <add>, %51, %cst_29 [0] : vector<256x256xf32> to vector<256xf32>
      %53 = vector.shape_cast %52 : vector<256xf32> to vector<1x256xf32>
      %54 = arith.addf %46, %53 : vector<1x256xf32>
      %c0_30 = arith.constant 0 : index
      %c0_31 = arith.constant 0 : index
      %55 = vector.load %arg5[%c0_30, %c0_31] : memref<1x256xf32, #tpu.memory_space<vmem>>, vector<1x256xf32>
      tpu.vector_store %arg5[%c0_30, %c0_31], %54 {strides = array<i32>} : memref<1x256xf32, #tpu.memory_space<vmem>>, vector<1x256xf32>,
    } else {
    }
    %c512 = arith.constant 512 : index
    %c0_12 = arith.constant 0 : index
    %17 = vector.load %arg2[%c512, %c0_12] : memref<1024x1xf32, #tpu.memory_space<vmem>>, vector<256x1xf32>
    %c2_i32 = arith.constant 2 : i32
    %18 = arith.cmpi sgt, %arg0, %c2_i32 : i32
    %19 = arith.extui %18 : i1 to i32
    %c0_i32_13 = arith.constant 0 : i32
    %20 = arith.cmpi ne, %19, %c0_i32_13 : i32
    scf.if %20 {
      %c0_27 = arith.constant 0 : index
      %c0_28 = arith.constant 0 : index
      %46 = vector.load %arg5[%c0_27, %c0_28] : memref<1x256xf32, #tpu.memory_space<vmem>>, vector<1x256xf32>
      %47 = vector.broadcast %17 : vector<256x1xf32> to vector<256x256xf32>
      %48 = vector.broadcast %0 : vector<1x256xf32> to vector<256x256xf32>
      %49 = arith.cmpf oge, %47, %48 : vector<256x256xf32>
      %50 = arith.extui %49 : vector<256x256xi1> to vector<256x256xi32>
      %51 = arith.sitofp %50 : vector<256x256xi32> to vector<256x256xf32>
      %cst_29 = arith.constant dense<0.000000e+00> : vector<256xf32>
      %52 = vector.multi_reduction <add>, %51, %cst_29 [0] : vector<256x256xf32> to vector<256xf32>
      %53 = vector.shape_cast %52 : vector<256xf32> to vector<1x256xf32>
      %54 = arith.addf %46, %53 : vector<1x256xf32>
      %c0_30 = arith.constant 0 : index
      %c0_31 = arith.constant 0 : index
      %55 = vector.load %arg5[%c0_30, %c0_31] : memref<1x256xf32, #tpu.memory_space<vmem>>, vector<1x256xf32>
      tpu.vector_store %arg5[%c0_30, %c0_31], %54 {strides = array<i32>} : memref<1x256xf32, #tpu.memory_space<vmem>>, vector<1x256xf32>,
    } else {
    }
    %c2_i32_14 = arith.constant 2 : i32
    %21 = arith.cmpi sle, %arg0, %c2_i32_14 : i32
    %22 = arith.extui %21 : i1 to i32
    %c0_i32_15 = arith.constant 0 : i32
    %23 = arith.cmpi ne, %22, %c0_i32_15 : i32
    scf.if %23 {
      %c0_27 = arith.constant 0 : index
      %c0_28 = arith.constant 0 : index
      %46 = vector.load %arg5[%c0_27, %c0_28] : memref<1x256xf32, #tpu.memory_space<vmem>>, vector<1x256xf32>
      %47 = vector.broadcast %17 : vector<256x1xf32> to vector<256x256xf32>
      %48 = vector.broadcast %0 : vector<1x256xf32> to vector<256x256xf32>
      %49 = arith.cmpf ogt, %47, %48 : vector<256x256xf32>
      %50 = arith.extui %49 : vector<256x256xi1> to vector<256x256xi32>
      %51 = arith.sitofp %50 : vector<256x256xi32> to vector<256x256xf32>
      %cst_29 = arith.constant dense<0.000000e+00> : vector<256xf32>
      %52 = vector.multi_reduction <add>, %51, %cst_29 [0] : vector<256x256xf32> to vector<256xf32>
      %53 = vector.shape_cast %52 : vector<256xf32> to vector<1x256xf32>
      %54 = arith.addf %46, %53 : vector<1x256xf32>
      %c0_30 = arith.constant 0 : index
      %c0_31 = arith.constant 0 : index
      %55 = vector.load %arg5[%c0_30, %c0_31] : memref<1x256xf32, #tpu.memory_space<vmem>>, vector<1x256xf32>
      tpu.vector_store %arg5[%c0_30, %c0_31], %54 {strides = array<i32>} : memref<1x256xf32, #tpu.memory_space<vmem>>, vector<1x256xf32>,
    } else {
    }
    %c768 = arith.constant 768 : index
    %c0_16 = arith.constant 0 : index
    %24 = vector.load %arg2[%c768, %c0_16] : memref<1024x1xf32, #tpu.memory_space<vmem>>, vector<256x1xf32>
    %c3_i32 = arith.constant 3 : i32
    %25 = arith.cmpi sgt, %arg0, %c3_i32 : i32
    %26 = arith.extui %25 : i1 to i32
    %c0_i32_17 = arith.constant 0 : i32
    %27 = arith.cmpi ne, %26, %c0_i32_17 : i32
    scf.if %27 {
      %c0_27 = arith.constant 0 : index
      %c0_28 = arith.constant 0 : index
      %46 = vector.load %arg5[%c0_27, %c0_28] : memref<1x256xf32, #tpu.memory_space<vmem>>, vector<1x256xf32>
      %47 = vector.broadcast %24 : vector<256x1xf32> to vector<256x256xf32>
      %48 = vector.broadcast %0 : vector<1x256xf32> to vector<256x256xf32>
      %49 = arith.cmpf oge, %47, %48 : vector<256x256xf32>
      %50 = arith.extui %49 : vector<256x256xi1> to vector<256x256xi32>
      %51 = arith.sitofp %50 : vector<256x256xi32> to vector<256x256xf32>
      %cst_29 = arith.constant dense<0.000000e+00> : vector<256xf32>
      %52 = vector.multi_reduction <add>, %51, %cst_29 [0] : vector<256x256xf32> to vector<256xf32>
      %53 = vector.shape_cast %52 : vector<256xf32> to vector<1x256xf32>
      %54 = arith.addf %46, %53 : vector<1x256xf32>
      %c0_30 = arith.constant 0 : index
      %c0_31 = arith.constant 0 : index
      %55 = vector.load %arg5[%c0_30, %c0_31] : memref<1x256xf32, #tpu.memory_space<vmem>>, vector<1x256xf32>
      tpu.vector_store %arg5[%c0_30, %c0_31], %54 {strides = array<i32>} : memref<1x256xf32, #tpu.memory_space<vmem>>, vector<1x256xf32>,
    } else {
    }
    %c3_i32_18 = arith.constant 3 : i32
    %28 = arith.cmpi sle, %arg0, %c3_i32_18 : i32
    %29 = arith.extui %28 : i1 to i32
    %c0_i32_19 = arith.constant 0 : i32
    %30 = arith.cmpi ne, %29, %c0_i32_19 : i32
    scf.if %30 {
      %c0_27 = arith.constant 0 : index
      %c0_28 = arith.constant 0 : index
      %46 = vector.load %arg5[%c0_27, %c0_28] : memref<1x256xf32, #tpu.memory_space<vmem>>, vector<1x256xf32>
      %47 = vector.broadcast %24 : vector<256x1xf32> to vector<256x256xf32>
      %48 = vector.broadcast %0 : vector<1x256xf32> to vector<256x256xf32>
      %49 = arith.cmpf ogt, %47, %48 : vector<256x256xf32>
      %50 = arith.extui %49 : vector<256x256xi1> to vector<256x256xi32>
      %51 = arith.sitofp %50 : vector<256x256xi32> to vector<256x256xf32>
      %cst_29 = arith.constant dense<0.000000e+00> : vector<256xf32>
      %52 = vector.multi_reduction <add>, %51, %cst_29 [0] : vector<256x256xf32> to vector<256xf32>
      %53 = vector.shape_cast %52 : vector<256xf32> to vector<1x256xf32>
      %54 = arith.addf %46, %53 : vector<1x256xf32>
      %c0_30 = arith.constant 0 : index
      %c0_31 = arith.constant 0 : index
      %55 = vector.load %arg5[%c0_30, %c0_31] : memref<1x256xf32, #tpu.memory_space<vmem>>, vector<1x256xf32>
      tpu.vector_store %arg5[%c0_30, %c0_31], %54 {strides = array<i32>} : memref<1x256xf32, #tpu.memory_space<vmem>>, vector<1x256xf32>,
    } else {
    }
    %c0_20 = arith.constant 0 : index
    %c0_21 = arith.constant 0 : index
    %31 = vector.load %arg3[%c0_20, %c0_21] : memref<256x1xf32, #tpu.memory_space<vmem>>, vector<256x1xf32>
    %32 = tpu.iota {dimensions = array<i32: 0>} : vector<256x256xi32>
    %33 = tpu.iota {dimensions = array<i32: 1>} : vector<256x256xi32>
    %34 = vector.broadcast %31 : vector<256x1xf32> to vector<256x256xf32>
    %35 = vector.broadcast %0 : vector<1x256xf32> to vector<256x256xf32>
    %36 = arith.cmpf oeq, %34, %35 : vector<256x256xf32>
    %37 = arith.cmpi slt, %32, %33 : vector<256x256xi32>
    %38 = arith.andi %36, %37 : vector<256x256xi1>
    %c0_22 = arith.constant 0 : index
    %c0_23 = arith.constant 0 : index
    %39 = vector.load %arg5[%c0_22, %c0_23] : memref<1x256xf32, #tpu.memory_space<vmem>>, vector<1x256xf32>
    %40 = arith.extui %38 : vector<256x256xi1> to vector<256x256xi32>
    %41 = arith.sitofp %40 : vector<256x256xi32> to vector<256x256xf32>
    %cst_24 = arith.constant dense<0.000000e+00> : vector<256xf32>
    %42 = vector.multi_reduction <add>, %41, %cst_24 [0] : vector<256x256xf32> to vector<256xf32>
    %43 = vector.shape_cast %42 : vector<256xf32> to vector<1x256xf32>
    %44 = arith.addf %39, %43 : vector<1x256xf32>
    %c0_25 = arith.constant 0 : index
    %c0_26 = arith.constant 0 : index
    %45 = vector.load %arg4[%c0_25, %c0_26] : memref<1x256xf32, #tpu.memory_space<vmem>>, vector<1x256xf32>
    tpu.vector_store %arg4[%c0_25, %c0_26], %44 {strides = array<i32>} : memref<1x256xf32, #tpu.memory_space<vmem>>, vector<1x256xf32>,
    return
  }
  func.func @transform_0(%arg0: i32) -> (i32, i32) {
    %c0_i32 = arith.constant 0 : i32
    %c0_i32_0 = arith.constant 0 : i32
    return %c0_i32, %arg0 : i32, i32
  }
  func.func @transform_1(%arg0: i32) -> (i32, i32) {
    %c0_i32 = arith.constant 0 : i32
    %c0_i32_0 = arith.constant 0 : i32
    %c0_i32_1 = arith.constant 0 : i32
    return %c0_i32, %c0_i32_0 : i32, i32
  }
  func.func @transform_2(%arg0: i32) -> (i32, i32) {
    %c0_i32 = arith.constant 0 : i32
    %c0_i32_0 = arith.constant 0 : i32
    return %arg0, %c0_i32 : i32, i32
  }
  func.func @transform_3(%arg0: i32) -> (i32, i32) {
    %c0_i32 = arith.constant 0 : i32
    %c0_i32_0 = arith.constant 0 : i32
    return %c0_i32, %arg0 : i32, i32
  }
}

</mosaic_0001>

<bundles_post_ra>
// kernel: tpu_custom_call.1
= control target key start
LH: loop header
LB: loop body
LE: loop exit
PB: predicated region body
PF: predicated region fallthrough
CT: control target
= control target key end

     0   :  { %8 = vsyncpa [#allocation4], 0  ;;  %s7813_s0 = inlined_call_operand.vmem [shape: f32[1,1024], index: 0, kind: input, shape index: {}]   ;;  %s7814_s1 = inlined_call_operand.vmem [shape: f32[1024,1], index: 1, kind: input, shape index: {}]   ;;  %s7815_s2 = inlined_call_operand.vmem [shape: f32[1024,1], index: 2, kind: input, shape index: {}]   ;;  %s7816_s3 = inlined_call_operand.hbm [shape: f32[1,1024], index: 3, kind: output, shape index: {}]  }
   0x1   :  { %10 = vsyncpa [#allocation4 + $0x1], 0  ;;  %s5363_s12 = smov 0   ;;  %s5365_s13 = smov 0  }
   0x2   :  { %s5367_s14 = smov 0   ;;  %s5369_s15 = smov 0  }
   0x3 LB: > { %s5384_s16 = sadd.s32 4294967295, %s5323_s15   ;;  %s4597_s17 = sadd.s32 4294967294, %s5323_s15   ;;  %s5323_s15 = sphi %s5369_s15, %s7838_s15   ;;  %s5319_s14 = sphi %s5367_s14, %s7837_s14   ;;  %s5315_s13 = sphi %s5365_s13, %s7836_s13   ;;  %s5311_s12 = sphi %s5363_s12, %s7835_s12  }
   0x4   : > { %s5388_s18 = sadd.s32 1, %s5323_s15   ;;  %s96_s19 = sadd.s32 1, %s5319_s14 }
   0x5   : > { %s93_s20 = ssub.s32 %s5323_s15, %s5388_s18  ;;  %p106_p0 = scmp.ne.s32.totalorder %s5319_s14, %s5315_s13 }
   0x6   : > { %p94_p1 = scmp.eq.s32.totalorder %s93_s20, 0  ;;  %p107_p2 = scmp.eq.s32.totalorder %s5384_s16, 3 }
   0x7   : > { %p112_p3 = scmp.ne.s32.totalorder %s5315_s13, %s5311_s12  ;;  %p113_p4 = scmp.eq.s32.totalorder %s4597_s17, 3 }
   0x8   : > { %s5399_s21 = scalar_select %p94_p1, %s5319_s14, %s96_s19  }
   0x9   : > { %p5401_p5 = por %p107_p2, %p106_p0  ;;  %p5405_p6 = por %p113_p4, %p112_p3 }
   0xa   : > { %p4600_p7 = scmp.ge.s32.totalorder %s5323_s15, 1  ;;  %p151_p8 = scmp.lt.s32.totalorder %s5323_s15, 5 }
   0xc   : > { %p152_p9 = pnand %p4600_p7, %p151_p8 }
   0xd   : > { %s176_s24 = sand.u32 (!%p152_p9), 1, %s5315_s13   ;;  %s5413_s25 = sshll.u32 (!%p152_p9), %s5384_s16, 1 }
   0xe   : > { %155 = sbr.rel (%p152_p9) target bundleno = 2093 (0x82d), region = 32  ;;  %s5432_s5 = sshll.u32 (!%p152_p9), %s176_s24, 1 }
   0xf   : > { %p180_p10 = scmp.lt.s32.totalorder (!%p152_p9), %s5413_s25, 7  ;;  %s4603_s17 = sshll.u32 (!%p152_p9), %s5384_s16, 5 }
  0x10   : > { %p185_p11 = scmp.lt.s32.totalorder (!%p152_p9), %s4603_s17, 127  ;;  %s178_s27 = scalar_lea.vmem (!%p152_p9), [#allocation3], %s5432_s5 }
  0x11   : > { %p4605_p12 = scmp.le.s32.totalorder (!%p152_p9), %s5384_s16, 0 }
  0x13   : > { %v192_v0 = vlaneseq  ;;  %v5418_v1 = vld [vmem:[%s7814_s1] sm:$0xff]  ;;  %v5423_v2 = vld [vmem:[%s7814_s1 + $0x8] sm:$0xff]  ;;  %v5428_v3 = vld [vmem:[%s7814_s1 + $0x10] sm:$0xff]  ;;  %s181_s30 = scalar_select %p180_p10, %s5413_s25, 7  ;;  %v5325_v11 = vmov 0.0  }
  0x14   : > { %v5438_v4 = vld [vmem:[%s7814_s1 + $0x18] sm:$0xff]  ;;  %v5443_v5 = vld [vmem:[%s7814_s1 + $0x20] sm:$0xff]  ;;  %v5448_v6 = vld [vmem:[%s7814_s1 + $0x28] sm:$0xff]  ;;  %s7840_s17 = smov (!%p185_p11, %s4603_s17), 127 }
  0x15   : > { %vm5452_vm0 = vcmp.lt.s32.totalorder %v192_v0, 256  ;;  %v5459_v8 = vld [vmem:[%s7814_s1 + $0x30] sm:$0xff]  ;;  %v5464_v9 = vld [vmem:[%s7814_s1 + $0x38] sm:$0xff]  ;;  %v5469_v10 = vld [vmem:[%s7814_s1 + $0x40] sm:$0xff]  ;;  %s182_s6 = scalar_lea.vmem %s7813_s0, %s181_s30  ;;  %s4604_s9 = sshll.u32 %s7840_s17, 3 }
  0x16   : > { %196 = vst.msk [vmem:[#allocation2] sm:$0x3] %vm5452_vm0, %v5325_v11  ;;  %v5478_v12 = vld [vmem:[%s7814_s1 + $0x48] sm:$0xff]  ;;  %v5483_v13 = vld [vmem:[%s7814_s1 + $0x50] sm:$0xff]  ;;  %v5488_v14 = vld [vmem:[%s7814_s1 + $0x58] sm:$0xff]  ;;  %s5568_s29 = scalar_lea.vmem %s7815_s2, %s4604_s9 }
  0x17   : > { %v5493_v15 = vld [vmem:[%s7814_s1 + $0x60] sm:$0xff]  ;;  %v5498_v16 = vld [vmem:[%s7814_s1 + $0x68] sm:$0xff]  ;;  %v5503_v17 = vld [vmem:[%s7814_s1 + $0x70] sm:$0xff] }
  0x18   : > { %v5511_v18 = vld [vmem:[%s7814_s1 + $0x78] sm:$0xff]  ;;  %v5516_v19 = vld [vmem:[%s7814_s1 + $0x80] sm:$0xff]  ;;  %v5521_v20 = vld [vmem:[%s7814_s1 + $0x88] sm:$0xff] }
  0x19   : > { %v5523_v21 = vld [vmem:[%s182_s6] sm:$0x3]  ;;  %v5528_v22 = vld [vmem:[%s7814_s1 + $0x90] sm:$0xff]  ;;  %v5533_v23 = vld [vmem:[%s7814_s1 + $0x98] sm:$0xff]  ;;  %232 = sbr.rel (%p4605_p12) target bundleno = 252 (0xfc), region = 36 }
  0x1a   : > { %v5538_v24 = vld [vmem:[%s7814_s1 + $0xa0] sm:$0xff]  ;;  %v5543_v25 = vld [vmem:[%s7814_s1 + $0xa8] sm:$0xff]  ;;  %v5548_v26 = vld [vmem:[%s7814_s1 + $0xb0] sm:$0xff] }
  0x1b   : > { %v5553_v27 = vld [vmem:[%s7814_s1 + $0xb8] sm:$0xff]  ;;  %v5558_v28 = vld [vmem:[%s7814_s1 + $0xc0] sm:$0xff]  ;;  %v5563_v29 = vld [vmem:[%s7814_s1 + $0xc8] sm:$0xff] }
  0x1c   : > { %v5573_v30 = vld [vmem:[%s7814_s1 + $0xd0] sm:$0xff]  ;;  %v5578_v31 = vld [vmem:[%s7814_s1 + $0xd8] sm:$0xff]  ;;  %v5583_v32 = vld [vmem:[%s7814_s1 + $0xe0] sm:$0xff] }
  0x1d   : > { %v5588_v33 = vld [vmem:[%s7814_s1 + $0xe8] sm:$0xff]  ;;  %v5593_v34 = vld [vmem:[%s7814_s1 + $0xf0] sm:$0xff]  ;;  %v5598_v35 = vld [vmem:[%s7814_s1 + $0xf8] sm:$0xff] }
  0x1e   : > { %v5326_v36 = vmov 0   ;;  %v5635_v42 = vperm.slane %v5523_v21, 0  ;;  %v5638_v43 = vperm.slane %v5523_v21, 1  ;;  %v5327_v46 = vmov 0.0  }
  0x1f   : > { %5236 = vset.pattern.permute.xlu2 %v5326_v36  ;;  %5235 = vset.pattern.permute.xlu1 %v5326_v36 }
  0x20   : > { %5234 = vset.pattern.permute.xlu0 %v5326_v36  ;;  %256 = vperm.xlu2 %5236, %v5443_v5  }
  0x21   : > { %246 = vperm.xlu1 %5235, %v5428_v3   ;;  %236 = vperm.xlu0 %5234, %v5418_v1  }
  0x28   : > { %261 = vperm.xlu2 %5236, %v5448_v6  }
  0x29   : > { %251 = vperm.xlu1 %5235, %v5438_v4   ;;  %241 = vperm.xlu0 %5234, %v5423_v2  }
  0x30   : > { %276 = vperm.xlu2 %5236, %v5469_v10  }
  0x31   : > { %271 = vperm.xlu1 %5235, %v5464_v9   ;;  %266 = vperm.xlu0 %5234, %v5459_v8  }
  0x38   : > { %291 = vperm.xlu2 %5236, %v5488_v14  }
  0x39   : > { %286 = vperm.xlu1 %5235, %v5483_v13   ;;  %281 = vperm.xlu0 %5234, %v5478_v12  }
  0x40   : > { %306 = vperm.xlu2 %5236, %v5503_v17  }
  0x41   : > { %301 = vperm.xlu1 %5235, %v5498_v16   ;;  %296 = vperm.xlu0 %5234, %v5493_v15  }
  0x48   : > { %321 = vperm.xlu2 %5236, %v5521_v20  }
  0x49   : > { %316 = vperm.xlu1 %5235, %v5516_v19   ;;  %311 = vperm.xlu0 %5234, %v5511_v18  }
  0x50   : > { %336 = vperm.xlu2 %5236, %v5538_v24  }
  0x51   : > { %331 = vperm.xlu1 %5235, %v5533_v23   ;;  %326 = vperm.xlu0 %5234, %v5528_v22  }
  0x58   : > { %351 = vperm.xlu2 %5236, %v5553_v27  }
  0x59   : > { %346 = vperm.xlu1 %5235, %v5548_v26   ;;  %341 = vperm.xlu0 %5234, %v5543_v25  }
  0x60   : > { %366 = vperm.xlu2 %5236, %v5573_v30  }
  0x61   : > { %361 = vperm.xlu1 %5235, %v5563_v29   ;;  %356 = vperm.xlu0 %5234, %v5558_v28  }
  0x68   : > { %381 = vperm.xlu2 %5236, %v5588_v33  }
  0x69   : > { %376 = vperm.xlu1 %5235, %v5583_v32   ;;  %371 = vperm.xlu0 %5234, %v5578_v31  }
  0x71   : > { %391 = vperm.xlu1 %5235, %v5598_v35   ;;  %386 = vperm.xlu0 %5234, %v5593_v34  }
  0x7a   : > { %v257_v37 = vpop.permute.xlu2 %256 }
  0x7b   : > { %vm407_vm9 = vcmp.ge.f32.partialorder %v257_v37, %v5635_v42  ;;  %vm408_vm10 = vcmp.ge.f32.partialorder %v257_v37, %v5638_v43 }
  0x7c   : > { %v4614_v36 = vsel %vm407_vm9, 1.0, %v5327_v46 }
  0x82   : > { %v262_v38 = vpop.permute.xlu2 %261 }
  0x83   : > { %vm409_vm11 = vcmp.ge.f32.partialorder %v262_v38, %v5635_v42  ;;  %vm410_vm12 = vcmp.ge.f32.partialorder %v262_v38, %v5638_v43 }
  0x8a   : > { %v277_v41 = vpop.permute.xlu2 %276 }
  0x92   : > { %v5652_v53 = vpop.permute.xlu2 %291 }
  0x93   : > { %v247_v39 = vpop.permute.xlu1 %246  ;;  %v237_v40 = vpop.permute.xlu0 %236  ;;  %vm422_vm9 = vcmp.ge.f32.partialorder %v5652_v53, %v5638_v43 }
  0x94   : > { %vm399_vm1 = vcmp.ge.f32.partialorder %v237_v40, %v5635_v42  ;;  %vm400_vm2 = vcmp.ge.f32.partialorder %v237_v40, %v5638_v43  ;;  %vm403_vm3 = vcmp.ge.f32.partialorder %v247_v39, %v5635_v42  ;;  %vm404_vm4 = vcmp.ge.f32.partialorder %v247_v39, %v5638_v43 }
  0x95   : > { %v4606_v47 = vsel %vm399_vm1, 1.0, %v5327_v46  ;;  %v4607_v48 = vsel %vm400_vm2, 1.0, %v5327_v46  ;;  %v4610_v54 = vsel %vm403_vm3, 1.0, %v5327_v46  ;;  %v4611_v55 = vsel %vm404_vm4, 1.0, %v5327_v46 }
  0x96   : > { %v4615_v39 = vsel %vm408_vm10, 1.0, %v5327_v46  ;;  %vm415_vm2 = vcmp.ge.f32.partialorder %v277_v41, %v5635_v42  ;;  %vm416_vm3 = vcmp.ge.f32.partialorder %v277_v41, %v5638_v43 }
  0x9b   : > { %v252_v44 = vpop.permute.xlu1 %251  ;;  %v242_v45 = vpop.permute.xlu0 %241 }
  0x9c   : > { %vm401_vm5 = vcmp.ge.f32.partialorder %v242_v45, %v5635_v42  ;;  %vm402_vm6 = vcmp.ge.f32.partialorder %v242_v45, %v5638_v43  ;;  %vm405_vm7 = vcmp.ge.f32.partialorder %v252_v44, %v5635_v42  ;;  %vm406_vm8 = vcmp.ge.f32.partialorder %v252_v44, %v5638_v43 }
  0x9d   : > { %v4608_v49 = vsel %vm401_vm5, 1.0, %v5327_v46  ;;  %v4609_v50 = vsel %vm402_vm6, 1.0, %v5327_v46  ;;  %v4612_v58 = vsel %vm405_vm7, 1.0, %v5327_v46  ;;  %v4613_v59 = vsel %vm406_vm8, 1.0, %v5327_v46 }
  0x9e   : > { %v591_v51 = vadd.f32 %v4608_v49, %v4606_v47  ;;  %v628_v52 = vadd.f32 %v4609_v50, %v4607_v48  ;;  %v4616_v44 = vsel %vm409_vm11, 1.0, %v5327_v46  ;;  %v4617_v45 = vsel %vm410_vm12, 1.0, %v5327_v46 }
  0x9f   : > { %vm421_vm8 = vcmp.ge.f32.partialorder %v5652_v53, %v5635_v42 }
  0xa0   : > { %v592_v56 = vadd.f32 %v4610_v54, %v591_v51  ;;  %v629_v57 = vadd.f32 %v4611_v55, %v628_v52  ;;  %v307_v52 = vpop.permute.xlu2 %306 }
  0xa2   : > { %v593_v60 = vadd.f32 %v4612_v58, %v592_v56  ;;  %v630_v61 = vadd.f32 %v4613_v59, %v629_v57 }
  0xa3   : > { %v272_v62 = vpop.permute.xlu1 %271  ;;  %v267_v63 = vpop.permute.xlu0 %266 }
  0xa4   : > { %v594_v40 = vadd.f32 %v4614_v36, %v593_v60  ;;  %v631_v37 = vadd.f32 %v4615_v39, %v630_v61  ;;  %vm411_vm13 = vcmp.ge.f32.partialorder %v267_v63, %v5635_v42  ;;  %vm412_vm14 = vcmp.ge.f32.partialorder %v267_v63, %v5638_v43 }
  0xa5   : > { %vm413_vm15 = vcmp.ge.f32.partialorder %v272_v62, %v5635_v42  ;;  %vm414_vm1 = vcmp.ge.f32.partialorder %v272_v62, %v5638_v43  ;;  %v4618_v48 = vsel %vm411_vm13, 1.0, %v5327_v46  ;;  %v4619_v49 = vsel %vm412_vm14, 1.0, %v5327_v46 }
  0xa6   : > { %v595_v38 = vadd.f32 %v4616_v44, %v594_v40  ;;  %v632_v47 = vadd.f32 %v4617_v45, %v631_v37  ;;  %v4620_v54 = vsel %vm413_vm15, 1.0, %v5327_v46  ;;  %v4621_v55 = vsel %vm414_vm1, 1.0, %v5327_v46 }
  0xa7   : > { %v4622_v60 = vsel %vm415_vm2, 1.0, %v5327_v46  ;;  %v4623_v61 = vsel %vm416_vm3, 1.0, %v5327_v46  ;;  %vm427_vm14 = vcmp.ge.f32.partialorder %v307_v52, %v5635_v42  ;;  %vm428_vm15 = vcmp.ge.f32.partialorder %v307_v52, %v5638_v43 }
  0xa8   : > { %v596_v50 = vadd.f32 %v4618_v48, %v595_v38  ;;  %v633_v51 = vadd.f32 %v4619_v49, %v632_v47  ;;  %v322_v49 = vpop.permute.xlu2 %321 }
  0xaa   : > { %v597_v56 = vadd.f32 %v4620_v54, %v596_v50  ;;  %v634_v57 = vadd.f32 %v4621_v55, %v633_v51  ;;  %v4628_v50 = vsel %vm421_vm8, 1.0, %v5327_v46  ;;  %v4629_v51 = vsel %vm422_vm9, 1.0, %v5327_v46 }
  0xab   : > { %v287_v58 = vpop.permute.xlu1 %286  ;;  %v282_v59 = vpop.permute.xlu0 %281 }
  0xac   : > { %v598_v62 = vadd.f32 %v4622_v60, %v597_v56  ;;  %v635_v63 = vadd.f32 %v4623_v61, %v634_v57  ;;  %vm419_vm4 = vcmp.ge.f32.partialorder %v287_v58, %v5635_v42  ;;  %vm420_vm5 = vcmp.ge.f32.partialorder %v287_v58, %v5638_v43 }
  0xad   : > { %vm417_vm6 = vcmp.ge.f32.partialorder %v282_v59, %v5635_v42  ;;  %vm418_vm7 = vcmp.ge.f32.partialorder %v282_v59, %v5638_v43  ;;  %v4626_v37 = vsel %vm419_vm4, 1.0, %v5327_v46  ;;  %v4627_v44 = vsel %vm420_vm5, 1.0, %v5327_v46 }
  0xae   : > { %v4624_v41 = vsel %vm417_vm6, 1.0, %v5327_v46  ;;  %v4625_v36 = vsel %vm418_vm7, 1.0, %v5327_v46  ;;  %vm433_vm5 = vcmp.ge.f32.partialorder %v322_v49, %v5635_v42  ;;  %vm434_vm6 = vcmp.ge.f32.partialorder %v322_v49, %v5638_v43 }
  0xaf   : > { %v599_v39 = vadd.f32 %v4624_v41, %v598_v62  ;;  %v636_v40 = vadd.f32 %v4625_v36, %v635_v63  ;;  %v4634_v36 = vsel %vm427_vm14, 1.0, %v5327_v46 }
  0xb1   : > { %v600_v45 = vadd.f32 %v4626_v37, %v599_v39  ;;  %v637_v38 = vadd.f32 %v4627_v44, %v636_v40  ;;  %v4635_v39 = vsel %vm428_vm15, 1.0, %v5327_v46  ;;  %v337_v40 = vpop.permute.xlu2 %336 }
  0xb3   : > { %v302_v47 = vpop.permute.xlu1 %301  ;;  %v297_v48 = vpop.permute.xlu0 %296  ;;  %v601_v54 = vadd.f32 %v4628_v50, %v600_v45  ;;  %v638_v55 = vadd.f32 %v4629_v51, %v637_v38 }
  0xb4   : > { %vm425_vm10 = vcmp.ge.f32.partialorder %v302_v47, %v5635_v42  ;;  %vm426_vm11 = vcmp.ge.f32.partialorder %v302_v47, %v5638_v43  ;;  %vm423_vm12 = vcmp.ge.f32.partialorder %v297_v48, %v5635_v42  ;;  %vm424_vm13 = vcmp.ge.f32.partialorder %v297_v48, %v5638_v43 }
  0xb5   : > { %v4630_v53 = vsel %vm423_vm12, 1.0, %v5327_v46  ;;  %v4631_v56 = vsel %vm424_vm13, 1.0, %v5327_v46  ;;  %v4632_v59 = vsel %vm425_vm10, 1.0, %v5327_v46  ;;  %v4633_v60 = vsel %vm426_vm11, 1.0, %v5327_v46 }
  0xb6   : > { %v602_v57 = vadd.f32 %v4630_v53, %v601_v54  ;;  %v639_v58 = vadd.f32 %v4631_v56, %v638_v55  ;;  %v4640_v56 = vsel %vm433_vm5, 1.0, %v5327_v46  ;;  %vm439_vm11 = vcmp.ge.f32.partialorder %v337_v40, %v5635_v42 }
  0xb7   : > { %vm440_vm12 = vcmp.ge.f32.partialorder %v337_v40, %v5638_v43 }
  0xb8   : > { %v603_v61 = vadd.f32 %v4632_v59, %v602_v57  ;;  %v640_v62 = vadd.f32 %v4633_v60, %v639_v58  ;;  %v4641_v57 = vsel %vm434_vm6, 1.0, %v5327_v46 }
  0xba   : > { %v604_v37 = vadd.f32 %v4634_v36, %v603_v61  ;;  %v641_v44 = vadd.f32 %v4635_v39, %v640_v62  ;;  %v352_v61 = vpop.permute.xlu2 %351 }
  0xbb   : > { %v317_v63 = vpop.permute.xlu1 %316  ;;  %v312_v41 = vpop.permute.xlu0 %311 }
  0xbc   : > { %vm431_vm1 = vcmp.ge.f32.partialorder %v317_v63, %v5635_v42  ;;  %vm432_vm2 = vcmp.ge.f32.partialorder %v317_v63, %v5638_v43  ;;  %vm429_vm3 = vcmp.ge.f32.partialorder %v312_v41, %v5635_v42  ;;  %vm430_vm4 = vcmp.ge.f32.partialorder %v312_v41, %v5638_v43 }
  0xbd   : > { %v4636_v52 = vsel %vm429_vm3, 1.0, %v5327_v46  ;;  %v4637_v45 = vsel %vm430_vm4, 1.0, %v5327_v46  ;;  %v4638_v48 = vsel %vm431_vm1, 1.0, %v5327_v46  ;;  %v4639_v50 = vsel %vm432_vm2, 1.0, %v5327_v46 }
  0xbe   : > { %v605_v38 = vadd.f32 %v4636_v52, %v604_v37  ;;  %v642_v47 = vadd.f32 %v4637_v45, %v641_v44  ;;  %v4646_v45 = vsel %vm439_vm11, 1.0, %v5327_v46  ;;  %vm445_vm2 = vcmp.ge.f32.partialorder %v352_v61, %v5635_v42 }
  0xbf   : > { %vm446_vm3 = vcmp.ge.f32.partialorder %v352_v61, %v5638_v43 }
  0xc0   : > { %v606_v51 = vadd.f32 %v4638_v48, %v605_v38  ;;  %v643_v54 = vadd.f32 %v4639_v50, %v642_v47  ;;  %v4647_v38 = vsel %vm440_vm12, 1.0, %v5327_v46 }
  0xc2   : > { %v607_v58 = vadd.f32 %v4640_v56, %v606_v51  ;;  %v644_v59 = vadd.f32 %v4641_v57, %v643_v54 }
  0xc3   : > { %v332_v55 = vpop.permute.xlu1 %331  ;;  %v327_v53 = vpop.permute.xlu0 %326 }
  0xc4   : > { %vm437_vm7 = vcmp.ge.f32.partialorder %v332_v55, %v5635_v42  ;;  %vm438_vm8 = vcmp.ge.f32.partialorder %v332_v55, %v5638_v43  ;;  %vm435_vm9 = vcmp.ge.f32.partialorder %v327_v53, %v5635_v42  ;;  %vm436_vm10 = vcmp.ge.f32.partialorder %v327_v53, %v5638_v43 }
  0xc5   : > { %v4642_v49 = vsel %vm435_vm9, 1.0, %v5327_v46  ;;  %v4643_v60 = vsel %vm436_vm10, 1.0, %v5327_v46  ;;  %v4644_v41 = vsel %vm437_vm7, 1.0, %v5327_v46  ;;  %v4645_v36 = vsel %vm438_vm8, 1.0, %v5327_v46 }
  0xc6   : > { %v608_v62 = vadd.f32 %v4642_v49, %v607_v58  ;;  %v645_v63 = vadd.f32 %v4643_v60, %v644_v59  ;;  %v4652_v58 = vsel %vm445_vm2, 1.0, %v5327_v46  ;;  %v4653_v59 = vsel %vm446_vm3, 1.0, %v5327_v46  ;;  %v367_v49 = vpop.permute.xlu2 %366 }
  0xc7   : > { %vm451_vm8 = vcmp.ge.f32.partialorder %v367_v49, %v5635_v42  ;;  %vm452_vm9 = vcmp.ge.f32.partialorder %v367_v49, %v5638_v43 }
  0xc8   : > { %v609_v39 = vadd.f32 %v4644_v41, %v608_v62  ;;  %v646_v37 = vadd.f32 %v4645_v36, %v645_v63 }
  0xca   : > { %v610_v47 = vadd.f32 %v4646_v45, %v609_v39  ;;  %v647_v48 = vadd.f32 %v4647_v38, %v646_v37 }
  0xcb   : > { %v347_v44 = vpop.permute.xlu1 %346  ;;  %v342_v52 = vpop.permute.xlu0 %341 }
  0xcc   : > { %vm443_vm13 = vcmp.ge.f32.partialorder %v347_v44, %v5635_v42  ;;  %vm444_vm14 = vcmp.ge.f32.partialorder %v347_v44, %v5638_v43  ;;  %vm441_vm15 = vcmp.ge.f32.partialorder %v342_v52, %v5635_v42  ;;  %vm442_vm1 = vcmp.ge.f32.partialorder %v342_v52, %v5638_v43 }
  0xcd   : > { %v4648_v40 = vsel %vm441_vm15, 1.0, %v5327_v46  ;;  %v4649_v50 = vsel %vm442_vm1, 1.0, %v5327_v46  ;;  %v4650_v55 = vsel %vm443_vm13, 1.0, %v5327_v46  ;;  %v4651_v53 = vsel %vm444_vm14, 1.0, %v5327_v46 }
  0xce   : > { %v611_v51 = vadd.f32 %v4648_v40, %v610_v47  ;;  %v648_v54 = vadd.f32 %v4649_v50, %v647_v48  ;;  %v4658_v47 = vsel %vm451_vm8, 1.0, %v5327_v46  ;;  %v4659_v48 = vsel %vm452_vm9, 1.0, %v5327_v46 }
  0xd0   : > { %v612_v56 = vadd.f32 %v4650_v55, %v611_v51  ;;  %v649_v57 = vadd.f32 %v4651_v53, %v648_v54  ;;  %v382_v55 = vpop.permute.xlu2 %381 }
  0xd1   : > { %vm457_vm14 = vcmp.ge.f32.partialorder %v382_v55, %v5635_v42  ;;  %vm458_vm15 = vcmp.ge.f32.partialorder %v382_v55, %v5638_v43 }
  0xd2   : > { %v613_v62 = vadd.f32 %v4652_v58, %v612_v56  ;;  %v650_v63 = vadd.f32 %v4653_v59, %v649_v57 }
  0xd3   : > { %v362_v60 = vpop.permute.xlu1 %361  ;;  %v357_v41 = vpop.permute.xlu0 %356 }
  0xd4   : > { %vm449_vm4 = vcmp.ge.f32.partialorder %v362_v60, %v5635_v42  ;;  %vm450_vm5 = vcmp.ge.f32.partialorder %v362_v60, %v5638_v43  ;;  %vm447_vm6 = vcmp.ge.f32.partialorder %v357_v41, %v5635_v42  ;;  %vm448_vm7 = vcmp.ge.f32.partialorder %v357_v41, %v5638_v43 }
  0xd5   : > { %v4654_v61 = vsel %vm447_vm6, 1.0, %v5327_v46  ;;  %v4655_v36 = vsel %vm448_vm7, 1.0, %v5327_v46  ;;  %v4656_v44 = vsel %vm449_vm4, 1.0, %v5327_v46  ;;  %v4657_v52 = vsel %vm450_vm5, 1.0, %v5327_v46 }
  0xd6   : > { %v614_v39 = vadd.f32 %v4654_v61, %v613_v62  ;;  %v651_v37 = vadd.f32 %v4655_v36, %v650_v63  ;;  %v4664_v63 = vsel %vm457_vm14, 1.0, %v5327_v46  ;;  %v4665_v41 = vsel %vm458_vm15, 1.0, %v5327_v46 }
  0xd7   : > { %vm668_vm5 = vcmask 1040384  }
  0xd8   : > { %v615_v45 = vadd.f32 %v4656_v44, %v614_v39  ;;  %v652_v38 = vadd.f32 %v4657_v52, %v651_v37 }
  0xda   : > { %v616_v50 = vadd.f32 %v4658_v47, %v615_v45  ;;  %v653_v51 = vadd.f32 %v4659_v48, %v652_v38 }
  0xdb   : > { %v377_v40 = vpop.permute.xlu1 %376  ;;  %v372_v54 = vpop.permute.xlu0 %371 }
  0xdc   : > { %vm455_vm10 = vcmp.ge.f32.partialorder %v377_v40, %v5635_v42  ;;  %vm456_vm11 = vcmp.ge.f32.partialorder %v377_v40, %v5638_v43  ;;  %vm453_vm12 = vcmp.ge.f32.partialorder %v372_v54, %v5635_v42  ;;  %vm454_vm13 = vcmp.ge.f32.partialorder %v372_v54, %v5638_v43 }
  0xdd   : > { %v4660_v53 = vsel %vm453_vm12, 1.0, %v5327_v46  ;;  %v4661_v56 = vsel %vm454_vm13, 1.0, %v5327_v46  ;;  %v4662_v59 = vsel %vm455_vm10, 1.0, %v5327_v46  ;;  %v4663_v49 = vsel %vm456_vm11, 1.0, %v5327_v46 }
  0xde   : > { %v617_v57 = vadd.f32 %v4660_v53, %v616_v50  ;;  %v654_v58 = vadd.f32 %v4661_v56, %v653_v51 }
  0xe0   : > { %v618_v60 = vadd.f32 %v4662_v59, %v617_v57  ;;  %v655_v62 = vadd.f32 %v4663_v49, %v654_v58 }
  0xe2   : > { %v619_v36 = vadd.f32 %v4664_v63, %v618_v60  ;;  %v656_v39 = vadd.f32 %v4665_v41, %v655_v62  ;;  %v233_v60 = vld [vmem:[#allocation2] sm:$0x3] }
  0xe3   : > { %v392_v61 = vpop.permute.xlu1 %391  ;;  %v387_v37 = vpop.permute.xlu0 %386 }
  0xe4   : > { %vm461_vm1 = vcmp.ge.f32.partialorder %v392_v61, %v5635_v42  ;;  %vm462_vm2 = vcmp.ge.f32.partialorder %v392_v61, %v5638_v43  ;;  %vm459_vm3 = vcmp.ge.f32.partialorder %v387_v37, %v5635_v42  ;;  %vm460_vm4 = vcmp.ge.f32.partialorder %v387_v37, %v5638_v43 }
  0xe5   : > { %v4666_v44 = vsel %vm459_vm3, 1.0, %v5327_v46  ;;  %v4667_v52 = vsel %vm460_vm4, 1.0, %v5327_v46  ;;  %v4668_v47 = vsel %vm461_vm1, 1.0, %v5327_v46  ;;  %v4669_v48 = vsel %vm462_vm2, 1.0, %v5327_v46 }
  0xe6   : > { %v620_v45 = vadd.f32 %v4666_v44, %v619_v36  ;;  %v657_v38 = vadd.f32 %v4667_v52, %v656_v39 }
  0xe8   : > { %v621_v40 = vadd.f32 %v4668_v47, %v620_v45  ;;  %v658_v50 = vadd.f32 %v4669_v48, %v657_v38 }
  0xea   : > { %v622_v51 = vrot.slane %v621_v40, 4  ;;  %v659_v54 = vrot.slane %v658_v50, 4 }
  0xec   : > { %v623_v55 = vadd.f32 %v622_v51, %v621_v40  ;;  %v660_v53 = vadd.f32 %v659_v54, %v658_v50 }
  0xee   : > { %v624_v56 = vrot.slane %v623_v55, 2  ;;  %v661_v42 = vrot.slane %v660_v53, 2 }
  0xf0   : > { %v625_v57 = vadd.f32 %v624_v56, %v623_v55  ;;  %v662_v43 = vadd.f32 %v661_v42, %v660_v53 }
  0xf2   : > { %v626_v58 = vrot.slane %v625_v57, 1  ;;  %v663_v59 = vrot.slane %v662_v43, 1 }
  0xf4   : > { %v664_v49 = vadd.f32 %v663_v59, %v662_v43  ;;  %v627_v62 = vadd.f32 %v626_v58, %v625_v57 }
  0xf6   : > { %v667_v63 = vrot.slane %v664_v49, 7 }
  0xf8   : > { %v669_v41 = vsel %vm668_vm5, %v627_v62, %v667_v63 }
  0xf9   : > { %v671_v61 = vadd.f32 %v669_v41, %v233_v60 }
  0xfb   : > { %672 = vst.msk [vmem:[#allocation2] sm:$0x3] %vm5452_vm0, %v671_v61 }
  0xfc PF: > { %p4670_p13 = scmp.gt.s32.totalorder %s5384_s16, 0 }
  0xfe   : > { %676 = sbr.rel (%p4670_p13) target bundleno = 481 (0x1e1), region = 40 }
 0x103   : > { %v5328_v46 = vmov 0  }
 0x104   : > { %5239 = vset.pattern.permute.xlu2 %v5328_v46  ;;  %5238 = vset.pattern.permute.xlu1 %v5328_v46 }
 0x105   : > { %5237 = vset.pattern.permute.xlu0 %v5328_v46  ;;  %700 = vperm.xlu2 %5239, %v5443_v5  }
 0x106   : > { %690 = vperm.xlu1 %5238, %v5428_v3   ;;  %680 = vperm.xlu0 %5237, %v5418_v1  }
 0x10d   : > { %705 = vperm.xlu2 %5239, %v5448_v6   ;;  %v5808_v6 = vperm.slane %v5523_v21, 0 }
 0x10e   : > { %695 = vperm.xlu1 %5238, %v5438_v4   ;;  %685 = vperm.xlu0 %5237, %v5423_v2  }
 0x115   : > { %720 = vperm.xlu2 %5239, %v5469_v10  }
 0x116   : > { %715 = vperm.xlu1 %5238, %v5464_v9   ;;  %710 = vperm.xlu0 %5237, %v5459_v8   ;;  %v5811_v8 = vperm.slane %v5523_v21, 1 }
 0x11d   : > { %735 = vperm.xlu2 %5239, %v5488_v14  }
 0x11e   : > { %730 = vperm.xlu1 %5238, %v5483_v13   ;;  %725 = vperm.xlu0 %5237, %v5478_v12   ;;  %v5329_v12 = vmov 0.0  }
 0x125   : > { %750 = vperm.xlu2 %5239, %v5503_v17  }
 0x126   : > { %745 = vperm.xlu1 %5238, %v5498_v16   ;;  %740 = vperm.xlu0 %5237, %v5493_v15  }
 0x12d   : > { %765 = vperm.xlu2 %5239, %v5521_v20  }
 0x12e   : > { %760 = vperm.xlu1 %5238, %v5516_v19   ;;  %755 = vperm.xlu0 %5237, %v5511_v18  }
 0x135   : > { %780 = vperm.xlu2 %5239, %v5538_v24  }
 0x136   : > { %775 = vperm.xlu1 %5238, %v5533_v23   ;;  %770 = vperm.xlu0 %5237, %v5528_v22  }
 0x13d   : > { %795 = vperm.xlu2 %5239, %v5553_v27  }
 0x13e   : > { %790 = vperm.xlu1 %5238, %v5548_v26   ;;  %785 = vperm.xlu0 %5237, %v5543_v25  }
 0x145   : > { %810 = vperm.xlu2 %5239, %v5573_v30  }
 0x146   : > { %805 = vperm.xlu1 %5238, %v5563_v29   ;;  %800 = vperm.xlu0 %5237, %v5558_v28  }
 0x14d   : > { %825 = vperm.xlu2 %5239, %v5588_v33  }
 0x14e   : > { %820 = vperm.xlu1 %5238, %v5583_v32   ;;  %815 = vperm.xlu0 %5237, %v5578_v31  }
 0x156   : > { %835 = vperm.xlu1 %5238, %v5598_v35   ;;  %830 = vperm.xlu0 %5237, %v5593_v34  }
 0x15f   : > { %v701_v1 = vpop.permute.xlu2 %700 }
 0x160   : > { %vm851_vm14 = vcmp.gt.f32.partialorder %v701_v1, %v5808_v6  ;;  %vm852_vm15 = vcmp.gt.f32.partialorder %v701_v1, %v5811_v8 }
 0x161   : > { %v4679_v31 = vsel %vm851_vm14, 1.0, %v5329_v12  ;;  %v4680_v32 = vsel %vm852_vm15, 1.0, %v5329_v12 }
 0x167   : > { %v706_v2 = vpop.permute.xlu2 %705 }
 0x168   : > { %vm853_vm1 = vcmp.gt.f32.partialorder %v706_v2, %v5808_v6  ;;  %vm854_vm2 = vcmp.gt.f32.partialorder %v706_v2, %v5811_v8 }
 0x169   : > { %v4681_v35 = vsel %vm853_vm1, 1.0, %v5329_v12  ;;  %v4682_v36 = vsel %vm854_vm2, 1.0, %v5329_v12 }
 0x16f   : > { %v721_v5 = vpop.permute.xlu2 %720 }
 0x177   : > { %v5825_v19 = vpop.permute.xlu2 %735 }
 0x178   : > { %v691_v3 = vpop.permute.xlu1 %690  ;;  %v681_v4 = vpop.permute.xlu0 %680  ;;  %vm866_vm14 = vcmp.gt.f32.partialorder %v5825_v19, %v5811_v8 }
 0x179   : > { %vm843_vm6 = vcmp.gt.f32.partialorder %v681_v4, %v5808_v6  ;;  %vm844_vm7 = vcmp.gt.f32.partialorder %v681_v4, %v5811_v8  ;;  %vm847_vm8 = vcmp.gt.f32.partialorder %v691_v3, %v5808_v6  ;;  %vm848_vm9 = vcmp.gt.f32.partialorder %v691_v3, %v5811_v8 }
 0x17a   : > { %v4671_v13 = vsel %vm843_vm6, 1.0, %v5329_v12  ;;  %v4672_v14 = vsel %vm844_vm7, 1.0, %v5329_v12  ;;  %v4675_v20 = vsel %vm847_vm8, 1.0, %v5329_v12  ;;  %v4676_v22 = vsel %vm848_vm9, 1.0, %v5329_v12 }
 0x17b   : > { %vm859_vm7 = vcmp.gt.f32.partialorder %v721_v5, %v5808_v6  ;;  %vm860_vm8 = vcmp.gt.f32.partialorder %v721_v5, %v5811_v8  ;;  %v4694_v3 = vsel %vm866_vm14, 1.0, %v5329_v12 }
 0x17c   : > { %v4687_v53 = vsel %vm859_vm7, 1.0, %v5329_v12  ;;  %v4688_v56 = vsel %vm860_vm8, 1.0, %v5329_v12 }
 0x17f   : > { %v751_v47 = vpop.permute.xlu2 %750 }
 0x180   : > { %v696_v9 = vpop.permute.xlu1 %695  ;;  %v686_v10 = vpop.permute.xlu0 %685 }
 0x181   : > { %vm845_vm10 = vcmp.gt.f32.partialorder %v686_v10, %v5808_v6  ;;  %vm846_vm11 = vcmp.gt.f32.partialorder %v686_v10, %v5811_v8  ;;  %vm849_vm12 = vcmp.gt.f32.partialorder %v696_v9, %v5808_v6  ;;  %vm850_vm13 = vcmp.gt.f32.partialorder %v696_v9, %v5811_v8 }
 0x182   : > { %v4673_v15 = vsel %vm845_vm10, 1.0, %v5329_v12  ;;  %v4674_v16 = vsel %vm846_vm11, 1.0, %v5329_v12  ;;  %v4677_v25 = vsel %vm849_vm12, 1.0, %v5329_v12  ;;  %v4678_v26 = vsel %vm850_vm13, 1.0, %v5329_v12 }
 0x183   : > { %v1035_v17 = vadd.f32 %v4673_v15, %v4671_v13  ;;  %v1072_v18 = vadd.f32 %v4674_v16, %v4672_v14  ;;  %vm865_vm13 = vcmp.gt.f32.partialorder %v5825_v19, %v5808_v6 }
 0x184   : > { %v4693_v2 = vsel %vm865_vm13, 1.0, %v5329_v12 }
 0x185   : > { %v1036_v23 = vadd.f32 %v4675_v20, %v1035_v17  ;;  %v1073_v24 = vadd.f32 %v4676_v22, %v1072_v18 }
 0x187   : > { %v1037_v27 = vadd.f32 %v4677_v25, %v1036_v23  ;;  %v1074_v28 = vadd.f32 %v4678_v26, %v1073_v24  ;;  %v766_v1 = vpop.permute.xlu2 %765 }
 0x188   : > { %v716_v29 = vpop.permute.xlu1 %715  ;;  %v711_v30 = vpop.permute.xlu0 %710 }
 0x189   : > { %v1038_v33 = vadd.f32 %v4679_v31, %v1037_v27  ;;  %v1075_v34 = vadd.f32 %v4680_v32, %v1074_v28  ;;  %vm855_vm3 = vcmp.gt.f32.partialorder %v711_v30, %v5808_v6  ;;  %vm856_vm4 = vcmp.gt.f32.partialorder %v711_v30, %v5811_v8 }
 0x18a   : > { %vm857_vm5 = vcmp.gt.f32.partialorder %v716_v29, %v5808_v6  ;;  %vm858_vm6 = vcmp.gt.f32.partialorder %v716_v29, %v5811_v8  ;;  %v4683_v44 = vsel %vm855_vm3, 1.0, %v5329_v12  ;;  %v4684_v52 = vsel %vm856_vm4, 1.0, %v5329_v12 }
 0x18b   : > { %v1039_v39 = vadd.f32 %v4681_v35, %v1038_v33  ;;  %v1076_v37 = vadd.f32 %v4682_v36, %v1075_v34  ;;  %v4685_v48 = vsel %vm857_vm5, 1.0, %v5329_v12  ;;  %v4686_v40 = vsel %vm858_vm6, 1.0, %v5329_v12 }
 0x18c   : > { %vm871_vm4 = vcmp.gt.f32.partialorder %v751_v47, %v5808_v6  ;;  %vm872_vm5 = vcmp.gt.f32.partialorder %v751_v47, %v5811_v8 }
 0x18d   : > { %v1040_v45 = vadd.f32 %v4683_v44, %v1039_v39  ;;  %v1077_v38 = vadd.f32 %v4684_v52, %v1076_v37  ;;  %v4699_v22 = vsel %vm871_vm4, 1.0, %v5329_v12  ;;  %v4700_v23 = vsel %vm872_vm5, 1.0, %v5329_v12 }
 0x18f   : > { %v1041_v50 = vadd.f32 %v4685_v48, %v1040_v45  ;;  %v1078_v51 = vadd.f32 %v4686_v40, %v1077_v38  ;;  %v781_v24 = vpop.permute.xlu2 %780 }
 0x190   : > { %v731_v54 = vpop.permute.xlu1 %730  ;;  %v726_v55 = vpop.permute.xlu0 %725 }
 0x191   : > { %v1042_v42 = vadd.f32 %v4687_v53, %v1041_v50  ;;  %v1079_v57 = vadd.f32 %v4688_v56, %v1078_v51  ;;  %vm863_vm9 = vcmp.gt.f32.partialorder %v731_v54, %v5808_v6  ;;  %vm864_vm10 = vcmp.gt.f32.partialorder %v731_v54, %v5811_v8 }
 0x192   : > { %vm861_vm11 = vcmp.gt.f32.partialorder %v726_v55, %v5808_v6  ;;  %vm862_vm12 = vcmp.gt.f32.partialorder %v726_v55, %v5811_v8  ;;  %v4691_v60 = vsel %vm863_vm9, 1.0, %v5329_v12  ;;  %v4692_v62 = vsel %vm864_vm10, 1.0, %v5329_v12 }
 0x193   : > { %v4689_v43 = vsel %vm861_vm11, 1.0, %v5329_v12  ;;  %v4690_v58 = vsel %vm862_vm12, 1.0, %v5329_v12  ;;  %vm877_vm10 = vcmp.gt.f32.partialorder %v766_v1, %v5808_v6  ;;  %vm878_vm11 = vcmp.gt.f32.partialorder %v766_v1, %v5811_v8 }
 0x194   : > { %v1043_v59 = vadd.f32 %v4689_v43, %v1042_v42  ;;  %v1080_v49 = vadd.f32 %v4690_v58, %v1079_v57  ;;  %v4705_v39 = vsel %vm877_vm10, 1.0, %v5329_v12  ;;  %v4706_v37 = vsel %vm878_vm11, 1.0, %v5329_v12 }
 0x196   : > { %v1044_v63 = vadd.f32 %v4691_v60, %v1043_v59  ;;  %v1081_v41 = vadd.f32 %v4692_v62, %v1080_v49 }
 0x197   : > { %v796_v47 = vpop.permute.xlu2 %795 }
 0x198   : > { %v746_v61 = vpop.permute.xlu1 %745  ;;  %v741_v46 = vpop.permute.xlu0 %740  ;;  %v1045_v4 = vadd.f32 %v4693_v2, %v1044_v63  ;;  %v1082_v5 = vadd.f32 %v4694_v3, %v1081_v41 }
 0x199   : > { %vm869_vm15 = vcmp.gt.f32.partialorder %v746_v61, %v5808_v6  ;;  %vm870_vm1 = vcmp.gt.f32.partialorder %v746_v61, %v5811_v8  ;;  %vm867_vm2 = vcmp.gt.f32.partialorder %v741_v46, %v5808_v6  ;;  %vm868_vm3 = vcmp.gt.f32.partialorder %v741_v46, %v5811_v8 }
 0x19a   : > { %v4695_v9 = vsel %vm867_vm2, 1.0, %v5329_v12  ;;  %v4696_v10 = vsel %vm868_vm3, 1.0, %v5329_v12  ;;  %v4697_v15 = vsel %vm869_vm15, 1.0, %v5329_v12  ;;  %v4698_v16 = vsel %vm870_vm1, 1.0, %v5329_v12 }
 0x19b   : > { %v1046_v13 = vadd.f32 %v4695_v9, %v1045_v4  ;;  %v1083_v14 = vadd.f32 %v4696_v10, %v1082_v5  ;;  %vm883_vm1 = vcmp.gt.f32.partialorder %v781_v24, %v5808_v6  ;;  %vm884_vm2 = vcmp.gt.f32.partialorder %v781_v24, %v5811_v8 }
 0x19c   : > { %v4711_v42 = vsel %vm883_vm1, 1.0, %v5329_v12  ;;  %v4712_v57 = vsel %vm884_vm2, 1.0, %v5329_v12 }
 0x19d   : > { %v1047_v17 = vadd.f32 %v4697_v15, %v1046_v13  ;;  %v1084_v18 = vadd.f32 %v4698_v16, %v1083_v14 }
 0x19f   : > { %v1048_v25 = vadd.f32 %v4699_v22, %v1047_v17  ;;  %v1085_v26 = vadd.f32 %v4700_v23, %v1084_v18  ;;  %v811_v3 = vpop.permute.xlu2 %810 }
 0x1a0   : > { %v761_v19 = vpop.permute.xlu1 %760  ;;  %v756_v20 = vpop.permute.xlu0 %755 }
 0x1a1   : > { %vm875_vm6 = vcmp.gt.f32.partialorder %v761_v19, %v5808_v6  ;;  %vm876_vm7 = vcmp.gt.f32.partialorder %v761_v19, %v5811_v8  ;;  %vm873_vm8 = vcmp.gt.f32.partialorder %v756_v20, %v5808_v6  ;;  %vm874_vm9 = vcmp.gt.f32.partialorder %v756_v20, %v5811_v8 }
 0x1a2   : > { %v4701_v27 = vsel %vm873_vm8, 1.0, %v5329_v12  ;;  %v4702_v28 = vsel %vm874_vm9, 1.0, %v5329_v12  ;;  %v4703_v31 = vsel %vm875_vm6, 1.0, %v5329_v12  ;;  %v4704_v32 = vsel %vm876_vm7, 1.0, %v5329_v12 }
 0x1a3   : > { %v1049_v29 = vadd.f32 %v4701_v27, %v1048_v25  ;;  %v1086_v30 = vadd.f32 %v4702_v28, %v1085_v26  ;;  %vm889_vm7 = vcmp.gt.f32.partialorder %v796_v47, %v5808_v6  ;;  %vm890_vm8 = vcmp.gt.f32.partialorder %v796_v47, %v5811_v8 }
 0x1a4   : > { %v4717_v1 = vsel %vm889_vm7, 1.0, %v5329_v12  ;;  %v4718_v2 = vsel %vm890_vm8, 1.0, %v5329_v12 }
 0x1a5   : > { %v1050_v33 = vadd.f32 %v4703_v31, %v1049_v29  ;;  %v1087_v34 = vadd.f32 %v4704_v32, %v1086_v30 }
 0x1a7   : > { %v1051_v44 = vadd.f32 %v4705_v39, %v1050_v33  ;;  %v1088_v52 = vadd.f32 %v4706_v37, %v1087_v34  ;;  %v826_v28 = vpop.permute.xlu2 %825 }
 0x1a8   : > { %v776_v35 = vpop.permute.xlu1 %775  ;;  %v771_v36 = vpop.permute.xlu0 %770 }
 0x1a9   : > { %vm881_vm12 = vcmp.gt.f32.partialorder %v776_v35, %v5808_v6  ;;  %vm882_vm13 = vcmp.gt.f32.partialorder %v776_v35, %v5811_v8  ;;  %vm879_vm14 = vcmp.gt.f32.partialorder %v771_v36, %v5808_v6  ;;  %vm880_vm15 = vcmp.gt.f32.partialorder %v771_v36, %v5811_v8 }
 0x1aa   : > { %v4707_v45 = vsel %vm879_vm14, 1.0, %v5329_v12  ;;  %v4708_v38 = vsel %vm880_vm15, 1.0, %v5329_v12  ;;  %v4709_v50 = vsel %vm881_vm12, 1.0, %v5329_v12  ;;  %v4710_v51 = vsel %vm882_vm13, 1.0, %v5329_v12 }
 0x1ab   : > { %v1052_v48 = vadd.f32 %v4707_v45, %v1051_v44  ;;  %v1089_v40 = vadd.f32 %v4708_v38, %v1088_v52  ;;  %vm895_vm13 = vcmp.gt.f32.partialorder %v811_v3, %v5808_v6  ;;  %vm896_vm14 = vcmp.gt.f32.partialorder %v811_v3, %v5811_v8 }
 0x1ac   : > { %v4723_v22 = vsel %vm895_vm13, 1.0, %v5329_v12  ;;  %v4724_v23 = vsel %vm896_vm14, 1.0, %v5329_v12 }
 0x1ad   : > { %v1053_v54 = vadd.f32 %v4709_v50, %v1052_v48  ;;  %v1090_v55 = vadd.f32 %v4710_v51, %v1089_v40 }
 0x1af   : > { %v1054_v43 = vadd.f32 %v4711_v42, %v1053_v54  ;;  %v1091_v58 = vadd.f32 %v4712_v57, %v1090_v55 }
 0x1b0   : > { %v791_v53 = vpop.permute.xlu1 %790  ;;  %v786_v56 = vpop.permute.xlu0 %785 }
 0x1b1   : > { %vm887_vm3 = vcmp.gt.f32.partialorder %v791_v53, %v5808_v6  ;;  %vm888_vm4 = vcmp.gt.f32.partialorder %v791_v53, %v5811_v8  ;;  %vm885_vm5 = vcmp.gt.f32.partialorder %v786_v56, %v5808_v6  ;;  %vm886_vm6 = vcmp.gt.f32.partialorder %v786_v56, %v5811_v8 }
 0x1b2   : > { %v4713_v59 = vsel %vm885_vm5, 1.0, %v5329_v12  ;;  %v4714_v49 = vsel %vm886_vm6, 1.0, %v5329_v12  ;;  %v4715_v63 = vsel %vm887_vm3, 1.0, %v5329_v12  ;;  %v4716_v41 = vsel %vm888_vm4, 1.0, %v5329_v12 }
 0x1b3   : > { %v1055_v60 = vadd.f32 %v4713_v59, %v1054_v43  ;;  %v1092_v62 = vadd.f32 %v4714_v49, %v1091_v58  ;;  %vm901_vm4 = vcmp.gt.f32.partialorder %v826_v28, %v5808_v6  ;;  %vm902_vm5 = vcmp.gt.f32.partialorder %v826_v28, %v5811_v8 }
 0x1b4   : > { %v4729_v39 = vsel %vm901_vm4, 1.0, %v5329_v12  ;;  %v4730_v37 = vsel %vm902_vm5, 1.0, %v5329_v12 }
 0x1b5   : > { %v1056_v61 = vadd.f32 %v4715_v63, %v1055_v60  ;;  %v1093_v46 = vadd.f32 %v4716_v41, %v1092_v62  ;;  %v677_v63 = vld [vmem:[#allocation2] sm:$0x3] }
 0x1b7   : > { %v1057_v5 = vadd.f32 %v4717_v1, %v1056_v61  ;;  %v1094_v9 = vadd.f32 %v4718_v2, %v1093_v46 }
 0x1b8   : > { %v806_v4 = vpop.permute.xlu1 %805  ;;  %v801_v10 = vpop.permute.xlu0 %800 }
 0x1b9   : > { %vm893_vm9 = vcmp.gt.f32.partialorder %v806_v4, %v5808_v6  ;;  %vm894_vm10 = vcmp.gt.f32.partialorder %v806_v4, %v5811_v8  ;;  %vm891_vm11 = vcmp.gt.f32.partialorder %v801_v10, %v5808_v6  ;;  %vm892_vm12 = vcmp.gt.f32.partialorder %v801_v10, %v5811_v8 }
 0x1ba   : > { %v4719_v13 = vsel %vm891_vm11, 1.0, %v5329_v12  ;;  %v4720_v14 = vsel %vm892_vm12, 1.0, %v5329_v12  ;;  %v4721_v17 = vsel %vm893_vm9, 1.0, %v5329_v12  ;;  %v4722_v18 = vsel %vm894_vm10, 1.0, %v5329_v12 }
 0x1bb   : > { %v1058_v15 = vadd.f32 %v4719_v13, %v1057_v5  ;;  %v1095_v16 = vadd.f32 %v4720_v14, %v1094_v9  ;;  %vm1112_vm10 = vcmask 1040384  }
 0x1bd   : > { %v1059_v19 = vadd.f32 %v4721_v17, %v1058_v15  ;;  %v1096_v20 = vadd.f32 %v4722_v18, %v1095_v16 }
 0x1bf   : > { %v1060_v25 = vadd.f32 %v4723_v22, %v1059_v19  ;;  %v1097_v26 = vadd.f32 %v4724_v23, %v1096_v20 }
 0x1c0   : > { %v821_v24 = vpop.permute.xlu1 %820  ;;  %v816_v27 = vpop.permute.xlu0 %815 }
 0x1c1   : > { %vm899_vm15 = vcmp.gt.f32.partialorder %v821_v24, %v5808_v6  ;;  %vm900_vm1 = vcmp.gt.f32.partialorder %v821_v24, %v5811_v8  ;;  %vm897_vm2 = vcmp.gt.f32.partialorder %v816_v27, %v5808_v6  ;;  %vm898_vm3 = vcmp.gt.f32.partialorder %v816_v27, %v5811_v8 }
 0x1c2   : > { %v4725_v29 = vsel %vm897_vm2, 1.0, %v5329_v12  ;;  %v4726_v30 = vsel %vm898_vm3, 1.0, %v5329_v12  ;;  %v4727_v33 = vsel %vm899_vm15, 1.0, %v5329_v12  ;;  %v4728_v34 = vsel %vm900_vm1, 1.0, %v5329_v12 }
 0x1c3   : > { %v1061_v31 = vadd.f32 %v4725_v29, %v1060_v25  ;;  %v1098_v32 = vadd.f32 %v4726_v30, %v1097_v26 }
 0x1c5   : > { %v1062_v35 = vadd.f32 %v4727_v33, %v1061_v31  ;;  %v1099_v36 = vadd.f32 %v4728_v34, %v1098_v32 }
 0x1c7   : > { %v1063_v52 = vadd.f32 %v4729_v39, %v1062_v35  ;;  %v1100_v45 = vadd.f32 %v4730_v37, %v1099_v36 }
 0x1c8   : > { %v836_v44 = vpop.permute.xlu1 %835  ;;  %v831_v38 = vpop.permute.xlu0 %830 }
 0x1c9   : > { %vm905_vm6 = vcmp.gt.f32.partialorder %v836_v44, %v5808_v6  ;;  %vm906_vm7 = vcmp.gt.f32.partialorder %v836_v44, %v5811_v8  ;;  %vm903_vm8 = vcmp.gt.f32.partialorder %v831_v38, %v5808_v6  ;;  %vm904_vm9 = vcmp.gt.f32.partialorder %v831_v38, %v5811_v8 }
 0x1ca   : > { %v4731_v47 = vsel %vm903_vm8, 1.0, %v5329_v12  ;;  %v4732_v48 = vsel %vm904_vm9, 1.0, %v5329_v12  ;;  %v4733_v51 = vsel %vm905_vm6, 1.0, %v5329_v12  ;;  %v4734_v54 = vsel %vm906_vm7, 1.0, %v5329_v12 }
 0x1cb   : > { %v1064_v40 = vadd.f32 %v4731_v47, %v1063_v52  ;;  %v1101_v50 = vadd.f32 %v4732_v48, %v1100_v45 }
 0x1cd   : > { %v1065_v55 = vadd.f32 %v4733_v51, %v1064_v40  ;;  %v1102_v53 = vadd.f32 %v4734_v54, %v1101_v50 }
 0x1cf   : > { %v1066_v56 = vrot.slane %v1065_v55, 4  ;;  %v1103_v42 = vrot.slane %v1102_v53, 4 }
 0x1d1   : > { %v1067_v57 = vadd.f32 %v1066_v56, %v1065_v55  ;;  %v1104_v43 = vadd.f32 %v1103_v42, %v1102_v53 }
 0x1d3   : > { %v1068_v58 = vrot.slane %v1067_v57, 2  ;;  %v1105_v6 = vrot.slane %v1104_v43, 2 }
 0x1d5   : > { %v1069_v59 = vadd.f32 %v1068_v58, %v1067_v57  ;;  %v1106_v8 = vadd.f32 %v1105_v6, %v1104_v43 }
 0x1d7   : > { %v1070_v49 = vrot.slane %v1069_v59, 1  ;;  %v1107_v60 = vrot.slane %v1106_v8, 1 }
 0x1d9   : > { %v1108_v62 = vadd.f32 %v1107_v60, %v1106_v8  ;;  %v1071_v41 = vadd.f32 %v1070_v49, %v1069_v59 }
 0x1db   : > { %v1111_v61 = vrot.slane %v1108_v62, 7 }
 0x1dd   : > { %v1113_v46 = vsel %vm1112_vm10, %v1071_v41, %v1111_v61 }
 0x1de   : > { %v1115_v1 = vadd.f32 %v1113_v46, %v677_v63 }
 0x1e0   : > { %1116 = vst.msk [vmem:[#allocation2] sm:$0x3] %vm5452_vm0, %v1115_v1 }
 0x1e1 PF: > { %v5950_v12 = vld [vmem:[%s7814_s1 + $0x100] sm:$0xff]  ;;  %v5955_v2 = vld [vmem:[%s7814_s1 + $0x108] sm:$0xff]  ;;  %v5960_v3 = vld [vmem:[%s7814_s1 + $0x110] sm:$0xff]  ;;  %p4735_p0 = scmp.le.s32.totalorder %s5384_s16, 1 }
 0x1e2   : > { %v5965_v4 = vld [vmem:[%s7814_s1 + $0x118] sm:$0xff]  ;;  %v5970_v5 = vld [vmem:[%s7814_s1 + $0x120] sm:$0xff]  ;;  %v5975_v9 = vld [vmem:[%s7814_s1 + $0x128] sm:$0xff] }
 0x1e3   : > { %v5980_v10 = vld [vmem:[%s7814_s1 + $0x130] sm:$0xff]  ;;  %v5985_v13 = vld [vmem:[%s7814_s1 + $0x138] sm:$0xff]  ;;  %v5990_v14 = vld [vmem:[%s7814_s1 + $0x140] sm:$0xff] }
 0x1e4   : > { %v5995_v15 = vld [vmem:[%s7814_s1 + $0x148] sm:$0xff]  ;;  %v6000_v16 = vld [vmem:[%s7814_s1 + $0x150] sm:$0xff]  ;;  %v6005_v17 = vld [vmem:[%s7814_s1 + $0x158] sm:$0xff] }
 0x1e5   : > { %v6010_v18 = vld [vmem:[%s7814_s1 + $0x160] sm:$0xff]  ;;  %v6015_v19 = vld [vmem:[%s7814_s1 + $0x168] sm:$0xff]  ;;  %v6020_v20 = vld [vmem:[%s7814_s1 + $0x170] sm:$0xff] }
 0x1e6   : > { %v6025_v22 = vld [vmem:[%s7814_s1 + $0x178] sm:$0xff]  ;;  %v6030_v23 = vld [vmem:[%s7814_s1 + $0x180] sm:$0xff]  ;;  %v6035_v24 = vld [vmem:[%s7814_s1 + $0x188] sm:$0xff] }
 0x1e7   : > { %v6040_v25 = vld [vmem:[%s7814_s1 + $0x190] sm:$0xff]  ;;  %v6045_v26 = vld [vmem:[%s7814_s1 + $0x198] sm:$0xff]  ;;  %v6050_v27 = vld [vmem:[%s7814_s1 + $0x1a0] sm:$0xff]  ;;  %1152 = sbr.rel (%p4735_p0) target bundleno = 714 (0x2ca), region = 44 }
 0x1e8   : > { %v6055_v28 = vld [vmem:[%s7814_s1 + $0x1a8] sm:$0xff]  ;;  %v6060_v29 = vld [vmem:[%s7814_s1 + $0x1b0] sm:$0xff]  ;;  %v6065_v30 = vld [vmem:[%s7814_s1 + $0x1b8] sm:$0xff] }
 0x1e9   : > { %v6070_v31 = vld [vmem:[%s7814_s1 + $0x1c0] sm:$0xff]  ;;  %v6075_v32 = vld [vmem:[%s7814_s1 + $0x1c8] sm:$0xff]  ;;  %v6080_v33 = vld [vmem:[%s7814_s1 + $0x1d0] sm:$0xff] }
 0x1ea   : > { %v6085_v34 = vld [vmem:[%s7814_s1 + $0x1d8] sm:$0xff]  ;;  %v6090_v35 = vld [vmem:[%s7814_s1 + $0x1e0] sm:$0xff]  ;;  %v6095_v36 = vld [vmem:[%s7814_s1 + $0x1e8] sm:$0xff] }
 0x1eb   : > { %v6100_v39 = vld [vmem:[%s7814_s1 + $0x1f0] sm:$0xff]  ;;  %v6105_v37 = vld [vmem:[%s7814_s1 + $0x1f8] sm:$0xff] }
 0x1ec   : > { %v5330_v44 = vmov 0   ;;  %v6141_v40 = vperm.slane %v5523_v21, 0  ;;  %v6144_v50 = vperm.slane %v5523_v21, 1  ;;  %v5331_v55 = vmov 0.0  }
 0x1ed   : > { %5242 = vset.pattern.permute.xlu2 %v5330_v44  ;;  %5241 = vset.pattern.permute.xlu1 %v5330_v44 }
 0x1ee   : > { %5240 = vset.pattern.permute.xlu0 %v5330_v44  ;;  %1176 = vperm.xlu2 %5242, %v5970_v5  }
 0x1ef   : > { %1166 = vperm.xlu1 %5241, %v5960_v3   ;;  %1156 = vperm.xlu0 %5240, %v5950_v12  }
 0x1f6   : > { %1181 = vperm.xlu2 %5242, %v5975_v9  }
 0x1f7   : > { %1171 = vperm.xlu1 %5241, %v5965_v4   ;;  %1161 = vperm.xlu0 %5240, %v5955_v2  }
 0x1fe   : > { %1196 = vperm.xlu2 %5242, %v5990_v14  }
 0x1ff   : > { %1191 = vperm.xlu1 %5241, %v5985_v13   ;;  %1186 = vperm.xlu0 %5240, %v5980_v10  }
 0x206   : > { %1211 = vperm.xlu2 %5242, %v6005_v17  }
 0x207   : > { %1206 = vperm.xlu1 %5241, %v6000_v16   ;;  %1201 = vperm.xlu0 %5240, %v5995_v15  }
 0x20e   : > { %1226 = vperm.xlu2 %5242, %v6020_v20  }
 0x20f   : > { %1221 = vperm.xlu1 %5241, %v6015_v19   ;;  %1216 = vperm.xlu0 %5240, %v6010_v18  }
 0x216   : > { %1241 = vperm.xlu2 %5242, %v6035_v24  }
 0x217   : > { %1236 = vperm.xlu1 %5241, %v6030_v23   ;;  %1231 = vperm.xlu0 %5240, %v6025_v22  }
 0x21e   : > { %1256 = vperm.xlu2 %5242, %v6050_v27  }
 0x21f   : > { %1251 = vperm.xlu1 %5241, %v6045_v26   ;;  %1246 = vperm.xlu0 %5240, %v6040_v25  }
 0x226   : > { %1271 = vperm.xlu2 %5242, %v6065_v30  }
 0x227   : > { %1266 = vperm.xlu1 %5241, %v6060_v29   ;;  %1261 = vperm.xlu0 %5240, %v6055_v28  }
 0x22e   : > { %1286 = vperm.xlu2 %5242, %v6080_v33  }
 0x22f   : > { %1281 = vperm.xlu1 %5241, %v6075_v32   ;;  %1276 = vperm.xlu0 %5240, %v6070_v31  }
 0x236   : > { %1301 = vperm.xlu2 %5242, %v6095_v36  }
 0x237   : > { %1296 = vperm.xlu1 %5241, %v6090_v35   ;;  %1291 = vperm.xlu0 %5240, %v6085_v34  }
 0x23f   : > { %1311 = vperm.xlu1 %5241, %v6105_v37   ;;  %1306 = vperm.xlu0 %5240, %v6100_v39  }
 0x248   : > { %v1177_v52 = vpop.permute.xlu2 %1176 }
 0x249   : > { %vm1327_vm4 = vcmp.ge.f32.partialorder %v1177_v52, %v6141_v40  ;;  %vm1328_vm5 = vcmp.ge.f32.partialorder %v1177_v52, %v6144_v50 }
 0x24a   : > { %v4744_v44 = vsel %vm1327_vm4, 1.0, %v5331_v55 }
 0x250   : > { %v1182_v45 = vpop.permute.xlu2 %1181 }
 0x251   : > { %vm1329_vm6 = vcmp.ge.f32.partialorder %v1182_v45, %v6141_v40  ;;  %vm1330_vm7 = vcmp.ge.f32.partialorder %v1182_v45, %v6144_v50 }
 0x258   : > { %v1197_v48 = vpop.permute.xlu2 %1196 }
 0x260   : > { %v6158_v6 = vpop.permute.xlu2 %1211 }
 0x261   : > { %v1167_v38 = vpop.permute.xlu1 %1166  ;;  %v1157_v47 = vpop.permute.xlu0 %1156  ;;  %vm1342_vm4 = vcmp.ge.f32.partialorder %v6158_v6, %v6144_v50 }
 0x262   : > { %vm1319_vm11 = vcmp.ge.f32.partialorder %v1157_v47, %v6141_v40  ;;  %vm1320_vm12 = vcmp.ge.f32.partialorder %v1157_v47, %v6144_v50  ;;  %vm1323_vm13 = vcmp.ge.f32.partialorder %v1167_v38, %v6141_v40  ;;  %vm1324_vm14 = vcmp.ge.f32.partialorder %v1167_v38, %v6144_v50 }
 0x263   : > { %v4736_v53 = vsel %vm1319_vm11, 1.0, %v5331_v55  ;;  %v4737_v56 = vsel %vm1320_vm12, 1.0, %v5331_v55  ;;  %v4740_v59 = vsel %vm1323_vm13, 1.0, %v5331_v55  ;;  %v4741_v8 = vsel %vm1324_vm14, 1.0, %v5331_v55 }
 0x264   : > { %v4745_v38 = vsel %vm1328_vm5, 1.0, %v5331_v55  ;;  %vm1335_vm12 = vcmp.ge.f32.partialorder %v1197_v48, %v6141_v40  ;;  %vm1336_vm13 = vcmp.ge.f32.partialorder %v1197_v48, %v6144_v50 }
 0x269   : > { %v1172_v51 = vpop.permute.xlu1 %1171  ;;  %v1162_v54 = vpop.permute.xlu0 %1161 }
 0x26a   : > { %vm1321_vm15 = vcmp.ge.f32.partialorder %v1162_v54, %v6141_v40  ;;  %vm1322_vm1 = vcmp.ge.f32.partialorder %v1162_v54, %v6144_v50  ;;  %vm1325_vm2 = vcmp.ge.f32.partialorder %v1172_v51, %v6141_v40  ;;  %vm1326_vm3 = vcmp.ge.f32.partialorder %v1172_v51, %v6144_v50 }
 0x26b   : > { %v4738_v42 = vsel %vm1321_vm15, 1.0, %v5331_v55  ;;  %v4739_v57 = vsel %vm1322_vm1, 1.0, %v5331_v55  ;;  %v4742_v62 = vsel %vm1325_vm2, 1.0, %v5331_v55  ;;  %v4743_v63 = vsel %vm1326_vm3, 1.0, %v5331_v55 }
 0x26c   : > { %v1511_v43 = vadd.f32 %v4738_v42, %v4736_v53  ;;  %v1548_v58 = vadd.f32 %v4739_v57, %v4737_v56  ;;  %v4746_v51 = vsel %vm1329_vm6, 1.0, %v5331_v55  ;;  %v4747_v54 = vsel %vm1330_vm7, 1.0, %v5331_v55 }
 0x26d   : > { %vm1341_vm3 = vcmp.ge.f32.partialorder %v6158_v6, %v6141_v40 }
 0x26e   : > { %v1512_v49 = vadd.f32 %v4740_v59, %v1511_v43  ;;  %v1549_v60 = vadd.f32 %v4741_v8, %v1548_v58  ;;  %v1227_v58 = vpop.permute.xlu2 %1226 }
 0x270   : > { %v1513_v41 = vadd.f32 %v4742_v62, %v1512_v49  ;;  %v1550_v61 = vadd.f32 %v4743_v63, %v1549_v60 }
 0x271   : > { %v1192_v46 = vpop.permute.xlu1 %1191  ;;  %v1187_v1 = vpop.permute.xlu0 %1186 }
 0x272   : > { %v1514_v47 = vadd.f32 %v4744_v44, %v1513_v41  ;;  %v1551_v52 = vadd.f32 %v4745_v38, %v1550_v61  ;;  %vm1331_vm8 = vcmp.ge.f32.partialorder %v1187_v1, %v6141_v40  ;;  %vm1332_vm9 = vcmp.ge.f32.partialorder %v1187_v1, %v6144_v50 }
 0x273   : > { %vm1333_vm10 = vcmp.ge.f32.partialorder %v1192_v46, %v6141_v40  ;;  %vm1334_vm11 = vcmp.ge.f32.partialorder %v1192_v46, %v6144_v50  ;;  %v4748_v56 = vsel %vm1331_vm8, 1.0, %v5331_v55  ;;  %v4749_v42 = vsel %vm1332_vm9, 1.0, %v5331_v55 }
 0x274   : > { %v1515_v45 = vadd.f32 %v4746_v51, %v1514_v47  ;;  %v1552_v53 = vadd.f32 %v4747_v54, %v1551_v52  ;;  %v4750_v59 = vsel %vm1333_vm10, 1.0, %v5331_v55  ;;  %v4751_v8 = vsel %vm1334_vm11, 1.0, %v5331_v55 }
 0x275   : > { %v4752_v41 = vsel %vm1335_vm12, 1.0, %v5331_v55  ;;  %v4753_v61 = vsel %vm1336_vm13, 1.0, %v5331_v55  ;;  %vm1347_vm9 = vcmp.ge.f32.partialorder %v1227_v58, %v6141_v40  ;;  %vm1348_vm10 = vcmp.ge.f32.partialorder %v1227_v58, %v6144_v50 }
 0x276   : > { %v1516_v57 = vadd.f32 %v4748_v56, %v1515_v45  ;;  %v1553_v43 = vadd.f32 %v4749_v42, %v1552_v53  ;;  %v1242_v42 = vpop.permute.xlu2 %1241 }
 0x278   : > { %v1517_v49 = vadd.f32 %v4750_v59, %v1516_v57  ;;  %v1554_v60 = vadd.f32 %v4751_v8, %v1553_v43  ;;  %v4758_v57 = vsel %vm1341_vm3, 1.0, %v5331_v55  ;;  %v4759_v43 = vsel %vm1342_vm4, 1.0, %v5331_v55 }
 0x279   : > { %v1207_v62 = vpop.permute.xlu1 %1206  ;;  %v1202_v63 = vpop.permute.xlu0 %1201 }
 0x27a   : > { %v1518_v46 = vadd.f32 %v4752_v41, %v1517_v49  ;;  %v1555_v1 = vadd.f32 %v4753_v61, %v1554_v60  ;;  %vm1339_vm14 = vcmp.ge.f32.partialorder %v1207_v62, %v6141_v40  ;;  %vm1340_vm15 = vcmp.ge.f32.partialorder %v1207_v62, %v6144_v50 }
 0x27b   : > { %vm1337_vm1 = vcmp.ge.f32.partialorder %v1202_v63, %v6141_v40  ;;  %vm1338_vm2 = vcmp.ge.f32.partialorder %v1202_v63, %v6144_v50  ;;  %v4756_v52 = vsel %vm1339_vm14, 1.0, %v5331_v55  ;;  %v4757_v51 = vsel %vm1340_vm15, 1.0, %v5331_v55 }
 0x27c   : > { %v4754_v48 = vsel %vm1337_vm1, 1.0, %v5331_v55  ;;  %v4755_v44 = vsel %vm1338_vm2, 1.0, %v5331_v55  ;;  %vm1353_vm15 = vcmp.ge.f32.partialorder %v1242_v42, %v6141_v40  ;;  %vm1354_vm1 = vcmp.ge.f32.partialorder %v1242_v42, %v6144_v50 }
 0x27d   : > { %v1519_v38 = vadd.f32 %v4754_v48, %v1518_v46  ;;  %v1556_v47 = vadd.f32 %v4755_v44, %v1555_v1  ;;  %v4764_v44 = vsel %vm1347_vm9, 1.0, %v5331_v55 }
 0x27f   : > { %v1520_v54 = vadd.f32 %v4756_v52, %v1519_v38  ;;  %v1557_v45 = vadd.f32 %v4757_v51, %v1556_v47  ;;  %v4765_v38 = vsel %vm1348_vm10, 1.0, %v5331_v55  ;;  %v1257_v47 = vpop.permute.xlu2 %1256 }
 0x281   : > { %v1222_v53 = vpop.permute.xlu1 %1221  ;;  %v1217_v56 = vpop.permute.xlu0 %1216  ;;  %v1521_v59 = vadd.f32 %v4758_v57, %v1520_v54  ;;  %v1558_v8 = vadd.f32 %v4759_v43, %v1557_v45 }
 0x282   : > { %vm1345_vm5 = vcmp.ge.f32.partialorder %v1222_v53, %v6141_v40  ;;  %vm1346_vm6 = vcmp.ge.f32.partialorder %v1222_v53, %v6144_v50  ;;  %vm1343_vm7 = vcmp.ge.f32.partialorder %v1217_v56, %v6141_v40  ;;  %vm1344_vm8 = vcmp.ge.f32.partialorder %v1217_v56, %v6144_v50 }
 0x283   : > { %v4760_v6 = vsel %vm1343_vm7, 1.0, %v5331_v55  ;;  %v4761_v49 = vsel %vm1344_vm8, 1.0, %v5331_v55  ;;  %v4762_v63 = vsel %vm1345_vm5, 1.0, %v5331_v55  ;;  %v4763_v41 = vsel %vm1346_vm6, 1.0, %v5331_v55 }
 0x284   : > { %v1522_v60 = vadd.f32 %v4760_v6, %v1521_v59  ;;  %v1559_v62 = vadd.f32 %v4761_v49, %v1558_v8  ;;  %v4770_v49 = vsel %vm1353_vm15, 1.0, %v5331_v55  ;;  %vm1359_vm6 = vcmp.ge.f32.partialorder %v1257_v47, %v6141_v40 }
 0x285   : > { %vm1360_vm7 = vcmp.ge.f32.partialorder %v1257_v47, %v6144_v50 }
 0x286   : > { %v1523_v61 = vadd.f32 %v4762_v63, %v1522_v60  ;;  %v1560_v46 = vadd.f32 %v4763_v41, %v1559_v62  ;;  %v4771_v60 = vsel %vm1354_vm1, 1.0, %v5331_v55 }
 0x288   : > { %v1524_v52 = vadd.f32 %v4764_v44, %v1523_v61  ;;  %v1561_v51 = vadd.f32 %v4765_v38, %v1560_v46  ;;  %v1272_v61 = vpop.permute.xlu2 %1271 }
 0x289   : > { %v1237_v1 = vpop.permute.xlu1 %1236  ;;  %v1232_v48 = vpop.permute.xlu0 %1231 }
 0x28a   : > { %vm1351_vm11 = vcmp.ge.f32.partialorder %v1237_v1, %v6141_v40  ;;  %vm1352_vm12 = vcmp.ge.f32.partialorder %v1237_v1, %v6144_v50  ;;  %vm1349_vm13 = vcmp.ge.f32.partialorder %v1232_v48, %v6141_v40  ;;  %vm1350_vm14 = vcmp.ge.f32.partialorder %v1232_v48, %v6144_v50 }
 0x28b   : > { %v4766_v58 = vsel %vm1349_vm13, 1.0, %v5331_v55  ;;  %v4767_v54 = vsel %vm1350_vm14, 1.0, %v5331_v55  ;;  %v4768_v56 = vsel %vm1351_vm11, 1.0, %v5331_v55  ;;  %v4769_v57 = vsel %vm1352_vm12, 1.0, %v5331_v55 }
 0x28c   : > { %v1525_v45 = vadd.f32 %v4766_v58, %v1524_v52  ;;  %v1562_v53 = vadd.f32 %v4767_v54, %v1561_v51  ;;  %v4776_v54 = vsel %vm1359_vm6, 1.0, %v5331_v55  ;;  %vm1365_vm12 = vcmp.ge.f32.partialorder %v1272_v61, %v6141_v40 }
 0x28d   : > { %vm1366_vm13 = vcmp.ge.f32.partialorder %v1272_v61, %v6144_v50 }
 0x28e   : > { %v1526_v43 = vadd.f32 %v4768_v56, %v1525_v45  ;;  %v1563_v59 = vadd.f32 %v4769_v57, %v1562_v53  ;;  %v4777_v45 = vsel %vm1360_vm7, 1.0, %v5331_v55 }
 0x290   : > { %v1527_v62 = vadd.f32 %v4770_v49, %v1526_v43  ;;  %v1564_v63 = vadd.f32 %v4771_v60, %v1563_v59 }
 0x291   : > { %v1252_v8 = vpop.permute.xlu1 %1251  ;;  %v1247_v6 = vpop.permute.xlu0 %1246 }
 0x292   : > { %vm1357_vm2 = vcmp.ge.f32.partialorder %v1252_v8, %v6141_v40  ;;  %vm1358_vm3 = vcmp.ge.f32.partialorder %v1252_v8, %v6144_v50  ;;  %vm1355_vm4 = vcmp.ge.f32.partialorder %v1247_v6, %v6141_v40  ;;  %vm1356_vm5 = vcmp.ge.f32.partialorder %v1247_v6, %v6144_v50 }
 0x293   : > { %v4772_v42 = vsel %vm1355_vm4, 1.0, %v5331_v55  ;;  %v4773_v41 = vsel %vm1356_vm5, 1.0, %v5331_v55  ;;  %v4774_v48 = vsel %vm1357_vm2, 1.0, %v5331_v55  ;;  %v4775_v44 = vsel %vm1358_vm3, 1.0, %v5331_v55 }
 0x294   : > { %v1528_v46 = vadd.f32 %v4772_v42, %v1527_v62  ;;  %v1565_v1 = vadd.f32 %v4773_v41, %v1564_v63  ;;  %v4782_v62 = vsel %vm1365_vm12, 1.0, %v5331_v55  ;;  %v4783_v63 = vsel %vm1366_vm13, 1.0, %v5331_v55  ;;  %v1287_v42 = vpop.permute.xlu2 %1286 }
 0x295   : > { %vm1371_vm3 = vcmp.ge.f32.partialorder %v1287_v42, %v6141_v40  ;;  %vm1372_vm4 = vcmp.ge.f32.partialorder %v1287_v42, %v6144_v50 }
 0x296   : > { %v1529_v38 = vadd.f32 %v4774_v48, %v1528_v46  ;;  %v1566_v52 = vadd.f32 %v4775_v44, %v1565_v1 }
 0x298   : > { %v1530_v53 = vadd.f32 %v4776_v54, %v1529_v38  ;;  %v1567_v56 = vadd.f32 %v4777_v45, %v1566_v52 }
 0x299   : > { %v1267_v51 = vpop.permute.xlu1 %1266  ;;  %v1262_v58 = vpop.permute.xlu0 %1261 }
 0x29a   : > { %vm1363_vm8 = vcmp.ge.f32.partialorder %v1267_v51, %v6141_v40  ;;  %vm1364_vm9 = vcmp.ge.f32.partialorder %v1267_v51, %v6144_v50  ;;  %vm1361_vm10 = vcmp.ge.f32.partialorder %v1262_v58, %v6141_v40  ;;  %vm1362_vm11 = vcmp.ge.f32.partialorder %v1262_v58, %v6144_v50 }
 0x29b   : > { %v4778_v47 = vsel %vm1361_vm10, 1.0, %v5331_v55  ;;  %v4779_v57 = vsel %vm1362_vm11, 1.0, %v5331_v55  ;;  %v4780_v8 = vsel %vm1363_vm8, 1.0, %v5331_v55  ;;  %v4781_v6 = vsel %vm1364_vm9, 1.0, %v5331_v55 }
 0x29c   : > { %v1531_v43 = vadd.f32 %v4778_v47, %v1530_v53  ;;  %v1568_v59 = vadd.f32 %v4779_v57, %v1567_v56  ;;  %v4788_v53 = vsel %vm1371_vm3, 1.0, %v5331_v55  ;;  %v4789_v56 = vsel %vm1372_vm4, 1.0, %v5331_v55 }
 0x29e   : > { %v1532_v49 = vadd.f32 %v4780_v8, %v1531_v43  ;;  %v1569_v60 = vadd.f32 %v4781_v6, %v1568_v59  ;;  %v1302_v8 = vpop.permute.xlu2 %1301 }
 0x29f   : > { %vm1377_vm9 = vcmp.ge.f32.partialorder %v1302_v8, %v6141_v40  ;;  %vm1378_vm10 = vcmp.ge.f32.partialorder %v1302_v8, %v6144_v50 }
 0x2a0   : > { %v1533_v46 = vadd.f32 %v4782_v62, %v1532_v49  ;;  %v1570_v1 = vadd.f32 %v4783_v63, %v1569_v60 }
 0x2a1   : > { %v1282_v41 = vpop.permute.xlu1 %1281  ;;  %v1277_v48 = vpop.permute.xlu0 %1276 }
 0x2a2   : > { %vm1369_vm14 = vcmp.ge.f32.partialorder %v1282_v41, %v6141_v40  ;;  %vm1370_vm15 = vcmp.ge.f32.partialorder %v1282_v41, %v6144_v50  ;;  %vm1367_vm1 = vcmp.ge.f32.partialorder %v1277_v48, %v6141_v40  ;;  %vm1368_vm2 = vcmp.ge.f32.partialorder %v1277_v48, %v6144_v50 }
 0x2a3   : > { %v4784_v61 = vsel %vm1367_vm1, 1.0, %v5331_v55  ;;  %v4785_v44 = vsel %vm1368_vm2, 1.0, %v5331_v55  ;;  %v4786_v51 = vsel %vm1369_vm14, 1.0, %v5331_v55  ;;  %v4787_v58 = vsel %vm1370_vm15, 1.0, %v5331_v55 }
 0x2a4   : > { %v1534_v38 = vadd.f32 %v4784_v61, %v1533_v46  ;;  %v1571_v52 = vadd.f32 %v4785_v44, %v1570_v1  ;;  %v4794_v1 = vsel %vm1377_vm9, 1.0, %v5331_v55  ;;  %v4795_v48 = vsel %vm1378_vm10, 1.0, %v5331_v55 }
 0x2a5   : > { %vm1588_vm15 = vcmask 1040384  }
 0x2a6   : > { %v1535_v54 = vadd.f32 %v4786_v51, %v1534_v38  ;;  %v1572_v45 = vadd.f32 %v4787_v58, %v1571_v52 }
 0x2a8   : > { %v1536_v57 = vadd.f32 %v4788_v53, %v1535_v54  ;;  %v1573_v43 = vadd.f32 %v4789_v56, %v1572_v45 }
 0x2a9   : > { %v1297_v47 = vpop.permute.xlu1 %1296  ;;  %v1292_v59 = vpop.permute.xlu0 %1291 }
 0x2aa   : > { %vm1375_vm5 = vcmp.ge.f32.partialorder %v1297_v47, %v6141_v40  ;;  %vm1376_vm6 = vcmp.ge.f32.partialorder %v1297_v47, %v6144_v50  ;;  %vm1373_vm7 = vcmp.ge.f32.partialorder %v1292_v59, %v6141_v40  ;;  %vm1374_vm8 = vcmp.ge.f32.partialorder %v1292_v59, %v6144_v50 }
 0x2ab   : > { %v4790_v6 = vsel %vm1373_vm7, 1.0, %v5331_v55  ;;  %v4791_v49 = vsel %vm1374_vm8, 1.0, %v5331_v55  ;;  %v4792_v63 = vsel %vm1375_vm5, 1.0, %v5331_v55  ;;  %v4793_v42 = vsel %vm1376_vm6, 1.0, %v5331_v55 }
 0x2ac   : > { %v1537_v60 = vadd.f32 %v4790_v6, %v1536_v57  ;;  %v1574_v62 = vadd.f32 %v4791_v49, %v1573_v43 }
 0x2ae   : > { %v1538_v41 = vadd.f32 %v4792_v63, %v1537_v60  ;;  %v1575_v46 = vadd.f32 %v4793_v42, %v1574_v62 }
 0x2b0   : > { %v1539_v44 = vadd.f32 %v4794_v1, %v1538_v41  ;;  %v1576_v38 = vadd.f32 %v4795_v48, %v1575_v46  ;;  %v1153_v41 = vld [vmem:[#allocation2] sm:$0x3] }
 0x2b1   : > { %v1312_v61 = vpop.permute.xlu1 %1311  ;;  %v1307_v52 = vpop.permute.xlu0 %1306 }
 0x2b2   : > { %vm1381_vm11 = vcmp.ge.f32.partialorder %v1312_v61, %v6141_v40  ;;  %vm1382_vm12 = vcmp.ge.f32.partialorder %v1312_v61, %v6144_v50  ;;  %vm1379_vm13 = vcmp.ge.f32.partialorder %v1307_v52, %v6141_v40  ;;  %vm1380_vm14 = vcmp.ge.f32.partialorder %v1307_v52, %v6144_v50 }
 0x2b3   : > { %v4796_v51 = vsel %vm1379_vm13, 1.0, %v5331_v55  ;;  %v4797_v58 = vsel %vm1380_vm14, 1.0, %v5331_v55  ;;  %v4798_v53 = vsel %vm1381_vm11, 1.0, %v5331_v55  ;;  %v4799_v56 = vsel %vm1382_vm12, 1.0, %v5331_v55 }
 0x2b4   : > { %v1540_v54 = vadd.f32 %v4796_v51, %v1539_v44  ;;  %v1577_v45 = vadd.f32 %v4797_v58, %v1576_v38 }
 0x2b6   : > { %v1541_v47 = vadd.f32 %v4798_v53, %v1540_v54  ;;  %v1578_v57 = vadd.f32 %v4799_v56, %v1577_v45 }
 0x2b8   : > { %v1542_v43 = vrot.slane %v1541_v47, 4  ;;  %v1579_v59 = vrot.slane %v1578_v57, 4 }
 0x2ba   : > { %v1543_v8 = vadd.f32 %v1542_v43, %v1541_v47  ;;  %v1580_v6 = vadd.f32 %v1579_v59, %v1578_v57 }
 0x2bc   : > { %v1544_v49 = vrot.slane %v1543_v8, 2  ;;  %v1581_v40 = vrot.slane %v1580_v6, 2 }
 0x2be   : > { %v1545_v60 = vadd.f32 %v1544_v49, %v1543_v8  ;;  %v1582_v50 = vadd.f32 %v1581_v40, %v1580_v6 }
 0x2c0   : > { %v1546_v62 = vrot.slane %v1545_v60, 1  ;;  %v1583_v63 = vrot.slane %v1582_v50, 1 }
 0x2c2   : > { %v1584_v42 = vadd.f32 %v1583_v63, %v1582_v50  ;;  %v1547_v46 = vadd.f32 %v1546_v62, %v1545_v60 }
 0x2c4   : > { %v1587_v1 = vrot.slane %v1584_v42, 7 }
 0x2c6   : > { %v1589_v48 = vsel %vm1588_vm15, %v1547_v46, %v1587_v1 }
 0x2c7   : > { %v1591_v61 = vadd.f32 %v1589_v48, %v1153_v41 }
 0x2c9   : > { %1592 = vst.msk [vmem:[#allocation2] sm:$0x3] %vm5452_vm0, %v1591_v61 }
 0x2ca PF: > { %p4800_p1 = scmp.gt.s32.totalorder %s5384_s16, 1 }
 0x2cc   : > { %1596 = sbr.rel (%p4800_p1) target bundleno = 943 (0x3af), region = 48 }
 0x2d1   : > { %v5332_v55 = vmov 0  }
 0x2d2   : > { %5245 = vset.pattern.permute.xlu2 %v5332_v55  ;;  %5244 = vset.pattern.permute.xlu1 %v5332_v55 }
 0x2d3   : > { %5243 = vset.pattern.permute.xlu0 %v5332_v55  ;;  %1620 = vperm.xlu2 %5245, %v5970_v5  }
 0x2d4   : > { %1610 = vperm.xlu1 %5244, %v5960_v3   ;;  %1600 = vperm.xlu0 %5243, %v5950_v12  }
 0x2db   : > { %1625 = vperm.xlu2 %5245, %v5975_v9   ;;  %v6314_v9 = vperm.slane %v5523_v21, 0 }
 0x2dc   : > { %1615 = vperm.xlu1 %5244, %v5965_v4   ;;  %1605 = vperm.xlu0 %5243, %v5955_v2  }
 0x2e3   : > { %1640 = vperm.xlu2 %5245, %v5990_v14  }
 0x2e4   : > { %1635 = vperm.xlu1 %5244, %v5985_v13   ;;  %1630 = vperm.xlu0 %5243, %v5980_v10   ;;  %v6317_v10 = vperm.slane %v5523_v21, 1 }
 0x2eb   : > { %1655 = vperm.xlu2 %5245, %v6005_v17  }
 0x2ec   : > { %1650 = vperm.xlu1 %5244, %v6000_v16   ;;  %1645 = vperm.xlu0 %5243, %v5995_v15   ;;  %v5333_v15 = vmov 0.0  }
 0x2f3   : > { %1670 = vperm.xlu2 %5245, %v6020_v20  }
 0x2f4   : > { %1665 = vperm.xlu1 %5244, %v6015_v19   ;;  %1660 = vperm.xlu0 %5243, %v6010_v18  }
 0x2fb   : > { %1685 = vperm.xlu2 %5245, %v6035_v24  }
 0x2fc   : > { %1680 = vperm.xlu1 %5244, %v6030_v23   ;;  %1675 = vperm.xlu0 %5243, %v6025_v22  }
 0x303   : > { %1700 = vperm.xlu2 %5245, %v6050_v27  }
 0x304   : > { %1695 = vperm.xlu1 %5244, %v6045_v26   ;;  %1690 = vperm.xlu0 %5243, %v6040_v25  }
 0x30b   : > { %1715 = vperm.xlu2 %5245, %v6065_v30  }
 0x30c   : > { %1710 = vperm.xlu1 %5244, %v6060_v29   ;;  %1705 = vperm.xlu0 %5243, %v6055_v28  }
 0x313   : > { %1730 = vperm.xlu2 %5245, %v6080_v33  }
 0x314   : > { %1725 = vperm.xlu1 %5244, %v6075_v32   ;;  %1720 = vperm.xlu0 %5243, %v6070_v31  }
 0x31b   : > { %1745 = vperm.xlu2 %5245, %v6095_v36  }
 0x31c   : > { %1740 = vperm.xlu1 %5244, %v6090_v35   ;;  %1735 = vperm.xlu0 %5243, %v6085_v34  }
 0x324   : > { %1755 = vperm.xlu1 %5244, %v6105_v37   ;;  %1750 = vperm.xlu0 %5243, %v6100_v39  }
 0x32d   : > { %v1621_v12 = vpop.permute.xlu2 %1620 }
 0x32e   : > { %vm1771_vm9 = vcmp.gt.f32.partialorder %v1621_v12, %v6314_v9  ;;  %vm1772_vm10 = vcmp.gt.f32.partialorder %v1621_v12, %v6317_v10 }
 0x32f   : > { %v4809_v34 = vsel %vm1771_vm9, 1.0, %v5333_v15  ;;  %v4810_v35 = vsel %vm1772_vm10, 1.0, %v5333_v15 }
 0x335   : > { %v1626_v2 = vpop.permute.xlu2 %1625 }
 0x336   : > { %vm1773_vm11 = vcmp.gt.f32.partialorder %v1626_v2, %v6314_v9  ;;  %vm1774_vm12 = vcmp.gt.f32.partialorder %v1626_v2, %v6317_v10 }
 0x337   : > { %v4811_v37 = vsel %vm1773_vm11, 1.0, %v5333_v15  ;;  %v4812_v44 = vsel %vm1774_vm12, 1.0, %v5333_v15 }
 0x33d   : > { %v1641_v5 = vpop.permute.xlu2 %1640 }
 0x345   : > { %v6331_v23 = vpop.permute.xlu2 %1655 }
 0x346   : > { %v1611_v3 = vpop.permute.xlu1 %1610  ;;  %v1601_v4 = vpop.permute.xlu0 %1600  ;;  %vm1786_vm9 = vcmp.gt.f32.partialorder %v6331_v23, %v6317_v10 }
 0x347   : > { %vm1763_vm1 = vcmp.gt.f32.partialorder %v1601_v4, %v6314_v9  ;;  %vm1764_vm2 = vcmp.gt.f32.partialorder %v1601_v4, %v6317_v10  ;;  %vm1767_vm3 = vcmp.gt.f32.partialorder %v1611_v3, %v6314_v9  ;;  %vm1768_vm4 = vcmp.gt.f32.partialorder %v1611_v3, %v6317_v10 }
 0x348   : > { %v4801_v16 = vsel %vm1763_vm1, 1.0, %v5333_v15  ;;  %v4802_v17 = vsel %vm1764_vm2, 1.0, %v5333_v15  ;;  %v4805_v24 = vsel %vm1767_vm3, 1.0, %v5333_v15  ;;  %v4806_v25 = vsel %vm1768_vm4, 1.0, %v5333_v15 }
 0x349   : > { %vm1779_vm2 = vcmp.gt.f32.partialorder %v1641_v5, %v6314_v9  ;;  %vm1780_vm3 = vcmp.gt.f32.partialorder %v1641_v5, %v6317_v10  ;;  %v4824_v3 = vsel %vm1786_vm9, 1.0, %v5333_v15 }
 0x34a   : > { %v4817_v6 = vsel %vm1779_vm2, 1.0, %v5333_v15  ;;  %v4818_v49 = vsel %vm1780_vm3, 1.0, %v5333_v15 }
 0x34d   : > { %v1671_v53 = vpop.permute.xlu2 %1670 }
 0x34e   : > { %v1616_v13 = vpop.permute.xlu1 %1615  ;;  %v1606_v14 = vpop.permute.xlu0 %1605 }
 0x34f   : > { %vm1765_vm5 = vcmp.gt.f32.partialorder %v1606_v14, %v6314_v9  ;;  %vm1766_vm6 = vcmp.gt.f32.partialorder %v1606_v14, %v6317_v10  ;;  %vm1769_vm7 = vcmp.gt.f32.partialorder %v1616_v13, %v6314_v9  ;;  %vm1770_vm8 = vcmp.gt.f32.partialorder %v1616_v13, %v6317_v10 }
 0x350   : > { %v4803_v18 = vsel %vm1765_vm5, 1.0, %v5333_v15  ;;  %v4804_v19 = vsel %vm1766_vm6, 1.0, %v5333_v15  ;;  %v4807_v28 = vsel %vm1769_vm7, 1.0, %v5333_v15  ;;  %v4808_v29 = vsel %vm1770_vm8, 1.0, %v5333_v15 }
 0x351   : > { %v1955_v20 = vadd.f32 %v4803_v18, %v4801_v16  ;;  %v1992_v22 = vadd.f32 %v4804_v19, %v4802_v17  ;;  %vm1785_vm8 = vcmp.gt.f32.partialorder %v6331_v23, %v6314_v9 }
 0x352   : > { %v4823_v2 = vsel %vm1785_vm8, 1.0, %v5333_v15 }
 0x353   : > { %v1956_v26 = vadd.f32 %v4805_v24, %v1955_v20  ;;  %v1993_v27 = vadd.f32 %v4806_v25, %v1992_v22 }
 0x355   : > { %v1957_v30 = vadd.f32 %v4807_v28, %v1956_v26  ;;  %v1994_v31 = vadd.f32 %v4808_v29, %v1993_v27  ;;  %v1686_v12 = vpop.permute.xlu2 %1685 }
 0x356   : > { %v1636_v32 = vpop.permute.xlu1 %1635  ;;  %v1631_v33 = vpop.permute.xlu0 %1630 }
 0x357   : > { %v1958_v36 = vadd.f32 %v4809_v34, %v1957_v30  ;;  %v1995_v39 = vadd.f32 %v4810_v35, %v1994_v31  ;;  %vm1775_vm13 = vcmp.gt.f32.partialorder %v1631_v33, %v6314_v9  ;;  %vm1776_vm14 = vcmp.gt.f32.partialorder %v1631_v33, %v6317_v10 }
 0x358   : > { %vm1777_vm15 = vcmp.gt.f32.partialorder %v1636_v32, %v6314_v9  ;;  %vm1778_vm1 = vcmp.gt.f32.partialorder %v1636_v32, %v6317_v10  ;;  %v4813_v51 = vsel %vm1775_vm13, 1.0, %v5333_v15  ;;  %v4814_v58 = vsel %vm1776_vm14, 1.0, %v5333_v15 }
 0x359   : > { %v1959_v38 = vadd.f32 %v4811_v37, %v1958_v36  ;;  %v1996_v52 = vadd.f32 %v4812_v44, %v1995_v39  ;;  %v4815_v56 = vsel %vm1777_vm15, 1.0, %v5333_v15  ;;  %v4816_v47 = vsel %vm1778_vm1, 1.0, %v5333_v15 }
 0x35a   : > { %vm1791_vm14 = vcmp.gt.f32.partialorder %v1671_v53, %v6314_v9  ;;  %vm1792_vm15 = vcmp.gt.f32.partialorder %v1671_v53, %v6317_v10 }
 0x35b   : > { %v1960_v54 = vadd.f32 %v4813_v51, %v1959_v38  ;;  %v1997_v45 = vadd.f32 %v4814_v58, %v1996_v52  ;;  %v4829_v25 = vsel %vm1791_vm14, 1.0, %v5333_v15  ;;  %v4830_v26 = vsel %vm1792_vm15, 1.0, %v5333_v15 }
 0x35d   : > { %v1961_v57 = vadd.f32 %v4815_v56, %v1960_v54  ;;  %v1998_v43 = vadd.f32 %v4816_v47, %v1997_v45  ;;  %v1701_v27 = vpop.permute.xlu2 %1700 }
 0x35e   : > { %v1651_v59 = vpop.permute.xlu1 %1650  ;;  %v1646_v8 = vpop.permute.xlu0 %1645 }
 0x35f   : > { %v1962_v40 = vadd.f32 %v4817_v6, %v1961_v57  ;;  %v1999_v60 = vadd.f32 %v4818_v49, %v1998_v43  ;;  %vm1783_vm4 = vcmp.gt.f32.partialorder %v1651_v59, %v6314_v9  ;;  %vm1784_vm5 = vcmp.gt.f32.partialorder %v1651_v59, %v6317_v10 }
 0x360   : > { %vm1781_vm6 = vcmp.gt.f32.partialorder %v1646_v8, %v6314_v9  ;;  %vm1782_vm7 = vcmp.gt.f32.partialorder %v1646_v8, %v6317_v10  ;;  %v4821_v41 = vsel %vm1783_vm4, 1.0, %v5333_v15  ;;  %v4822_v46 = vsel %vm1784_vm5, 1.0, %v5333_v15 }
 0x361   : > { %v4819_v50 = vsel %vm1781_vm6, 1.0, %v5333_v15  ;;  %v4820_v62 = vsel %vm1782_vm7, 1.0, %v5333_v15  ;;  %vm1797_vm5 = vcmp.gt.f32.partialorder %v1686_v12, %v6314_v9  ;;  %vm1798_vm6 = vcmp.gt.f32.partialorder %v1686_v12, %v6317_v10 }
 0x362   : > { %v1963_v63 = vadd.f32 %v4819_v50, %v1962_v40  ;;  %v2000_v42 = vadd.f32 %v4820_v62, %v1999_v60  ;;  %v4835_v38 = vsel %vm1797_vm5, 1.0, %v5333_v15  ;;  %v4836_v52 = vsel %vm1798_vm6, 1.0, %v5333_v15 }
 0x364   : > { %v1964_v1 = vadd.f32 %v4821_v41, %v1963_v63  ;;  %v2001_v48 = vadd.f32 %v4822_v46, %v2000_v42 }
 0x365   : > { %v1716_v53 = vpop.permute.xlu2 %1715 }
 0x366   : > { %v1666_v61 = vpop.permute.xlu1 %1665  ;;  %v1661_v55 = vpop.permute.xlu0 %1660  ;;  %v1965_v4 = vadd.f32 %v4823_v2, %v1964_v1  ;;  %v2002_v5 = vadd.f32 %v4824_v3, %v2001_v48 }
 0x367   : > { %vm1789_vm10 = vcmp.gt.f32.partialorder %v1666_v61, %v6314_v9  ;;  %vm1790_vm11 = vcmp.gt.f32.partialorder %v1666_v61, %v6317_v10  ;;  %vm1787_vm12 = vcmp.gt.f32.partialorder %v1661_v55, %v6314_v9  ;;  %vm1788_vm13 = vcmp.gt.f32.partialorder %v1661_v55, %v6317_v10 }
 0x368   : > { %v4825_v13 = vsel %vm1787_vm12, 1.0, %v5333_v15  ;;  %v4826_v14 = vsel %vm1788_vm13, 1.0, %v5333_v15  ;;  %v4827_v18 = vsel %vm1789_vm10, 1.0, %v5333_v15  ;;  %v4828_v19 = vsel %vm1790_vm11, 1.0, %v5333_v15 }
 0x369   : > { %v1966_v16 = vadd.f32 %v4825_v13, %v1965_v4  ;;  %v2003_v17 = vadd.f32 %v4826_v14, %v2002_v5  ;;  %vm1803_vm11 = vcmp.gt.f32.partialorder %v1701_v27, %v6314_v9  ;;  %vm1804_vm12 = vcmp.gt.f32.partialorder %v1701_v27, %v6317_v10 }
 0x36a   : > { %v4841_v40 = vsel %vm1803_vm11, 1.0, %v5333_v15  ;;  %v4842_v60 = vsel %vm1804_vm12, 1.0, %v5333_v15 }
 0x36b   : > { %v1967_v20 = vadd.f32 %v4827_v18, %v1966_v16  ;;  %v2004_v22 = vadd.f32 %v4828_v19, %v2003_v17 }
 0x36d   : > { %v1968_v28 = vadd.f32 %v4829_v25, %v1967_v20  ;;  %v2005_v29 = vadd.f32 %v4830_v26, %v2004_v22  ;;  %v1731_v3 = vpop.permute.xlu2 %1730 }
 0x36e   : > { %v1681_v23 = vpop.permute.xlu1 %1680  ;;  %v1676_v24 = vpop.permute.xlu0 %1675 }
 0x36f   : > { %vm1795_vm1 = vcmp.gt.f32.partialorder %v1681_v23, %v6314_v9  ;;  %vm1796_vm2 = vcmp.gt.f32.partialorder %v1681_v23, %v6317_v10  ;;  %vm1793_vm3 = vcmp.gt.f32.partialorder %v1676_v24, %v6314_v9  ;;  %vm1794_vm4 = vcmp.gt.f32.partialorder %v1676_v24, %v6317_v10 }
 0x370   : > { %v4831_v30 = vsel %vm1793_vm3, 1.0, %v5333_v15  ;;  %v4832_v31 = vsel %vm1794_vm4, 1.0, %v5333_v15  ;;  %v4833_v34 = vsel %vm1795_vm1, 1.0, %v5333_v15  ;;  %v4834_v35 = vsel %vm1796_vm2, 1.0, %v5333_v15 }
 0x371   : > { %v1969_v32 = vadd.f32 %v4831_v30, %v1968_v28  ;;  %v2006_v33 = vadd.f32 %v4832_v31, %v2005_v29  ;;  %vm1809_vm2 = vcmp.gt.f32.partialorder %v1716_v53, %v6314_v9  ;;  %vm1810_vm3 = vcmp.gt.f32.partialorder %v1716_v53, %v6317_v10 }
 0x372   : > { %v4847_v12 = vsel %vm1809_vm2, 1.0, %v5333_v15  ;;  %v4848_v2 = vsel %vm1810_vm3, 1.0, %v5333_v15 }
 0x373   : > { %v1970_v36 = vadd.f32 %v4833_v34, %v1969_v32  ;;  %v2007_v39 = vadd.f32 %v4834_v35, %v2006_v33 }
 0x375   : > { %v1971_v51 = vadd.f32 %v4835_v38, %v1970_v36  ;;  %v2008_v58 = vadd.f32 %v4836_v52, %v2007_v39  ;;  %v1746_v31 = vpop.permute.xlu2 %1745 }
 0x376   : > { %v1696_v37 = vpop.permute.xlu1 %1695  ;;  %v1691_v44 = vpop.permute.xlu0 %1690 }
 0x377   : > { %vm1801_vm7 = vcmp.gt.f32.partialorder %v1696_v37, %v6314_v9  ;;  %vm1802_vm8 = vcmp.gt.f32.partialorder %v1696_v37, %v6317_v10  ;;  %vm1799_vm9 = vcmp.gt.f32.partialorder %v1691_v44, %v6314_v9  ;;  %vm1800_vm10 = vcmp.gt.f32.partialorder %v1691_v44, %v6317_v10 }
 0x378   : > { %v4837_v54 = vsel %vm1799_vm9, 1.0, %v5333_v15  ;;  %v4838_v45 = vsel %vm1800_vm10, 1.0, %v5333_v15  ;;  %v4839_v57 = vsel %vm1801_vm7, 1.0, %v5333_v15  ;;  %v4840_v43 = vsel %vm1802_vm8, 1.0, %v5333_v15 }
 0x379   : > { %v1972_v56 = vadd.f32 %v4837_v54, %v1971_v51  ;;  %v2009_v47 = vadd.f32 %v4838_v45, %v2008_v58  ;;  %vm1815_vm8 = vcmp.gt.f32.partialorder %v1731_v3, %v6314_v9  ;;  %vm1816_vm9 = vcmp.gt.f32.partialorder %v1731_v3, %v6317_v10 }
 0x37a   : > { %v4853_v25 = vsel %vm1815_vm8, 1.0, %v5333_v15  ;;  %v4854_v26 = vsel %vm1816_vm9, 1.0, %v5333_v15 }
 0x37b   : > { %v1973_v59 = vadd.f32 %v4839_v57, %v1972_v56  ;;  %v2010_v8 = vadd.f32 %v4840_v43, %v2009_v47 }
 0x37d   : > { %v1974_v50 = vadd.f32 %v4841_v40, %v1973_v59  ;;  %v2011_v62 = vadd.f32 %v4842_v60, %v2010_v8 }
 0x37e   : > { %v1711_v6 = vpop.permute.xlu1 %1710  ;;  %v1706_v49 = vpop.permute.xlu0 %1705 }
 0x37f   : > { %vm1807_vm13 = vcmp.gt.f32.partialorder %v1711_v6, %v6314_v9  ;;  %vm1808_vm14 = vcmp.gt.f32.partialorder %v1711_v6, %v6317_v10  ;;  %vm1805_vm15 = vcmp.gt.f32.partialorder %v1706_v49, %v6314_v9  ;;  %vm1806_vm1 = vcmp.gt.f32.partialorder %v1706_v49, %v6317_v10 }
 0x380   : > { %v4843_v63 = vsel %vm1805_vm15, 1.0, %v5333_v15  ;;  %v4844_v42 = vsel %vm1806_vm1, 1.0, %v5333_v15  ;;  %v4845_v1 = vsel %vm1807_vm13, 1.0, %v5333_v15  ;;  %v4846_v48 = vsel %vm1808_vm14, 1.0, %v5333_v15 }
 0x381   : > { %v1975_v41 = vadd.f32 %v4843_v63, %v1974_v50  ;;  %v2012_v46 = vadd.f32 %v4844_v42, %v2011_v62  ;;  %vm1821_vm14 = vcmp.gt.f32.partialorder %v1746_v31, %v6314_v9  ;;  %vm1822_vm15 = vcmp.gt.f32.partialorder %v1746_v31, %v6317_v10 }
 0x382   : > { %v4859_v38 = vsel %vm1821_vm14, 1.0, %v5333_v15  ;;  %v4860_v52 = vsel %vm1822_vm15, 1.0, %v5333_v15 }
 0x383   : > { %v1976_v61 = vadd.f32 %v4845_v1, %v1975_v41  ;;  %v2013_v55 = vadd.f32 %v4846_v48, %v2012_v46  ;;  %v1597_v1 = vld [vmem:[#allocation2] sm:$0x3] }
 0x385   : > { %v1977_v5 = vadd.f32 %v4847_v12, %v1976_v61  ;;  %v2014_v13 = vadd.f32 %v4848_v2, %v2013_v55 }
 0x386   : > { %v1726_v4 = vpop.permute.xlu1 %1725  ;;  %v1721_v14 = vpop.permute.xlu0 %1720 }
 0x387   : > { %vm1813_vm4 = vcmp.gt.f32.partialorder %v1726_v4, %v6314_v9  ;;  %vm1814_vm5 = vcmp.gt.f32.partialorder %v1726_v4, %v6317_v10  ;;  %vm1811_vm6 = vcmp.gt.f32.partialorder %v1721_v14, %v6314_v9  ;;  %vm1812_vm7 = vcmp.gt.f32.partialorder %v1721_v14, %v6317_v10 }
 0x388   : > { %v4849_v16 = vsel %vm1811_vm6, 1.0, %v5333_v15  ;;  %v4850_v17 = vsel %vm1812_vm7, 1.0, %v5333_v15  ;;  %v4851_v20 = vsel %vm1813_vm4, 1.0, %v5333_v15  ;;  %v4852_v22 = vsel %vm1814_vm5, 1.0, %v5333_v15 }
 0x389   : > { %v1978_v18 = vadd.f32 %v4849_v16, %v1977_v5  ;;  %v2015_v19 = vadd.f32 %v4850_v17, %v2014_v13  ;;  %vm2032_vm5 = vcmask 1040384  }
 0x38b   : > { %v1979_v23 = vadd.f32 %v4851_v20, %v1978_v18  ;;  %v2016_v24 = vadd.f32 %v4852_v22, %v2015_v19 }
 0x38d   : > { %v1980_v28 = vadd.f32 %v4853_v25, %v1979_v23  ;;  %v2017_v29 = vadd.f32 %v4854_v26, %v2016_v24 }
 0x38e   : > { %v1741_v27 = vpop.permute.xlu1 %1740  ;;  %v1736_v30 = vpop.permute.xlu0 %1735 }
 0x38f   : > { %vm1819_vm10 = vcmp.gt.f32.partialorder %v1741_v27, %v6314_v9  ;;  %vm1820_vm11 = vcmp.gt.f32.partialorder %v1741_v27, %v6317_v10  ;;  %vm1817_vm12 = vcmp.gt.f32.partialorder %v1736_v30, %v6314_v9  ;;  %vm1818_vm13 = vcmp.gt.f32.partialorder %v1736_v30, %v6317_v10 }
 0x390   : > { %v4855_v32 = vsel %vm1817_vm12, 1.0, %v5333_v15  ;;  %v4856_v33 = vsel %vm1818_vm13, 1.0, %v5333_v15  ;;  %v4857_v36 = vsel %vm1819_vm10, 1.0, %v5333_v15  ;;  %v4858_v39 = vsel %vm1820_vm11, 1.0, %v5333_v15 }
 0x391   : > { %v1981_v34 = vadd.f32 %v4855_v32, %v1980_v28  ;;  %v2018_v35 = vadd.f32 %v4856_v33, %v2017_v29 }
 0x393   : > { %v1982_v37 = vadd.f32 %v4857_v36, %v1981_v34  ;;  %v2019_v44 = vadd.f32 %v4858_v39, %v2018_v35 }
 0x395   : > { %v1983_v58 = vadd.f32 %v4859_v38, %v1982_v37  ;;  %v2020_v54 = vadd.f32 %v4860_v52, %v2019_v44 }
 0x396   : > { %v1756_v51 = vpop.permute.xlu1 %1755  ;;  %v1751_v45 = vpop.permute.xlu0 %1750 }
 0x397   : > { %vm1825_vm1 = vcmp.gt.f32.partialorder %v1756_v51, %v6314_v9  ;;  %vm1826_vm2 = vcmp.gt.f32.partialorder %v1756_v51, %v6317_v10  ;;  %vm1823_vm3 = vcmp.gt.f32.partialorder %v1751_v45, %v6314_v9  ;;  %vm1824_vm4 = vcmp.gt.f32.partialorder %v1751_v45, %v6317_v10 }
 0x398   : > { %v4861_v53 = vsel %vm1823_vm3, 1.0, %v5333_v15  ;;  %v4862_v56 = vsel %vm1824_vm4, 1.0, %v5333_v15  ;;  %v4863_v43 = vsel %vm1825_vm1, 1.0, %v5333_v15  ;;  %v4864_v59 = vsel %vm1826_vm2, 1.0, %v5333_v15 }
 0x399   : > { %v1984_v47 = vadd.f32 %v4861_v53, %v1983_v58  ;;  %v2021_v57 = vadd.f32 %v4862_v56, %v2020_v54 }
 0x39b   : > { %v1985_v8 = vadd.f32 %v4863_v43, %v1984_v47  ;;  %v2022_v6 = vadd.f32 %v4864_v59, %v2021_v57 }
 0x39d   : > { %v1986_v49 = vrot.slane %v1985_v8, 4  ;;  %v2023_v40 = vrot.slane %v2022_v6, 4 }
 0x39f   : > { %v1987_v60 = vadd.f32 %v1986_v49, %v1985_v8  ;;  %v2024_v50 = vadd.f32 %v2023_v40, %v2022_v6 }
 0x3a1   : > { %v1988_v62 = vrot.slane %v1987_v60, 2  ;;  %v2025_v9 = vrot.slane %v2024_v50, 2 }
 0x3a3   : > { %v1989_v63 = vadd.f32 %v1988_v62, %v1987_v60  ;;  %v2026_v10 = vadd.f32 %v2025_v9, %v2024_v50 }
 0x3a5   : > { %v1990_v42 = vrot.slane %v1989_v63, 1  ;;  %v2027_v41 = vrot.slane %v2026_v10, 1 }
 0x3a7   : > { %v2028_v46 = vadd.f32 %v2027_v41, %v2026_v10  ;;  %v1991_v48 = vadd.f32 %v1990_v42, %v1989_v63 }
 0x3a9   : > { %v2031_v61 = vrot.slane %v2028_v46, 7 }
 0x3ab   : > { %v2033_v55 = vsel %vm2032_vm5, %v1991_v48, %v2031_v61 }
 0x3ac   : > { %v2035_v12 = vadd.f32 %v2033_v55, %v1597_v1 }
 0x3ae   : > { %2036 = vst.msk [vmem:[#allocation2] sm:$0x3] %vm5452_vm0, %v2035_v12 }
 0x3af PF: > { %v6456_v15 = vld [vmem:[%s7814_s1 + $0x200] sm:$0xff]  ;;  %v6461_v2 = vld [vmem:[%s7814_s1 + $0x208] sm:$0xff]  ;;  %v6466_v3 = vld [vmem:[%s7814_s1 + $0x210] sm:$0xff]  ;;  %p4865_p2 = scmp.le.s32.totalorder %s5384_s16, 2 }
 0x3b0   : > { %v6471_v4 = vld [vmem:[%s7814_s1 + $0x218] sm:$0xff]  ;;  %v6476_v5 = vld [vmem:[%s7814_s1 + $0x220] sm:$0xff]  ;;  %v6481_v13 = vld [vmem:[%s7814_s1 + $0x228] sm:$0xff] }
 0x3b1   : > { %v6486_v14 = vld [vmem:[%s7814_s1 + $0x230] sm:$0xff]  ;;  %v6491_v16 = vld [vmem:[%s7814_s1 + $0x238] sm:$0xff]  ;;  %v6496_v17 = vld [vmem:[%s7814_s1 + $0x240] sm:$0xff] }
 0x3b2   : > { %v6501_v18 = vld [vmem:[%s7814_s1 + $0x248] sm:$0xff]  ;;  %v6506_v19 = vld [vmem:[%s7814_s1 + $0x250] sm:$0xff]  ;;  %v6511_v20 = vld [vmem:[%s7814_s1 + $0x258] sm:$0xff] }
 0x3b3   : > { %v6516_v22 = vld [vmem:[%s7814_s1 + $0x260] sm:$0xff]  ;;  %v6521_v23 = vld [vmem:[%s7814_s1 + $0x268] sm:$0xff]  ;;  %v6526_v24 = vld [vmem:[%s7814_s1 + $0x270] sm:$0xff] }
 0x3b4   : > { %v6531_v25 = vld [vmem:[%s7814_s1 + $0x278] sm:$0xff]  ;;  %v6536_v26 = vld [vmem:[%s7814_s1 + $0x280] sm:$0xff]  ;;  %v6541_v27 = vld [vmem:[%s7814_s1 + $0x288] sm:$0xff] }
 0x3b5   : > { %v6546_v28 = vld [vmem:[%s7814_s1 + $0x290] sm:$0xff]  ;;  %v6551_v29 = vld [vmem:[%s7814_s1 + $0x298] sm:$0xff]  ;;  %v6556_v30 = vld [vmem:[%s7814_s1 + $0x2a0] sm:$0xff]  ;;  %2072 = sbr.rel (%p4865_p2) target bundleno = 1176 (0x498), region = 52 }
 0x3b6   : > { %v6561_v31 = vld [vmem:[%s7814_s1 + $0x2a8] sm:$0xff]  ;;  %v6566_v32 = vld [vmem:[%s7814_s1 + $0x2b0] sm:$0xff]  ;;  %v6571_v33 = vld [vmem:[%s7814_s1 + $0x2b8] sm:$0xff] }
 0x3b7   : > { %v6576_v34 = vld [vmem:[%s7814_s1 + $0x2c0] sm:$0xff]  ;;  %v6581_v35 = vld [vmem:[%s7814_s1 + $0x2c8] sm:$0xff]  ;;  %v6586_v36 = vld [vmem:[%s7814_s1 + $0x2d0] sm:$0xff] }
 0x3b8   : > { %v6591_v39 = vld [vmem:[%s7814_s1 + $0x2d8] sm:$0xff]  ;;  %v6596_v37 = vld [vmem:[%s7814_s1 + $0x2e0] sm:$0xff]  ;;  %v6601_v44 = vld [vmem:[%s7814_s1 + $0x2e8] sm:$0xff] }
 0x3b9   : > { %v6606_v38 = vld [vmem:[%s7814_s1 + $0x2f0] sm:$0xff]  ;;  %v6611_v52 = vld [vmem:[%s7814_s1 + $0x2f8] sm:$0xff] }
 0x3ba   : > { %v5334_v51 = vmov 0   ;;  %v6647_v47 = vperm.slane %v5523_v21, 0  ;;  %v6650_v57 = vperm.slane %v5523_v21, 1  ;;  %v5335_v8 = vmov 0.0  }
 0x3bb   : > { %5248 = vset.pattern.permute.xlu2 %v5334_v51  ;;  %5247 = vset.pattern.permute.xlu1 %v5334_v51 }
 0x3bc   : > { %5246 = vset.pattern.permute.xlu0 %v5334_v51  ;;  %2096 = vperm.xlu2 %5248, %v6476_v5  }
 0x3bd   : > { %2086 = vperm.xlu1 %5247, %v6466_v3   ;;  %2076 = vperm.xlu0 %5246, %v6456_v15  }
 0x3c4   : > { %2101 = vperm.xlu2 %5248, %v6481_v13  }
 0x3c5   : > { %2091 = vperm.xlu1 %5247, %v6471_v4   ;;  %2081 = vperm.xlu0 %5246, %v6461_v2  }
 0x3cc   : > { %2116 = vperm.xlu2 %5248, %v6496_v17  }
 0x3cd   : > { %2111 = vperm.xlu1 %5247, %v6491_v16   ;;  %2106 = vperm.xlu0 %5246, %v6486_v14  }
 0x3d4   : > { %2131 = vperm.xlu2 %5248, %v6511_v20  }
 0x3d5   : > { %2126 = vperm.xlu1 %5247, %v6506_v19   ;;  %2121 = vperm.xlu0 %5246, %v6501_v18  }
 0x3dc   : > { %2146 = vperm.xlu2 %5248, %v6526_v24  }
 0x3dd   : > { %2141 = vperm.xlu1 %5247, %v6521_v23   ;;  %2136 = vperm.xlu0 %5246, %v6516_v22  }
 0x3e4   : > { %2161 = vperm.xlu2 %5248, %v6541_v27  }
 0x3e5   : > { %2156 = vperm.xlu1 %5247, %v6536_v26   ;;  %2151 = vperm.xlu0 %5246, %v6531_v25  }
 0x3ec   : > { %2176 = vperm.xlu2 %5248, %v6556_v30  }
 0x3ed   : > { %2171 = vperm.xlu1 %5247, %v6551_v29   ;;  %2166 = vperm.xlu0 %5246, %v6546_v28  }
 0x3f4   : > { %2191 = vperm.xlu2 %5248, %v6571_v33  }
 0x3f5   : > { %2186 = vperm.xlu1 %5247, %v6566_v32   ;;  %2181 = vperm.xlu0 %5246, %v6561_v31  }
 0x3fc   : > { %2206 = vperm.xlu2 %5248, %v6586_v36  }
 0x3fd   : > { %2201 = vperm.xlu1 %5247, %v6581_v35   ;;  %2196 = vperm.xlu0 %5246, %v6576_v34  }
 0x404   : > { %2221 = vperm.xlu2 %5248, %v6601_v44  }
 0x405   : > { %2216 = vperm.xlu1 %5247, %v6596_v37   ;;  %2211 = vperm.xlu0 %5246, %v6591_v39  }
 0x40d   : > { %2231 = vperm.xlu1 %5247, %v6611_v52   ;;  %2226 = vperm.xlu0 %5246, %v6606_v38  }
 0x416   : > { %v2097_v58 = vpop.permute.xlu2 %2096 }
 0x417   : > { %vm2247_vm14 = vcmp.ge.f32.partialorder %v2097_v58, %v6647_v47  ;;  %vm2248_vm15 = vcmp.ge.f32.partialorder %v2097_v58, %v6650_v57 }
 0x418   : > { %v4874_v51 = vsel %vm2247_vm14, 1.0, %v5335_v8 }
 0x41e   : > { %v2102_v54 = vpop.permute.xlu2 %2101 }
 0x41f   : > { %vm2249_vm1 = vcmp.ge.f32.partialorder %v2102_v54, %v6647_v47  ;;  %vm2250_vm2 = vcmp.ge.f32.partialorder %v2102_v54, %v6650_v57 }
 0x426   : > { %v2117_v56 = vpop.permute.xlu2 %2116 }
 0x42e   : > { %v6664_v9 = vpop.permute.xlu2 %2131 }
 0x42f   : > { %v2087_v45 = vpop.permute.xlu1 %2086  ;;  %v2077_v53 = vpop.permute.xlu0 %2076  ;;  %vm2262_vm14 = vcmp.ge.f32.partialorder %v6664_v9, %v6650_v57 }
 0x430   : > { %vm2239_vm6 = vcmp.ge.f32.partialorder %v2077_v53, %v6647_v47  ;;  %vm2240_vm7 = vcmp.ge.f32.partialorder %v2077_v53, %v6650_v57  ;;  %vm2243_vm8 = vcmp.ge.f32.partialorder %v2087_v45, %v6647_v47  ;;  %vm2244_vm9 = vcmp.ge.f32.partialorder %v2087_v45, %v6650_v57 }
 0x431   : > { %v4866_v6 = vsel %vm2239_vm6, 1.0, %v5335_v8  ;;  %v4867_v49 = vsel %vm2240_vm7, 1.0, %v5335_v8  ;;  %v4870_v63 = vsel %vm2243_vm8, 1.0, %v5335_v8  ;;  %v4871_v10 = vsel %vm2244_vm9, 1.0, %v5335_v8 }
 0x432   : > { %v4875_v45 = vsel %vm2248_vm15, 1.0, %v5335_v8  ;;  %vm2255_vm7 = vcmp.ge.f32.partialorder %v2117_v56, %v6647_v47  ;;  %vm2256_vm8 = vcmp.ge.f32.partialorder %v2117_v56, %v6650_v57 }
 0x437   : > { %v2092_v43 = vpop.permute.xlu1 %2091  ;;  %v2082_v59 = vpop.permute.xlu0 %2081 }
 0x438   : > { %vm2241_vm10 = vcmp.ge.f32.partialorder %v2082_v59, %v6647_v47  ;;  %vm2242_vm11 = vcmp.ge.f32.partialorder %v2082_v59, %v6650_v57  ;;  %vm2245_vm12 = vcmp.ge.f32.partialorder %v2092_v43, %v6647_v47  ;;  %vm2246_vm13 = vcmp.ge.f32.partialorder %v2092_v43, %v6650_v57 }
 0x439   : > { %v4868_v40 = vsel %vm2241_vm10, 1.0, %v5335_v8  ;;  %v4869_v60 = vsel %vm2242_vm11, 1.0, %v5335_v8  ;;  %v4872_v46 = vsel %vm2245_vm12, 1.0, %v5335_v8  ;;  %v4873_v1 = vsel %vm2246_vm13, 1.0, %v5335_v8 }
 0x43a   : > { %v2431_v50 = vadd.f32 %v4868_v40, %v4866_v6  ;;  %v2468_v62 = vadd.f32 %v4869_v60, %v4867_v49  ;;  %v4876_v43 = vsel %vm2249_vm1, 1.0, %v5335_v8  ;;  %v4877_v59 = vsel %vm2250_vm2, 1.0, %v5335_v8 }
 0x43b   : > { %vm2261_vm13 = vcmp.ge.f32.partialorder %v6664_v9, %v6647_v47 }
 0x43c   : > { %v2432_v42 = vadd.f32 %v4870_v63, %v2431_v50  ;;  %v2469_v41 = vadd.f32 %v4871_v10, %v2468_v62  ;;  %v2147_v62 = vpop.permute.xlu2 %2146 }
 0x43e   : > { %v2433_v48 = vadd.f32 %v4872_v46, %v2432_v42  ;;  %v2470_v61 = vadd.f32 %v4873_v1, %v2469_v41 }
 0x43f   : > { %v2112_v55 = vpop.permute.xlu1 %2111  ;;  %v2107_v12 = vpop.permute.xlu0 %2106 }
 0x440   : > { %v2434_v53 = vadd.f32 %v4874_v51, %v2433_v48  ;;  %v2471_v58 = vadd.f32 %v4875_v45, %v2470_v61  ;;  %vm2251_vm3 = vcmp.ge.f32.partialorder %v2107_v12, %v6647_v47  ;;  %vm2252_vm4 = vcmp.ge.f32.partialorder %v2107_v12, %v6650_v57 }
 0x441   : > { %vm2253_vm5 = vcmp.ge.f32.partialorder %v2112_v55, %v6647_v47  ;;  %vm2254_vm6 = vcmp.ge.f32.partialorder %v2112_v55, %v6650_v57  ;;  %v4878_v49 = vsel %vm2251_vm3, 1.0, %v5335_v8  ;;  %v4879_v40 = vsel %vm2252_vm4, 1.0, %v5335_v8 }
 0x442   : > { %v2435_v54 = vadd.f32 %v4876_v43, %v2434_v53  ;;  %v2472_v6 = vadd.f32 %v4877_v59, %v2471_v58  ;;  %v4880_v63 = vsel %vm2253_vm5, 1.0, %v5335_v8  ;;  %v4881_v10 = vsel %vm2254_vm6, 1.0, %v5335_v8 }
 0x443   : > { %v4882_v48 = vsel %vm2255_vm7, 1.0, %v5335_v8  ;;  %v4883_v61 = vsel %vm2256_vm8, 1.0, %v5335_v8  ;;  %vm2267_vm4 = vcmp.ge.f32.partialorder %v2147_v62, %v6647_v47  ;;  %vm2268_vm5 = vcmp.ge.f32.partialorder %v2147_v62, %v6650_v57 }
 0x444   : > { %v2436_v60 = vadd.f32 %v4878_v49, %v2435_v54  ;;  %v2473_v50 = vadd.f32 %v4879_v40, %v2472_v6  ;;  %v2162_v40 = vpop.permute.xlu2 %2161 }
 0x446   : > { %v2437_v42 = vadd.f32 %v4880_v63, %v2436_v60  ;;  %v2474_v41 = vadd.f32 %v4881_v10, %v2473_v50  ;;  %v4888_v60 = vsel %vm2261_vm13, 1.0, %v5335_v8  ;;  %v4889_v50 = vsel %vm2262_vm14, 1.0, %v5335_v8 }
 0x447   : > { %v2127_v46 = vpop.permute.xlu1 %2126  ;;  %v2122_v1 = vpop.permute.xlu0 %2121 }
 0x448   : > { %v2438_v55 = vadd.f32 %v4882_v48, %v2437_v42  ;;  %v2475_v12 = vadd.f32 %v4883_v61, %v2474_v41  ;;  %vm2259_vm9 = vcmp.ge.f32.partialorder %v2127_v46, %v6647_v47  ;;  %vm2260_vm10 = vcmp.ge.f32.partialorder %v2127_v46, %v6650_v57 }
 0x449   : > { %vm2257_vm11 = vcmp.ge.f32.partialorder %v2122_v1, %v6647_v47  ;;  %vm2258_vm12 = vcmp.ge.f32.partialorder %v2122_v1, %v6650_v57  ;;  %v4886_v58 = vsel %vm2259_vm9, 1.0, %v5335_v8  ;;  %v4887_v43 = vsel %vm2260_vm10, 1.0, %v5335_v8 }
 0x44a   : > { %v4884_v56 = vsel %vm2257_vm11, 1.0, %v5335_v8  ;;  %v4885_v51 = vsel %vm2258_vm12, 1.0, %v5335_v8  ;;  %vm2273_vm10 = vcmp.ge.f32.partialorder %v2162_v40, %v6647_v47  ;;  %vm2274_vm11 = vcmp.ge.f32.partialorder %v2162_v40, %v6650_v57 }
 0x44b   : > { %v2439_v45 = vadd.f32 %v4884_v56, %v2438_v55  ;;  %v2476_v53 = vadd.f32 %v4885_v51, %v2475_v12  ;;  %v4894_v51 = vsel %vm2267_vm4, 1.0, %v5335_v8 }
 0x44d   : > { %v2440_v59 = vadd.f32 %v4886_v58, %v2439_v45  ;;  %v2477_v54 = vadd.f32 %v4887_v43, %v2476_v53  ;;  %v4895_v45 = vsel %vm2268_vm5, 1.0, %v5335_v8  ;;  %v2177_v53 = vpop.permute.xlu2 %2176 }
 0x44f   : > { %v2142_v6 = vpop.permute.xlu1 %2141  ;;  %v2137_v49 = vpop.permute.xlu0 %2136  ;;  %v2441_v63 = vadd.f32 %v4888_v60, %v2440_v59  ;;  %v2478_v10 = vadd.f32 %v4889_v50, %v2477_v54 }
 0x450   : > { %vm2265_vm15 = vcmp.ge.f32.partialorder %v2142_v6, %v6647_v47  ;;  %vm2266_vm1 = vcmp.ge.f32.partialorder %v2142_v6, %v6650_v57  ;;  %vm2263_vm2 = vcmp.ge.f32.partialorder %v2137_v49, %v6647_v47  ;;  %vm2264_vm3 = vcmp.ge.f32.partialorder %v2137_v49, %v6650_v57 }
 0x451   : > { %v4890_v9 = vsel %vm2263_vm2, 1.0, %v5335_v8  ;;  %v4891_v42 = vsel %vm2264_vm3, 1.0, %v5335_v8  ;;  %v4892_v1 = vsel %vm2265_vm15, 1.0, %v5335_v8  ;;  %v4893_v48 = vsel %vm2266_vm1, 1.0, %v5335_v8 }
 0x452   : > { %v2442_v41 = vadd.f32 %v4890_v9, %v2441_v63  ;;  %v2479_v46 = vadd.f32 %v4891_v42, %v2478_v10  ;;  %v4900_v42 = vsel %vm2273_vm10, 1.0, %v5335_v8  ;;  %vm2279_vm1 = vcmp.ge.f32.partialorder %v2177_v53, %v6647_v47 }
 0x453   : > { %vm2280_vm2 = vcmp.ge.f32.partialorder %v2177_v53, %v6650_v57 }
 0x454   : > { %v2443_v61 = vadd.f32 %v4892_v1, %v2442_v41  ;;  %v2480_v55 = vadd.f32 %v4893_v48, %v2479_v46  ;;  %v4901_v41 = vsel %vm2274_vm11, 1.0, %v5335_v8 }
 0x456   : > { %v2444_v58 = vadd.f32 %v4894_v51, %v2443_v61  ;;  %v2481_v43 = vadd.f32 %v4895_v45, %v2480_v55  ;;  %v2192_v61 = vpop.permute.xlu2 %2191 }
 0x457   : > { %v2157_v12 = vpop.permute.xlu1 %2156  ;;  %v2152_v56 = vpop.permute.xlu0 %2151 }
 0x458   : > { %vm2271_vm6 = vcmp.ge.f32.partialorder %v2157_v12, %v6647_v47  ;;  %vm2272_vm7 = vcmp.ge.f32.partialorder %v2157_v12, %v6650_v57  ;;  %vm2269_vm8 = vcmp.ge.f32.partialorder %v2152_v56, %v6647_v47  ;;  %vm2270_vm9 = vcmp.ge.f32.partialorder %v2152_v56, %v6650_v57 }
 0x459   : > { %v4896_v62 = vsel %vm2269_vm8, 1.0, %v5335_v8  ;;  %v4897_v59 = vsel %vm2270_vm9, 1.0, %v5335_v8  ;;  %v4898_v49 = vsel %vm2271_vm6, 1.0, %v5335_v8  ;;  %v4899_v60 = vsel %vm2272_vm7, 1.0, %v5335_v8 }
 0x45a   : > { %v2445_v54 = vadd.f32 %v4896_v62, %v2444_v58  ;;  %v2482_v6 = vadd.f32 %v4897_v59, %v2481_v43  ;;  %v4906_v59 = vsel %vm2279_vm1, 1.0, %v5335_v8  ;;  %vm2285_vm7 = vcmp.ge.f32.partialorder %v2192_v61, %v6647_v47 }
 0x45b   : > { %vm2286_vm8 = vcmp.ge.f32.partialorder %v2192_v61, %v6650_v57 }
 0x45c   : > { %v2446_v50 = vadd.f32 %v4898_v49, %v2445_v54  ;;  %v2483_v63 = vadd.f32 %v4899_v60, %v2482_v6  ;;  %v4907_v54 = vsel %vm2280_vm2, 1.0, %v5335_v8 }
 0x45e   : > { %v2447_v46 = vadd.f32 %v4900_v42, %v2446_v50  ;;  %v2484_v1 = vadd.f32 %v4901_v41, %v2483_v63 }
 0x45f   : > { %v2172_v10 = vpop.permute.xlu1 %2171  ;;  %v2167_v9 = vpop.permute.xlu0 %2166 }
 0x460   : > { %vm2277_vm12 = vcmp.ge.f32.partialorder %v2172_v10, %v6647_v47  ;;  %vm2278_vm13 = vcmp.ge.f32.partialorder %v2172_v10, %v6650_v57  ;;  %vm2275_vm14 = vcmp.ge.f32.partialorder %v2167_v9, %v6647_v47  ;;  %vm2276_vm15 = vcmp.ge.f32.partialorder %v2167_v9, %v6650_v57 }
 0x461   : > { %v4902_v40 = vsel %vm2275_vm14, 1.0, %v5335_v8  ;;  %v4903_v48 = vsel %vm2276_vm15, 1.0, %v5335_v8  ;;  %v4904_v56 = vsel %vm2277_vm12, 1.0, %v5335_v8  ;;  %v4905_v51 = vsel %vm2278_vm13, 1.0, %v5335_v8 }
 0x462   : > { %v2448_v55 = vadd.f32 %v4902_v40, %v2447_v46  ;;  %v2485_v12 = vadd.f32 %v4903_v48, %v2484_v1  ;;  %v4912_v46 = vsel %vm2285_vm7, 1.0, %v5335_v8  ;;  %v4913_v1 = vsel %vm2286_vm8, 1.0, %v5335_v8  ;;  %v2207_v40 = vpop.permute.xlu2 %2206 }
 0x463   : > { %vm2291_vm13 = vcmp.ge.f32.partialorder %v2207_v40, %v6647_v47  ;;  %vm2292_vm14 = vcmp.ge.f32.partialorder %v2207_v40, %v6650_v57 }
 0x464   : > { %v2449_v45 = vadd.f32 %v4904_v56, %v2448_v55  ;;  %v2486_v58 = vadd.f32 %v4905_v51, %v2485_v12 }
 0x466   : > { %v2450_v6 = vadd.f32 %v4906_v59, %v2449_v45  ;;  %v2487_v49 = vadd.f32 %v4907_v54, %v2486_v58 }
 0x467   : > { %v2187_v43 = vpop.permute.xlu1 %2186  ;;  %v2182_v62 = vpop.permute.xlu0 %2181 }
 0x468   : > { %vm2283_vm3 = vcmp.ge.f32.partialorder %v2187_v43, %v6647_v47  ;;  %vm2284_vm4 = vcmp.ge.f32.partialorder %v2187_v43, %v6650_v57  ;;  %vm2281_vm5 = vcmp.ge.f32.partialorder %v2182_v62, %v6647_v47  ;;  %vm2282_vm6 = vcmp.ge.f32.partialorder %v2182_v62, %v6650_v57 }
 0x469   : > { %v4908_v53 = vsel %vm2281_vm5, 1.0, %v5335_v8  ;;  %v4909_v60 = vsel %vm2282_vm6, 1.0, %v5335_v8  ;;  %v4910_v10 = vsel %vm2283_vm3, 1.0, %v5335_v8  ;;  %v4911_v9 = vsel %vm2284_vm4, 1.0, %v5335_v8 }
 0x46a   : > { %v2451_v50 = vadd.f32 %v4908_v53, %v2450_v6  ;;  %v2488_v63 = vadd.f32 %v4909_v60, %v2487_v49  ;;  %v4918_v6 = vsel %vm2291_vm13, 1.0, %v5335_v8  ;;  %v4919_v49 = vsel %vm2292_vm14, 1.0, %v5335_v8 }
 0x46c   : > { %v2452_v42 = vadd.f32 %v4910_v10, %v2451_v50  ;;  %v2489_v41 = vadd.f32 %v4911_v9, %v2488_v63  ;;  %v2222_v10 = vpop.permute.xlu2 %2221 }
 0x46d   : > { %vm2297_vm4 = vcmp.ge.f32.partialorder %v2222_v10, %v6647_v47  ;;  %vm2298_vm5 = vcmp.ge.f32.partialorder %v2222_v10, %v6650_v57 }
 0x46e   : > { %v2453_v55 = vadd.f32 %v4912_v46, %v2452_v42  ;;  %v2490_v12 = vadd.f32 %v4913_v1, %v2489_v41 }
 0x46f   : > { %v2202_v48 = vpop.permute.xlu1 %2201  ;;  %v2197_v56 = vpop.permute.xlu0 %2196 }
 0x470   : > { %vm2289_vm9 = vcmp.ge.f32.partialorder %v2202_v48, %v6647_v47  ;;  %vm2290_vm10 = vcmp.ge.f32.partialorder %v2202_v48, %v6650_v57  ;;  %vm2287_vm11 = vcmp.ge.f32.partialorder %v2197_v56, %v6647_v47  ;;  %vm2288_vm12 = vcmp.ge.f32.partialorder %v2197_v56, %v6650_v57 }
 0x471   : > { %v4914_v61 = vsel %vm2287_vm11, 1.0, %v5335_v8  ;;  %v4915_v51 = vsel %vm2288_vm12, 1.0, %v5335_v8  ;;  %v4916_v43 = vsel %vm2289_vm9, 1.0, %v5335_v8  ;;  %v4917_v62 = vsel %vm2290_vm10, 1.0, %v5335_v8 }
 0x472   : > { %v2454_v45 = vadd.f32 %v4914_v61, %v2453_v55  ;;  %v2491_v58 = vadd.f32 %v4915_v51, %v2490_v12  ;;  %v4924_v12 = vsel %vm2297_vm4, 1.0, %v5335_v8  ;;  %v4925_v56 = vsel %vm2298_vm5, 1.0, %v5335_v8 }
 0x473   : > { %vm2508_vm10 = vcmask 1040384  }
 0x474   : > { %v2455_v59 = vadd.f32 %v4916_v43, %v2454_v45  ;;  %v2492_v54 = vadd.f32 %v4917_v62, %v2491_v58 }
 0x476   : > { %v2456_v60 = vadd.f32 %v4918_v6, %v2455_v59  ;;  %v2493_v50 = vadd.f32 %v4919_v49, %v2492_v54 }
 0x477   : > { %v2217_v53 = vpop.permute.xlu1 %2216  ;;  %v2212_v63 = vpop.permute.xlu0 %2211 }
 0x478   : > { %vm2295_vm15 = vcmp.ge.f32.partialorder %v2217_v53, %v6647_v47  ;;  %vm2296_vm1 = vcmp.ge.f32.partialorder %v2217_v53, %v6650_v57  ;;  %vm2293_vm2 = vcmp.ge.f32.partialorder %v2212_v63, %v6647_v47  ;;  %vm2294_vm3 = vcmp.ge.f32.partialorder %v2212_v63, %v6650_v57 }
 0x479   : > { %v4920_v9 = vsel %vm2293_vm2, 1.0, %v5335_v8  ;;  %v4921_v42 = vsel %vm2294_vm3, 1.0, %v5335_v8  ;;  %v4922_v1 = vsel %vm2295_vm15, 1.0, %v5335_v8  ;;  %v4923_v40 = vsel %vm2296_vm1, 1.0, %v5335_v8 }
 0x47a   : > { %v2457_v41 = vadd.f32 %v4920_v9, %v2456_v60  ;;  %v2494_v46 = vadd.f32 %v4921_v42, %v2493_v50 }
 0x47c   : > { %v2458_v48 = vadd.f32 %v4922_v1, %v2457_v41  ;;  %v2495_v55 = vadd.f32 %v4923_v40, %v2494_v46 }
 0x47e   : > { %v2459_v51 = vadd.f32 %v4924_v12, %v2458_v48  ;;  %v2496_v45 = vadd.f32 %v4925_v56, %v2495_v55  ;;  %v2073_v48 = vld [vmem:[#allocation2] sm:$0x3] }
 0x47f   : > { %v2232_v61 = vpop.permute.xlu1 %2231  ;;  %v2227_v58 = vpop.permute.xlu0 %2226 }
 0x480   : > { %vm2301_vm6 = vcmp.ge.f32.partialorder %v2232_v61, %v6647_v47  ;;  %vm2302_vm7 = vcmp.ge.f32.partialorder %v2232_v61, %v6650_v57  ;;  %vm2299_vm8 = vcmp.ge.f32.partialorder %v2227_v58, %v6647_v47  ;;  %vm2300_vm9 = vcmp.ge.f32.partialorder %v2227_v58, %v6650_v57 }
 0x481   : > { %v4926_v43 = vsel %vm2299_vm8, 1.0, %v5335_v8  ;;  %v4927_v62 = vsel %vm2300_vm9, 1.0, %v5335_v8  ;;  %v4928_v6 = vsel %vm2301_vm6, 1.0, %v5335_v8  ;;  %v4929_v49 = vsel %vm2302_vm7, 1.0, %v5335_v8 }
 0x482   : > { %v2460_v59 = vadd.f32 %v4926_v43, %v2459_v51  ;;  %v2497_v54 = vadd.f32 %v4927_v62, %v2496_v45 }
 0x484   : > { %v2461_v53 = vadd.f32 %v4928_v6, %v2460_v59  ;;  %v2498_v60 = vadd.f32 %v4929_v49, %v2497_v54 }
 0x486   : > { %v2462_v50 = vrot.slane %v2461_v53, 4  ;;  %v2499_v63 = vrot.slane %v2498_v60, 4 }
 0x488   : > { %v2463_v10 = vadd.f32 %v2462_v50, %v2461_v53  ;;  %v2500_v9 = vadd.f32 %v2499_v63, %v2498_v60 }
 0x48a   : > { %v2464_v42 = vrot.slane %v2463_v10, 2  ;;  %v2501_v47 = vrot.slane %v2500_v9, 2 }
 0x48c   : > { %v2465_v41 = vadd.f32 %v2464_v42, %v2463_v10  ;;  %v2502_v57 = vadd.f32 %v2501_v47, %v2500_v9 }
 0x48e   : > { %v2466_v46 = vrot.slane %v2465_v41, 1  ;;  %v2503_v1 = vrot.slane %v2502_v57, 1 }
 0x490   : > { %v2504_v40 = vadd.f32 %v2503_v1, %v2502_v57  ;;  %v2467_v55 = vadd.f32 %v2466_v46, %v2465_v41 }
 0x492   : > { %v2507_v12 = vrot.slane %v2504_v40, 7 }
 0x494   : > { %v2509_v56 = vsel %vm2508_vm10, %v2467_v55, %v2507_v12 }
 0x495   : > { %v2511_v61 = vadd.f32 %v2509_v56, %v2073_v48 }
 0x497   : > { %2512 = vst.msk [vmem:[#allocation2] sm:$0x3] %vm5452_vm0, %v2511_v61 }
 0x498 PF: > { %p4930_p3 = scmp.gt.s32.totalorder %s5384_s16, 2 }
 0x49a   : > { %2516 = sbr.rel (%p4930_p3) target bundleno = 1405 (0x57d), region = 56 }
 0x49f   : > { %v5336_v8 = vmov 0  }
 0x4a0   : > { %5251 = vset.pattern.permute.xlu2 %v5336_v8  ;;  %5250 = vset.pattern.permute.xlu1 %v5336_v8 }
 0x4a1   : > { %5249 = vset.pattern.permute.xlu0 %v5336_v8  ;;  %2540 = vperm.xlu2 %5251, %v6476_v5  }
 0x4a2   : > { %2530 = vperm.xlu1 %5250, %v6466_v3   ;;  %2520 = vperm.xlu0 %5249, %v6456_v15  }
 0x4a9   : > { %2545 = vperm.xlu2 %5251, %v6481_v13   ;;  %v6820_v13 = vperm.slane %v5523_v21, 0 }
 0x4aa   : > { %2535 = vperm.xlu1 %5250, %v6471_v4   ;;  %2525 = vperm.xlu0 %5249, %v6461_v2  }
 0x4b1   : > { %2560 = vperm.xlu2 %5251, %v6496_v17  }
 0x4b2   : > { %2555 = vperm.xlu1 %5250, %v6491_v16   ;;  %2550 = vperm.xlu0 %5249, %v6486_v14   ;;  %v6823_v14 = vperm.slane %v5523_v21, 1 }
 0x4b9   : > { %2575 = vperm.xlu2 %5251, %v6511_v20  }
 0x4ba   : > { %2570 = vperm.xlu1 %5250, %v6506_v19   ;;  %2565 = vperm.xlu0 %5249, %v6501_v18   ;;  %v5337_v18 = vmov 0.0  }
 0x4c1   : > { %2590 = vperm.xlu2 %5251, %v6526_v24  }
 0x4c2   : > { %2585 = vperm.xlu1 %5250, %v6521_v23   ;;  %2580 = vperm.xlu0 %5249, %v6516_v22  }
 0x4c9   : > { %2605 = vperm.xlu2 %5251, %v6541_v27  }
 0x4ca   : > { %2600 = vperm.xlu1 %5250, %v6536_v26   ;;  %2595 = vperm.xlu0 %5249, %v6531_v25  }
 0x4d1   : > { %2620 = vperm.xlu2 %5251, %v6556_v30  }
 0x4d2   : > { %2615 = vperm.xlu1 %5250, %v6551_v29   ;;  %2610 = vperm.xlu0 %5249, %v6546_v28  }
 0x4d9   : > { %2635 = vperm.xlu2 %5251, %v6571_v33  }
 0x4da   : > { %2630 = vperm.xlu1 %5250, %v6566_v32   ;;  %2625 = vperm.xlu0 %5249, %v6561_v31  }
 0x4e1   : > { %2650 = vperm.xlu2 %5251, %v6586_v36  }
 0x4e2   : > { %2645 = vperm.xlu1 %5250, %v6581_v35   ;;  %2640 = vperm.xlu0 %5249, %v6576_v34  }
 0x4e9   : > { %2665 = vperm.xlu2 %5251, %v6601_v44  }
 0x4ea   : > { %2660 = vperm.xlu1 %5250, %v6596_v37   ;;  %2655 = vperm.xlu0 %5249, %v6591_v39  }
 0x4f2   : > { %2675 = vperm.xlu1 %5250, %v6611_v52   ;;  %2670 = vperm.xlu0 %5249, %v6606_v38  }
 0x4fb   : > { %v2541_v15 = vpop.permute.xlu2 %2540 }
 0x4fc   : > { %vm2691_vm4 = vcmp.gt.f32.partialorder %v2541_v15, %v6820_v13  ;;  %vm2692_vm5 = vcmp.gt.f32.partialorder %v2541_v15, %v6823_v14 }
 0x4fd   : > { %v4939_v39 = vsel %vm2691_vm4, 1.0, %v5337_v18  ;;  %v4940_v37 = vsel %vm2692_vm5, 1.0, %v5337_v18 }
 0x503   : > { %v2546_v2 = vpop.permute.xlu2 %2545 }
 0x504   : > { %vm2693_vm6 = vcmp.gt.f32.partialorder %v2546_v2, %v6820_v13  ;;  %vm2694_vm7 = vcmp.gt.f32.partialorder %v2546_v2, %v6823_v14 }
 0x505   : > { %v4941_v52 = vsel %vm2693_vm6, 1.0, %v5337_v18  ;;  %v4942_v51 = vsel %vm2694_vm7, 1.0, %v5337_v18 }
 0x50b   : > { %v2561_v5 = vpop.permute.xlu2 %2560 }
 0x513   : > { %v6837_v26 = vpop.permute.xlu2 %2575 }
 0x514   : > { %v2531_v3 = vpop.permute.xlu1 %2530  ;;  %v2521_v4 = vpop.permute.xlu0 %2520  ;;  %vm2706_vm4 = vcmp.gt.f32.partialorder %v6837_v26, %v6823_v14 }
 0x515   : > { %vm2683_vm11 = vcmp.gt.f32.partialorder %v2521_v4, %v6820_v13  ;;  %vm2684_vm12 = vcmp.gt.f32.partialorder %v2521_v4, %v6823_v14  ;;  %vm2687_vm13 = vcmp.gt.f32.partialorder %v2531_v3, %v6820_v13  ;;  %vm2688_vm14 = vcmp.gt.f32.partialorder %v2531_v3, %v6823_v14 }
 0x516   : > { %v4931_v19 = vsel %vm2683_vm11, 1.0, %v5337_v18  ;;  %v4932_v20 = vsel %vm2684_vm12, 1.0, %v5337_v18  ;;  %v4935_v27 = vsel %vm2687_vm13, 1.0, %v5337_v18  ;;  %v4936_v28 = vsel %vm2688_vm14, 1.0, %v5337_v18 }
 0x517   : > { %vm2699_vm12 = vcmp.gt.f32.partialorder %v2561_v5, %v6820_v13  ;;  %vm2700_vm13 = vcmp.gt.f32.partialorder %v2561_v5, %v6823_v14  ;;  %v4954_v3 = vsel %vm2706_vm4, 1.0, %v5337_v18 }
 0x518   : > { %v4947_v9 = vsel %vm2699_vm12, 1.0, %v5337_v18  ;;  %v4948_v42 = vsel %vm2700_vm13, 1.0, %v5337_v18 }
 0x51b   : > { %v2591_v6 = vpop.permute.xlu2 %2590 }
 0x51c   : > { %v2536_v16 = vpop.permute.xlu1 %2535  ;;  %v2526_v17 = vpop.permute.xlu0 %2525 }
 0x51d   : > { %vm2685_vm15 = vcmp.gt.f32.partialorder %v2526_v17, %v6820_v13  ;;  %vm2686_vm1 = vcmp.gt.f32.partialorder %v2526_v17, %v6823_v14  ;;  %vm2689_vm2 = vcmp.gt.f32.partialorder %v2536_v16, %v6820_v13  ;;  %vm2690_vm3 = vcmp.gt.f32.partialorder %v2536_v16, %v6823_v14 }
 0x51e   : > { %v4933_v22 = vsel %vm2685_vm15, 1.0, %v5337_v18  ;;  %v4934_v23 = vsel %vm2686_vm1, 1.0, %v5337_v18  ;;  %v4937_v31 = vsel %vm2689_vm2, 1.0, %v5337_v18  ;;  %v4938_v32 = vsel %vm2690_vm3, 1.0, %v5337_v18 }
 0x51f   : > { %v2875_v24 = vadd.f32 %v4933_v22, %v4931_v19  ;;  %v2912_v25 = vadd.f32 %v4934_v23, %v4932_v20  ;;  %vm2705_vm3 = vcmp.gt.f32.partialorder %v6837_v26, %v6820_v13 }
 0x520   : > { %v4953_v2 = vsel %vm2705_vm3, 1.0, %v5337_v18 }
 0x521   : > { %v2876_v29 = vadd.f32 %v4935_v27, %v2875_v24  ;;  %v2913_v30 = vadd.f32 %v4936_v28, %v2912_v25 }
 0x523   : > { %v2877_v33 = vadd.f32 %v4937_v31, %v2876_v29  ;;  %v2914_v34 = vadd.f32 %v4938_v32, %v2913_v30  ;;  %v2606_v15 = vpop.permute.xlu2 %2605 }
 0x524   : > { %v2556_v35 = vpop.permute.xlu1 %2555  ;;  %v2551_v36 = vpop.permute.xlu0 %2550 }
 0x525   : > { %v2878_v44 = vadd.f32 %v4939_v39, %v2877_v33  ;;  %v2915_v38 = vadd.f32 %v4940_v37, %v2914_v34  ;;  %vm2695_vm8 = vcmp.gt.f32.partialorder %v2551_v36, %v6820_v13  ;;  %vm2696_vm9 = vcmp.gt.f32.partialorder %v2551_v36, %v6823_v14 }
 0x526   : > { %vm2697_vm10 = vcmp.gt.f32.partialorder %v2556_v35, %v6820_v13  ;;  %vm2698_vm11 = vcmp.gt.f32.partialorder %v2556_v35, %v6823_v14  ;;  %v4943_v43 = vsel %vm2695_vm8, 1.0, %v5337_v18  ;;  %v4944_v62 = vsel %vm2696_vm9, 1.0, %v5337_v18 }
 0x527   : > { %v2879_v45 = vadd.f32 %v4941_v52, %v2878_v44  ;;  %v2916_v58 = vadd.f32 %v4942_v51, %v2915_v38  ;;  %v4945_v49 = vsel %vm2697_vm10, 1.0, %v5337_v18  ;;  %v4946_v53 = vsel %vm2698_vm11, 1.0, %v5337_v18 }
 0x528   : > { %vm2711_vm9 = vcmp.gt.f32.partialorder %v2591_v6, %v6820_v13  ;;  %vm2712_vm10 = vcmp.gt.f32.partialorder %v2591_v6, %v6823_v14 }
 0x529   : > { %v2880_v59 = vadd.f32 %v4943_v43, %v2879_v45  ;;  %v2917_v54 = vadd.f32 %v4944_v62, %v2916_v58  ;;  %v4959_v28 = vsel %vm2711_vm9, 1.0, %v5337_v18  ;;  %v4960_v29 = vsel %vm2712_vm10, 1.0, %v5337_v18 }
 0x52b   : > { %v2881_v60 = vadd.f32 %v4945_v49, %v2880_v59  ;;  %v2918_v50 = vadd.f32 %v4946_v53, %v2917_v54  ;;  %v2621_v30 = vpop.permute.xlu2 %2620 }
 0x52c   : > { %v2571_v63 = vpop.permute.xlu1 %2570  ;;  %v2566_v10 = vpop.permute.xlu0 %2565 }
 0x52d   : > { %v2882_v47 = vadd.f32 %v4947_v9, %v2881_v60  ;;  %v2919_v41 = vadd.f32 %v4948_v42, %v2918_v50  ;;  %vm2703_vm14 = vcmp.gt.f32.partialorder %v2571_v63, %v6820_v13  ;;  %vm2704_vm15 = vcmp.gt.f32.partialorder %v2571_v63, %v6823_v14 }
 0x52e   : > { %vm2701_vm1 = vcmp.gt.f32.partialorder %v2566_v10, %v6820_v13  ;;  %vm2702_vm2 = vcmp.gt.f32.partialorder %v2566_v10, %v6823_v14  ;;  %v4951_v48 = vsel %vm2703_vm14, 1.0, %v5337_v18  ;;  %v4952_v55 = vsel %vm2704_vm15, 1.0, %v5337_v18 }
 0x52f   : > { %v4949_v57 = vsel %vm2701_vm1, 1.0, %v5337_v18  ;;  %v4950_v46 = vsel %vm2702_vm2, 1.0, %v5337_v18  ;;  %vm2717_vm15 = vcmp.gt.f32.partialorder %v2606_v15, %v6820_v13  ;;  %vm2718_vm1 = vcmp.gt.f32.partialorder %v2606_v15, %v6823_v14 }
 0x530   : > { %v2883_v1 = vadd.f32 %v4949_v57, %v2882_v47  ;;  %v2920_v40 = vadd.f32 %v4950_v46, %v2919_v41  ;;  %v4965_v45 = vsel %vm2717_vm15, 1.0, %v5337_v18  ;;  %v4966_v58 = vsel %vm2718_vm1, 1.0, %v5337_v18 }
 0x532   : > { %v2884_v12 = vadd.f32 %v4951_v48, %v2883_v1  ;;  %v2921_v56 = vadd.f32 %v4952_v55, %v2920_v40 }
 0x533   : > { %v2636_v6 = vpop.permute.xlu2 %2635 }
 0x534   : > { %v2586_v61 = vpop.permute.xlu1 %2585  ;;  %v2581_v8 = vpop.permute.xlu0 %2580  ;;  %v2885_v4 = vadd.f32 %v4953_v2, %v2884_v12  ;;  %v2922_v5 = vadd.f32 %v4954_v3, %v2921_v56 }
 0x535   : > { %vm2709_vm5 = vcmp.gt.f32.partialorder %v2586_v61, %v6820_v13  ;;  %vm2710_vm6 = vcmp.gt.f32.partialorder %v2586_v61, %v6823_v14  ;;  %vm2707_vm7 = vcmp.gt.f32.partialorder %v2581_v8, %v6820_v13  ;;  %vm2708_vm8 = vcmp.gt.f32.partialorder %v2581_v8, %v6823_v14 }
 0x536   : > { %v4955_v16 = vsel %vm2707_vm7, 1.0, %v5337_v18  ;;  %v4956_v17 = vsel %vm2708_vm8, 1.0, %v5337_v18  ;;  %v4957_v22 = vsel %vm2709_vm5, 1.0, %v5337_v18  ;;  %v4958_v23 = vsel %vm2710_vm6, 1.0, %v5337_v18 }
 0x537   : > { %v2886_v19 = vadd.f32 %v4955_v16, %v2885_v4  ;;  %v2923_v20 = vadd.f32 %v4956_v17, %v2922_v5  ;;  %vm2723_vm6 = vcmp.gt.f32.partialorder %v2621_v30, %v6820_v13  ;;  %vm2724_vm7 = vcmp.gt.f32.partialorder %v2621_v30, %v6823_v14 }
 0x538   : > { %v4971_v47 = vsel %vm2723_vm6, 1.0, %v5337_v18  ;;  %v4972_v41 = vsel %vm2724_vm7, 1.0, %v5337_v18 }
 0x539   : > { %v2887_v24 = vadd.f32 %v4957_v22, %v2886_v19  ;;  %v2924_v25 = vadd.f32 %v4958_v23, %v2923_v20 }
 0x53b   : > { %v2888_v31 = vadd.f32 %v4959_v28, %v2887_v24  ;;  %v2925_v32 = vadd.f32 %v4960_v29, %v2924_v25  ;;  %v2651_v3 = vpop.permute.xlu2 %2650 }
 0x53c   : > { %v2601_v26 = vpop.permute.xlu1 %2600  ;;  %v2596_v27 = vpop.permute.xlu0 %2595 }
 0x53d   : > { %vm2715_vm11 = vcmp.gt.f32.partialorder %v2601_v26, %v6820_v13  ;;  %vm2716_vm12 = vcmp.gt.f32.partialorder %v2601_v26, %v6823_v14  ;;  %vm2713_vm13 = vcmp.gt.f32.partialorder %v2596_v27, %v6820_v13  ;;  %vm2714_vm14 = vcmp.gt.f32.partialorder %v2596_v27, %v6823_v14 }
 0x53e   : > { %v4961_v33 = vsel %vm2713_vm13, 1.0, %v5337_v18  ;;  %v4962_v34 = vsel %vm2714_vm14, 1.0, %v5337_v18  ;;  %v4963_v39 = vsel %vm2715_vm11, 1.0, %v5337_v18  ;;  %v4964_v37 = vsel %vm2716_vm12, 1.0, %v5337_v18 }
 0x53f   : > { %v2889_v35 = vadd.f32 %v4961_v33, %v2888_v31  ;;  %v2926_v36 = vadd.f32 %v4962_v34, %v2925_v32  ;;  %vm2729_vm12 = vcmp.gt.f32.partialorder %v2636_v6, %v6820_v13  ;;  %vm2730_vm13 = vcmp.gt.f32.partialorder %v2636_v6, %v6823_v14 }
 0x540   : > { %v4977_v15 = vsel %vm2729_vm12, 1.0, %v5337_v18  ;;  %v4978_v2 = vsel %vm2730_vm13, 1.0, %v5337_v18 }
 0x541   : > { %v2890_v44 = vadd.f32 %v4963_v39, %v2889_v35  ;;  %v2927_v38 = vadd.f32 %v4964_v37, %v2926_v36 }
 0x543   : > { %v2891_v43 = vadd.f32 %v4965_v45, %v2890_v44  ;;  %v2928_v62 = vadd.f32 %v4966_v58, %v2927_v38  ;;  %v2666_v34 = vpop.permute.xlu2 %2665 }
 0x544   : > { %v2616_v52 = vpop.permute.xlu1 %2615  ;;  %v2611_v51 = vpop.permute.xlu0 %2610 }
 0x545   : > { %vm2721_vm2 = vcmp.gt.f32.partialorder %v2616_v52, %v6820_v13  ;;  %vm2722_vm3 = vcmp.gt.f32.partialorder %v2616_v52, %v6823_v14  ;;  %vm2719_vm4 = vcmp.gt.f32.partialorder %v2611_v51, %v6820_v13  ;;  %vm2720_vm5 = vcmp.gt.f32.partialorder %v2611_v51, %v6823_v14 }
 0x546   : > { %v4967_v59 = vsel %vm2719_vm4, 1.0, %v5337_v18  ;;  %v4968_v54 = vsel %vm2720_vm5, 1.0, %v5337_v18  ;;  %v4969_v60 = vsel %vm2721_vm2, 1.0, %v5337_v18  ;;  %v4970_v50 = vsel %vm2722_vm3, 1.0, %v5337_v18 }
 0x547   : > { %v2892_v49 = vadd.f32 %v4967_v59, %v2891_v43  ;;  %v2929_v53 = vadd.f32 %v4968_v54, %v2928_v62  ;;  %vm2735_vm3 = vcmp.gt.f32.partialorder %v2651_v3, %v6820_v13  ;;  %vm2736_vm4 = vcmp.gt.f32.partialorder %v2651_v3, %v6823_v14 }
 0x548   : > { %v4983_v28 = vsel %vm2735_vm3, 1.0, %v5337_v18  ;;  %v4984_v29 = vsel %vm2736_vm4, 1.0, %v5337_v18 }
 0x549   : > { %v2893_v63 = vadd.f32 %v4969_v60, %v2892_v49  ;;  %v2930_v10 = vadd.f32 %v4970_v50, %v2929_v53 }
 0x54b   : > { %v2894_v57 = vadd.f32 %v4971_v47, %v2893_v63  ;;  %v2931_v46 = vadd.f32 %v4972_v41, %v2930_v10 }
 0x54c   : > { %v2631_v9 = vpop.permute.xlu1 %2630  ;;  %v2626_v42 = vpop.permute.xlu0 %2625 }
 0x54d   : > { %vm2727_vm8 = vcmp.gt.f32.partialorder %v2631_v9, %v6820_v13  ;;  %vm2728_vm9 = vcmp.gt.f32.partialorder %v2631_v9, %v6823_v14  ;;  %vm2725_vm10 = vcmp.gt.f32.partialorder %v2626_v42, %v6820_v13  ;;  %vm2726_vm11 = vcmp.gt.f32.partialorder %v2626_v42, %v6823_v14 }
 0x54e   : > { %v4973_v1 = vsel %vm2725_vm10, 1.0, %v5337_v18  ;;  %v4974_v40 = vsel %vm2726_vm11, 1.0, %v5337_v18  ;;  %v4975_v12 = vsel %vm2727_vm8, 1.0, %v5337_v18  ;;  %v4976_v56 = vsel %vm2728_vm9, 1.0, %v5337_v18 }
 0x54f   : > { %v2895_v48 = vadd.f32 %v4973_v1, %v2894_v57  ;;  %v2932_v55 = vadd.f32 %v4974_v40, %v2931_v46  ;;  %vm2741_vm9 = vcmp.gt.f32.partialorder %v2666_v34, %v6820_v13  ;;  %vm2742_vm10 = vcmp.gt.f32.partialorder %v2666_v34, %v6823_v14 }
 0x550   : > { %v4989_v45 = vsel %vm2741_vm9, 1.0, %v5337_v18  ;;  %v4990_v58 = vsel %vm2742_vm10, 1.0, %v5337_v18 }
 0x551   : > { %v2896_v61 = vadd.f32 %v4975_v12, %v2895_v48  ;;  %v2933_v8 = vadd.f32 %v4976_v56, %v2932_v55  ;;  %v2517_v12 = vld [vmem:[#allocation2] sm:$0x3] }
 0x553   : > { %v2897_v5 = vadd.f32 %v4977_v15, %v2896_v61  ;;  %v2934_v16 = vadd.f32 %v4978_v2, %v2933_v8 }
 0x554   : > { %v2646_v4 = vpop.permute.xlu1 %2645  ;;  %v2641_v17 = vpop.permute.xlu0 %2640 }
 0x555   : > { %vm2733_vm14 = vcmp.gt.f32.partialorder %v2646_v4, %v6820_v13  ;;  %vm2734_vm15 = vcmp.gt.f32.partialorder %v2646_v4, %v6823_v14  ;;  %vm2731_vm1 = vcmp.gt.f32.partialorder %v2641_v17, %v6820_v13  ;;  %vm2732_vm2 = vcmp.gt.f32.partialorder %v2641_v17, %v6823_v14 }
 0x556   : > { %v4979_v19 = vsel %vm2731_vm1, 1.0, %v5337_v18  ;;  %v4980_v20 = vsel %vm2732_vm2, 1.0, %v5337_v18  ;;  %v4981_v24 = vsel %vm2733_vm14, 1.0, %v5337_v18  ;;  %v4982_v25 = vsel %vm2734_vm15, 1.0, %v5337_v18 }
 0x557   : > { %v2898_v22 = vadd.f32 %v4979_v19, %v2897_v5  ;;  %v2935_v23 = vadd.f32 %v4980_v20, %v2934_v16  ;;  %vm2952_vm15 = vcmask 1040384  }
 0x559   : > { %v2899_v26 = vadd.f32 %v4981_v24, %v2898_v22  ;;  %v2936_v27 = vadd.f32 %v4982_v25, %v2935_v23 }
 0x55b   : > { %v2900_v31 = vadd.f32 %v4983_v28, %v2899_v26  ;;  %v2937_v32 = vadd.f32 %v4984_v29, %v2936_v27 }
 0x55c   : > { %v2661_v30 = vpop.permute.xlu1 %2660  ;;  %v2656_v33 = vpop.permute.xlu0 %2655 }
 0x55d   : > { %vm2739_vm5 = vcmp.gt.f32.partialorder %v2661_v30, %v6820_v13  ;;  %vm2740_vm6 = vcmp.gt.f32.partialorder %v2661_v30, %v6823_v14  ;;  %vm2737_vm7 = vcmp.gt.f32.partialorder %v2656_v33, %v6820_v13  ;;  %vm2738_vm8 = vcmp.gt.f32.partialorder %v2656_v33, %v6823_v14 }
 0x55e   : > { %v4985_v35 = vsel %vm2737_vm7, 1.0, %v5337_v18  ;;  %v4986_v36 = vsel %vm2738_vm8, 1.0, %v5337_v18  ;;  %v4987_v44 = vsel %vm2739_vm5, 1.0, %v5337_v18  ;;  %v4988_v38 = vsel %vm2740_vm6, 1.0, %v5337_v18 }
 0x55f   : > { %v2901_v39 = vadd.f32 %v4985_v35, %v2900_v31  ;;  %v2938_v37 = vadd.f32 %v4986_v36, %v2937_v32 }
 0x561   : > { %v2902_v52 = vadd.f32 %v4987_v44, %v2901_v39  ;;  %v2939_v51 = vadd.f32 %v4988_v38, %v2938_v37 }
 0x563   : > { %v2903_v62 = vadd.f32 %v4989_v45, %v2902_v52  ;;  %v2940_v59 = vadd.f32 %v4990_v58, %v2939_v51 }
 0x564   : > { %v2676_v43 = vpop.permute.xlu1 %2675  ;;  %v2671_v54 = vpop.permute.xlu0 %2670 }
 0x565   : > { %vm2745_vm11 = vcmp.gt.f32.partialorder %v2676_v43, %v6820_v13  ;;  %vm2746_vm12 = vcmp.gt.f32.partialorder %v2676_v43, %v6823_v14  ;;  %vm2743_vm13 = vcmp.gt.f32.partialorder %v2671_v54, %v6820_v13  ;;  %vm2744_vm14 = vcmp.gt.f32.partialorder %v2671_v54, %v6823_v14 }
 0x566   : > { %v4991_v6 = vsel %vm2743_vm13, 1.0, %v5337_v18  ;;  %v4992_v49 = vsel %vm2744_vm14, 1.0, %v5337_v18  ;;  %v4993_v50 = vsel %vm2745_vm11, 1.0, %v5337_v18  ;;  %v4994_v63 = vsel %vm2746_vm12, 1.0, %v5337_v18 }
 0x567   : > { %v2904_v53 = vadd.f32 %v4991_v6, %v2903_v62  ;;  %v2941_v60 = vadd.f32 %v4992_v49, %v2940_v59 }
 0x569   : > { %v2905_v10 = vadd.f32 %v4993_v50, %v2904_v53  ;;  %v2942_v9 = vadd.f32 %v4994_v63, %v2941_v60 }
 0x56b   : > { %v2906_v42 = vrot.slane %v2905_v10, 4  ;;  %v2943_v47 = vrot.slane %v2942_v9, 4 }
 0x56d   : > { %v2907_v41 = vadd.f32 %v2906_v42, %v2905_v10  ;;  %v2944_v57 = vadd.f32 %v2943_v47, %v2942_v9 }
 0x56f   : > { %v2908_v46 = vrot.slane %v2907_v41, 2  ;;  %v2945_v13 = vrot.slane %v2944_v57, 2 }
 0x571   : > { %v2909_v1 = vadd.f32 %v2908_v46, %v2907_v41  ;;  %v2946_v14 = vadd.f32 %v2945_v13, %v2944_v57 }
 0x573   : > { %v2910_v40 = vrot.slane %v2909_v1, 1  ;;  %v2947_v48 = vrot.slane %v2946_v14, 1 }
 0x575   : > { %v2948_v55 = vadd.f32 %v2947_v48, %v2946_v14  ;;  %v2911_v56 = vadd.f32 %v2910_v40, %v2909_v1 }
 0x577   : > { %v2951_v61 = vrot.slane %v2948_v55, 7 }
 0x579   : > { %v2953_v8 = vsel %vm2952_vm15, %v2911_v56, %v2951_v61 }
 0x57a   : > { %v2955_v15 = vadd.f32 %v2953_v8, %v2517_v12 }
 0x57c   : > { %2956 = vst.msk [vmem:[#allocation2] sm:$0x3] %vm5452_vm0, %v2955_v15 }
 0x57d PF: > { %v6962_v18 = vld [vmem:[%s7814_s1 + $0x300] sm:$0xff]  ;;  %v6967_v2 = vld [vmem:[%s7814_s1 + $0x308] sm:$0xff]  ;;  %v6972_v3 = vld [vmem:[%s7814_s1 + $0x310] sm:$0xff]  ;;  %p4995_p4 = scmp.le.s32.totalorder %s5384_s16, 3 }
 0x57e   : > { %v6977_v4 = vld [vmem:[%s7814_s1 + $0x318] sm:$0xff]  ;;  %v6982_v5 = vld [vmem:[%s7814_s1 + $0x320] sm:$0xff]  ;;  %v6987_v16 = vld [vmem:[%s7814_s1 + $0x328] sm:$0xff] }
 0x57f   : > { %v6992_v17 = vld [vmem:[%s7814_s1 + $0x330] sm:$0xff]  ;;  %v6997_v19 = vld [vmem:[%s7814_s1 + $0x338] sm:$0xff]  ;;  %v7002_v20 = vld [vmem:[%s7814_s1 + $0x340] sm:$0xff] }
 0x580   : > { %v7007_v22 = vld [vmem:[%s7814_s1 + $0x348] sm:$0xff]  ;;  %v7012_v23 = vld [vmem:[%s7814_s1 + $0x350] sm:$0xff]  ;;  %v7017_v24 = vld [vmem:[%s7814_s1 + $0x358] sm:$0xff] }
 0x581   : > { %v7022_v25 = vld [vmem:[%s7814_s1 + $0x360] sm:$0xff]  ;;  %v7027_v26 = vld [vmem:[%s7814_s1 + $0x368] sm:$0xff]  ;;  %v7032_v27 = vld [vmem:[%s7814_s1 + $0x370] sm:$0xff] }
 0x582   : > { %v7037_v28 = vld [vmem:[%s7814_s1 + $0x378] sm:$0xff]  ;;  %v7042_v29 = vld [vmem:[%s7814_s1 + $0x380] sm:$0xff]  ;;  %v7047_v30 = vld [vmem:[%s7814_s1 + $0x388] sm:$0xff] }
 0x583   : > { %v7052_v31 = vld [vmem:[%s7814_s1 + $0x390] sm:$0xff]  ;;  %v7057_v32 = vld [vmem:[%s7814_s1 + $0x398] sm:$0xff]  ;;  %v7062_v33 = vld [vmem:[%s7814_s1 + $0x3a0] sm:$0xff]  ;;  %2992 = sbr.rel (%p4995_p4) target bundleno = 1638 (0x666), region = 60 }
 0x584   : > { %v7067_v34 = vld [vmem:[%s7814_s1 + $0x3a8] sm:$0xff]  ;;  %v7072_v35 = vld [vmem:[%s7814_s1 + $0x3b0] sm:$0xff]  ;;  %v7077_v36 = vld [vmem:[%s7814_s1 + $0x3b8] sm:$0xff] }
 0x585   : > { %v7082_v39 = vld [vmem:[%s7814_s1 + $0x3c0] sm:$0xff]  ;;  %v7087_v37 = vld [vmem:[%s7814_s1 + $0x3c8] sm:$0xff]  ;;  %v7092_v44 = vld [vmem:[%s7814_s1 + $0x3d0] sm:$0xff] }
 0x586   : > { %v7097_v38 = vld [vmem:[%s7814_s1 + $0x3d8] sm:$0xff]  ;;  %v7102_v52 = vld [vmem:[%s7814_s1 + $0x3e0] sm:$0xff]  ;;  %v7107_v51 = vld [vmem:[%s7814_s1 + $0x3e8] sm:$0xff] }
 0x587   : > { %v7112_v45 = vld [vmem:[%s7814_s1 + $0x3f0] sm:$0xff]  ;;  %v7117_v58 = vld [vmem:[%s7814_s1 + $0x3f8] sm:$0xff] }
 0x588   : > { %v5338_v43 = vmov 0   ;;  %v7153_v53 = vperm.slane %v5523_v21, 0  ;;  %v7156_v60 = vperm.slane %v5523_v21, 1  ;;  %v5339_v10 = vmov 0.0  }
 0x589   : > { %5254 = vset.pattern.permute.xlu2 %v5338_v43  ;;  %5253 = vset.pattern.permute.xlu1 %v5338_v43 }
 0x58a   : > { %5252 = vset.pattern.permute.xlu0 %v5338_v43  ;;  %3016 = vperm.xlu2 %5254, %v6982_v5  }
 0x58b   : > { %3006 = vperm.xlu1 %5253, %v6972_v3   ;;  %2996 = vperm.xlu0 %5252, %v6962_v18  }
 0x592   : > { %3021 = vperm.xlu2 %5254, %v6987_v16  }
 0x593   : > { %3011 = vperm.xlu1 %5253, %v6977_v4   ;;  %3001 = vperm.xlu0 %5252, %v6967_v2  }
 0x59a   : > { %3036 = vperm.xlu2 %5254, %v7002_v20  }
 0x59b   : > { %3031 = vperm.xlu1 %5253, %v6997_v19   ;;  %3026 = vperm.xlu0 %5252, %v6992_v17  }
 0x5a2   : > { %3051 = vperm.xlu2 %5254, %v7017_v24  }
 0x5a3   : > { %3046 = vperm.xlu1 %5253, %v7012_v23   ;;  %3041 = vperm.xlu0 %5252, %v7007_v22  }
 0x5aa   : > { %3066 = vperm.xlu2 %5254, %v7032_v27  }
 0x5ab   : > { %3061 = vperm.xlu1 %5253, %v7027_v26   ;;  %3056 = vperm.xlu0 %5252, %v7022_v25  }
 0x5b2   : > { %3081 = vperm.xlu2 %5254, %v7047_v30  }
 0x5b3   : > { %3076 = vperm.xlu1 %5253, %v7042_v29   ;;  %3071 = vperm.xlu0 %5252, %v7037_v28  }
 0x5ba   : > { %3096 = vperm.xlu2 %5254, %v7062_v33  }
 0x5bb   : > { %3091 = vperm.xlu1 %5253, %v7057_v32   ;;  %3086 = vperm.xlu0 %5252, %v7052_v31  }
 0x5c2   : > { %3111 = vperm.xlu2 %5254, %v7077_v36  }
 0x5c3   : > { %3106 = vperm.xlu1 %5253, %v7072_v35   ;;  %3101 = vperm.xlu0 %5252, %v7067_v34  }
 0x5ca   : > { %3126 = vperm.xlu2 %5254, %v7092_v44  }
 0x5cb   : > { %3121 = vperm.xlu1 %5253, %v7087_v37   ;;  %3116 = vperm.xlu0 %5252, %v7082_v39  }
 0x5d2   : > { %3141 = vperm.xlu2 %5254, %v7107_v51  }
 0x5d3   : > { %3136 = vperm.xlu1 %5253, %v7102_v52   ;;  %3131 = vperm.xlu0 %5252, %v7097_v38  }
 0x5db   : > { %3151 = vperm.xlu1 %5253, %v7117_v58   ;;  %3146 = vperm.xlu0 %5252, %v7112_v45  }
 0x5e4   : > { %v3017_v62 = vpop.permute.xlu2 %3016 }
 0x5e5   : > { %vm3167_vm9 = vcmp.ge.f32.partialorder %v3017_v62, %v7153_v53  ;;  %vm3168_vm10 = vcmp.ge.f32.partialorder %v3017_v62, %v7156_v60 }
 0x5e6   : > { %v5004_v43 = vsel %vm3167_vm9, 1.0, %v5339_v10 }
 0x5ec   : > { %v3022_v59 = vpop.permute.xlu2 %3021 }
 0x5ed   : > { %vm3169_vm11 = vcmp.ge.f32.partialorder %v3022_v59, %v7153_v53  ;;  %vm3170_vm12 = vcmp.ge.f32.partialorder %v3022_v59, %v7156_v60 }
 0x5f4   : > { %v3037_v49 = vpop.permute.xlu2 %3036 }
 0x5fc   : > { %v7170_v13 = vpop.permute.xlu2 %3051 }
 0x5fd   : > { %v3007_v54 = vpop.permute.xlu1 %3006  ;;  %v2997_v6 = vpop.permute.xlu0 %2996  ;;  %vm3182_vm9 = vcmp.ge.f32.partialorder %v7170_v13, %v7156_v60 }
 0x5fe   : > { %vm3159_vm1 = vcmp.ge.f32.partialorder %v2997_v6, %v7153_v53  ;;  %vm3160_vm2 = vcmp.ge.f32.partialorder %v2997_v6, %v7156_v60  ;;  %vm3163_vm3 = vcmp.ge.f32.partialorder %v3007_v54, %v7153_v53  ;;  %vm3164_vm4 = vcmp.ge.f32.partialorder %v3007_v54, %v7156_v60 }
 0x5ff   : > { %v4996_v9 = vsel %vm3159_vm1, 1.0, %v5339_v10  ;;  %v4997_v42 = vsel %vm3160_vm2, 1.0, %v5339_v10  ;;  %v5000_v1 = vsel %vm3163_vm3, 1.0, %v5339_v10  ;;  %v5001_v14 = vsel %vm3164_vm4, 1.0, %v5339_v10 }
 0x600   : > { %v5005_v54 = vsel %vm3168_vm10, 1.0, %v5339_v10  ;;  %vm3175_vm2 = vcmp.ge.f32.partialorder %v3037_v49, %v7153_v53  ;;  %vm3176_vm3 = vcmp.ge.f32.partialorder %v3037_v49, %v7156_v60 }
 0x605   : > { %v3012_v50 = vpop.permute.xlu1 %3011  ;;  %v3002_v63 = vpop.permute.xlu0 %3001 }
 0x606   : > { %vm3161_vm5 = vcmp.ge.f32.partialorder %v3002_v63, %v7153_v53  ;;  %vm3162_vm6 = vcmp.ge.f32.partialorder %v3002_v63, %v7156_v60  ;;  %vm3165_vm7 = vcmp.ge.f32.partialorder %v3012_v50, %v7153_v53  ;;  %vm3166_vm8 = vcmp.ge.f32.partialorder %v3012_v50, %v7156_v60 }
 0x607   : > { %v4998_v47 = vsel %vm3161_vm5, 1.0, %v5339_v10  ;;  %v4999_v41 = vsel %vm3162_vm6, 1.0, %v5339_v10  ;;  %v5002_v55 = vsel %vm3165_vm7, 1.0, %v5339_v10  ;;  %v5003_v12 = vsel %vm3166_vm8, 1.0, %v5339_v10 }
 0x608   : > { %v3351_v57 = vadd.f32 %v4998_v47, %v4996_v9  ;;  %v3388_v46 = vadd.f32 %v4999_v41, %v4997_v42  ;;  %v5006_v50 = vsel %vm3169_vm11, 1.0, %v5339_v10  ;;  %v5007_v63 = vsel %vm3170_vm12, 1.0, %v5339_v10 }
 0x609   : > { %vm3181_vm8 = vcmp.ge.f32.partialorder %v7170_v13, %v7153_v53 }
 0x60a   : > { %v3352_v40 = vadd.f32 %v5000_v1, %v3351_v57  ;;  %v3389_v48 = vadd.f32 %v5001_v14, %v3388_v46  ;;  %v3067_v46 = vpop.permute.xlu2 %3066 }
 0x60c   : > { %v3353_v56 = vadd.f32 %v5002_v55, %v3352_v40  ;;  %v3390_v61 = vadd.f32 %v5003_v12, %v3389_v48 }
 0x60d   : > { %v3032_v8 = vpop.permute.xlu1 %3031  ;;  %v3027_v15 = vpop.permute.xlu0 %3026 }
 0x60e   : > { %v3354_v6 = vadd.f32 %v5004_v43, %v3353_v56  ;;  %v3391_v62 = vadd.f32 %v5005_v54, %v3390_v61  ;;  %vm3171_vm13 = vcmp.ge.f32.partialorder %v3027_v15, %v7153_v53  ;;  %vm3172_vm14 = vcmp.ge.f32.partialorder %v3027_v15, %v7156_v60 }
 0x60f   : > { %vm3173_vm15 = vcmp.ge.f32.partialorder %v3032_v8, %v7153_v53  ;;  %vm3174_vm1 = vcmp.ge.f32.partialorder %v3032_v8, %v7156_v60  ;;  %v5008_v42 = vsel %vm3171_vm13, 1.0, %v5339_v10  ;;  %v5009_v47 = vsel %vm3172_vm14, 1.0, %v5339_v10 }
 0x610   : > { %v3355_v59 = vadd.f32 %v5006_v50, %v3354_v6  ;;  %v3392_v9 = vadd.f32 %v5007_v63, %v3391_v62  ;;  %v5010_v1 = vsel %vm3173_vm15, 1.0, %v5339_v10  ;;  %v5011_v14 = vsel %vm3174_vm1, 1.0, %v5339_v10 }
 0x611   : > { %v5012_v56 = vsel %vm3175_vm2, 1.0, %v5339_v10  ;;  %v5013_v61 = vsel %vm3176_vm3, 1.0, %v5339_v10  ;;  %vm3187_vm14 = vcmp.ge.f32.partialorder %v3067_v46, %v7153_v53  ;;  %vm3188_vm15 = vcmp.ge.f32.partialorder %v3067_v46, %v7156_v60 }
 0x612   : > { %v3356_v41 = vadd.f32 %v5008_v42, %v3355_v59  ;;  %v3393_v57 = vadd.f32 %v5009_v47, %v3392_v9  ;;  %v3082_v47 = vpop.permute.xlu2 %3081 }
 0x614   : > { %v3357_v40 = vadd.f32 %v5010_v1, %v3356_v41  ;;  %v3394_v48 = vadd.f32 %v5011_v14, %v3393_v57  ;;  %v5018_v41 = vsel %vm3181_vm8, 1.0, %v5339_v10  ;;  %v5019_v57 = vsel %vm3182_vm9, 1.0, %v5339_v10 }
 0x615   : > { %v3047_v55 = vpop.permute.xlu1 %3046  ;;  %v3042_v12 = vpop.permute.xlu0 %3041 }
 0x616   : > { %v3358_v8 = vadd.f32 %v5012_v56, %v3357_v40  ;;  %v3395_v15 = vadd.f32 %v5013_v61, %v3394_v48  ;;  %vm3179_vm4 = vcmp.ge.f32.partialorder %v3047_v55, %v7153_v53  ;;  %vm3180_vm5 = vcmp.ge.f32.partialorder %v3047_v55, %v7156_v60 }
 0x617   : > { %vm3177_vm6 = vcmp.ge.f32.partialorder %v3042_v12, %v7153_v53  ;;  %vm3178_vm7 = vcmp.ge.f32.partialorder %v3042_v12, %v7156_v60  ;;  %v5016_v62 = vsel %vm3179_vm4, 1.0, %v5339_v10  ;;  %v5017_v50 = vsel %vm3180_vm5, 1.0, %v5339_v10 }
 0x618   : > { %v5014_v49 = vsel %vm3177_vm6, 1.0, %v5339_v10  ;;  %v5015_v43 = vsel %vm3178_vm7, 1.0, %v5339_v10  ;;  %vm3193_vm5 = vcmp.ge.f32.partialorder %v3082_v47, %v7153_v53  ;;  %vm3194_vm6 = vcmp.ge.f32.partialorder %v3082_v47, %v7156_v60 }
 0x619   : > { %v3359_v54 = vadd.f32 %v5014_v49, %v3358_v8  ;;  %v3396_v6 = vadd.f32 %v5015_v43, %v3395_v15  ;;  %v5024_v43 = vsel %vm3187_vm14, 1.0, %v5339_v10 }
 0x61b   : > { %v3360_v63 = vadd.f32 %v5016_v62, %v3359_v54  ;;  %v3397_v59 = vadd.f32 %v5017_v50, %v3396_v6  ;;  %v5025_v54 = vsel %vm3188_vm15, 1.0, %v5339_v10  ;;  %v3097_v6 = vpop.permute.xlu2 %3096 }
 0x61d   : > { %v3062_v9 = vpop.permute.xlu1 %3061  ;;  %v3057_v42 = vpop.permute.xlu0 %3056  ;;  %v3361_v1 = vadd.f32 %v5018_v41, %v3360_v63  ;;  %v3398_v14 = vadd.f32 %v5019_v57, %v3397_v59 }
 0x61e   : > { %vm3185_vm10 = vcmp.ge.f32.partialorder %v3062_v9, %v7153_v53  ;;  %vm3186_vm11 = vcmp.ge.f32.partialorder %v3062_v9, %v7156_v60  ;;  %vm3183_vm12 = vcmp.ge.f32.partialorder %v3057_v42, %v7153_v53  ;;  %vm3184_vm13 = vcmp.ge.f32.partialorder %v3057_v42, %v7156_v60 }
 0x61f   : > { %v5020_v13 = vsel %vm3183_vm12, 1.0, %v5339_v10  ;;  %v5021_v40 = vsel %vm3184_vm13, 1.0, %v5339_v10  ;;  %v5022_v12 = vsel %vm3185_vm10, 1.0, %v5339_v10  ;;  %v5023_v56 = vsel %vm3186_vm11, 1.0, %v5339_v10 }
 0x620   : > { %v3362_v48 = vadd.f32 %v5020_v13, %v3361_v1  ;;  %v3399_v55 = vadd.f32 %v5021_v40, %v3398_v14  ;;  %v5030_v40 = vsel %vm3193_vm5, 1.0, %v5339_v10  ;;  %vm3199_vm11 = vcmp.ge.f32.partialorder %v3097_v6, %v7153_v53 }
 0x621   : > { %vm3200_vm12 = vcmp.ge.f32.partialorder %v3097_v6, %v7156_v60 }
 0x622   : > { %v3363_v61 = vadd.f32 %v5022_v12, %v3362_v48  ;;  %v3400_v8 = vadd.f32 %v5023_v56, %v3399_v55  ;;  %v5031_v48 = vsel %vm3194_vm6, 1.0, %v5339_v10 }
 0x624   : > { %v3364_v62 = vadd.f32 %v5024_v43, %v3363_v61  ;;  %v3401_v50 = vadd.f32 %v5025_v54, %v3400_v8  ;;  %v3112_v61 = vpop.permute.xlu2 %3111 }
 0x625   : > { %v3077_v15 = vpop.permute.xlu1 %3076  ;;  %v3072_v49 = vpop.permute.xlu0 %3071 }
 0x626   : > { %vm3191_vm1 = vcmp.ge.f32.partialorder %v3077_v15, %v7153_v53  ;;  %vm3192_vm2 = vcmp.ge.f32.partialorder %v3077_v15, %v7156_v60  ;;  %vm3189_vm3 = vcmp.ge.f32.partialorder %v3072_v49, %v7153_v53  ;;  %vm3190_vm4 = vcmp.ge.f32.partialorder %v3072_v49, %v7156_v60 }
 0x627   : > { %v5026_v46 = vsel %vm3189_vm3, 1.0, %v5339_v10  ;;  %v5027_v63 = vsel %vm3190_vm4, 1.0, %v5339_v10  ;;  %v5028_v42 = vsel %vm3191_vm1, 1.0, %v5339_v10  ;;  %v5029_v41 = vsel %vm3192_vm2, 1.0, %v5339_v10 }
 0x628   : > { %v3365_v59 = vadd.f32 %v5026_v46, %v3364_v62  ;;  %v3402_v9 = vadd.f32 %v5027_v63, %v3401_v50  ;;  %v5036_v63 = vsel %vm3199_vm11, 1.0, %v5339_v10  ;;  %vm3205_vm2 = vcmp.ge.f32.partialorder %v3112_v61, %v7153_v53 }
 0x629   : > { %vm3206_vm3 = vcmp.ge.f32.partialorder %v3112_v61, %v7156_v60 }
 0x62a   : > { %v3366_v57 = vadd.f32 %v5028_v42, %v3365_v59  ;;  %v3403_v1 = vadd.f32 %v5029_v41, %v3402_v9  ;;  %v5037_v59 = vsel %vm3200_vm12, 1.0, %v5339_v10 }
 0x62c   : > { %v3367_v55 = vadd.f32 %v5030_v40, %v3366_v57  ;;  %v3404_v12 = vadd.f32 %v5031_v48, %v3403_v1 }
 0x62d   : > { %v3092_v14 = vpop.permute.xlu1 %3091  ;;  %v3087_v13 = vpop.permute.xlu0 %3086 }
 0x62e   : > { %vm3197_vm7 = vcmp.ge.f32.partialorder %v3092_v14, %v7153_v53  ;;  %vm3198_vm8 = vcmp.ge.f32.partialorder %v3092_v14, %v7156_v60  ;;  %vm3195_vm9 = vcmp.ge.f32.partialorder %v3087_v13, %v7153_v53  ;;  %vm3196_vm10 = vcmp.ge.f32.partialorder %v3087_v13, %v7156_v60 }
 0x62f   : > { %v5032_v47 = vsel %vm3195_vm9, 1.0, %v5339_v10  ;;  %v5033_v56 = vsel %vm3196_vm10, 1.0, %v5339_v10  ;;  %v5034_v49 = vsel %vm3197_vm7, 1.0, %v5339_v10  ;;  %v5035_v43 = vsel %vm3198_vm8, 1.0, %v5339_v10 }
 0x630   : > { %v3368_v8 = vadd.f32 %v5032_v47, %v3367_v55  ;;  %v3405_v15 = vadd.f32 %v5033_v56, %v3404_v12  ;;  %v5042_v55 = vsel %vm3205_vm2, 1.0, %v5339_v10  ;;  %v5043_v12 = vsel %vm3206_vm3, 1.0, %v5339_v10  ;;  %v3127_v47 = vpop.permute.xlu2 %3126 }
 0x631   : > { %vm3211_vm8 = vcmp.ge.f32.partialorder %v3127_v47, %v7153_v53  ;;  %vm3212_vm9 = vcmp.ge.f32.partialorder %v3127_v47, %v7156_v60 }
 0x632   : > { %v3369_v54 = vadd.f32 %v5034_v49, %v3368_v8  ;;  %v3406_v62 = vadd.f32 %v5035_v43, %v3405_v15 }
 0x634   : > { %v3370_v9 = vadd.f32 %v5036_v63, %v3369_v54  ;;  %v3407_v42 = vadd.f32 %v5037_v59, %v3406_v62 }
 0x635   : > { %v3107_v50 = vpop.permute.xlu1 %3106  ;;  %v3102_v46 = vpop.permute.xlu0 %3101 }
 0x636   : > { %vm3203_vm13 = vcmp.ge.f32.partialorder %v3107_v50, %v7153_v53  ;;  %vm3204_vm14 = vcmp.ge.f32.partialorder %v3107_v50, %v7156_v60  ;;  %vm3201_vm15 = vcmp.ge.f32.partialorder %v3102_v46, %v7153_v53  ;;  %vm3202_vm1 = vcmp.ge.f32.partialorder %v3102_v46, %v7156_v60 }
 0x637   : > { %v5038_v6 = vsel %vm3201_vm15, 1.0, %v5339_v10  ;;  %v5039_v41 = vsel %vm3202_vm1, 1.0, %v5339_v10  ;;  %v5040_v14 = vsel %vm3203_vm13, 1.0, %v5339_v10  ;;  %v5041_v13 = vsel %vm3204_vm14, 1.0, %v5339_v10 }
 0x638   : > { %v3371_v57 = vadd.f32 %v5038_v6, %v3370_v9  ;;  %v3408_v1 = vadd.f32 %v5039_v41, %v3407_v42  ;;  %v5048_v9 = vsel %vm3211_vm8, 1.0, %v5339_v10  ;;  %v5049_v42 = vsel %vm3212_vm9, 1.0, %v5339_v10 }
 0x63a   : > { %v3372_v40 = vadd.f32 %v5040_v14, %v3371_v57  ;;  %v3409_v48 = vadd.f32 %v5041_v13, %v3408_v1  ;;  %v3142_v14 = vpop.permute.xlu2 %3141 }
 0x63b   : > { %vm3217_vm14 = vcmp.ge.f32.partialorder %v3142_v14, %v7153_v53  ;;  %vm3218_vm15 = vcmp.ge.f32.partialorder %v3142_v14, %v7156_v60 }
 0x63c   : > { %v3373_v8 = vadd.f32 %v5042_v55, %v3372_v40  ;;  %v3410_v15 = vadd.f32 %v5043_v12, %v3409_v48 }
 0x63d   : > { %v3122_v56 = vpop.permute.xlu1 %3121  ;;  %v3117_v49 = vpop.permute.xlu0 %3116 }
 0x63e   : > { %vm3209_vm4 = vcmp.ge.f32.partialorder %v3122_v56, %v7153_v53  ;;  %vm3210_vm5 = vcmp.ge.f32.partialorder %v3122_v56, %v7156_v60  ;;  %vm3207_vm6 = vcmp.ge.f32.partialorder %v3117_v49, %v7153_v53  ;;  %vm3208_vm7 = vcmp.ge.f32.partialorder %v3117_v49, %v7156_v60 }
 0x63f   : > { %v5044_v61 = vsel %vm3207_vm6, 1.0, %v5339_v10  ;;  %v5045_v43 = vsel %vm3208_vm7, 1.0, %v5339_v10  ;;  %v5046_v50 = vsel %vm3209_vm4, 1.0, %v5339_v10  ;;  %v5047_v46 = vsel %vm3210_vm5, 1.0, %v5339_v10 }
 0x640   : > { %v3374_v54 = vadd.f32 %v5044_v61, %v3373_v8  ;;  %v3411_v62 = vadd.f32 %v5045_v43, %v3410_v15  ;;  %v5054_v15 = vsel %vm3217_vm14, 1.0, %v5339_v10  ;;  %v5055_v49 = vsel %vm3218_vm15, 1.0, %v5339_v10 }
 0x641   : > { %vm3428_vm5 = vcmask 1040384  }
 0x642   : > { %v3375_v63 = vadd.f32 %v5046_v50, %v3374_v54  ;;  %v3412_v59 = vadd.f32 %v5047_v46, %v3411_v62 }
 0x644   : > { %v3376_v41 = vadd.f32 %v5048_v9, %v3375_v63  ;;  %v3413_v57 = vadd.f32 %v5049_v42, %v3412_v59 }
 0x645   : > { %v3137_v6 = vpop.permute.xlu1 %3136  ;;  %v3132_v1 = vpop.permute.xlu0 %3131 }
 0x646   : > { %vm3215_vm10 = vcmp.ge.f32.partialorder %v3137_v6, %v7153_v53  ;;  %vm3216_vm11 = vcmp.ge.f32.partialorder %v3137_v6, %v7156_v60  ;;  %vm3213_vm12 = vcmp.ge.f32.partialorder %v3132_v1, %v7153_v53  ;;  %vm3214_vm13 = vcmp.ge.f32.partialorder %v3132_v1, %v7156_v60 }
 0x647   : > { %v5050_v13 = vsel %vm3213_vm12, 1.0, %v5339_v10  ;;  %v5051_v40 = vsel %vm3214_vm13, 1.0, %v5339_v10  ;;  %v5052_v12 = vsel %vm3215_vm10, 1.0, %v5339_v10  ;;  %v5053_v47 = vsel %vm3216_vm11, 1.0, %v5339_v10 }
 0x648   : > { %v3377_v48 = vadd.f32 %v5050_v13, %v3376_v41  ;;  %v3414_v55 = vadd.f32 %v5051_v40, %v3413_v57 }
 0x64a   : > { %v3378_v56 = vadd.f32 %v5052_v12, %v3377_v48  ;;  %v3415_v8 = vadd.f32 %v5053_v47, %v3414_v55 }
 0x64c   : > { %v3379_v43 = vadd.f32 %v5054_v15, %v3378_v56  ;;  %v3416_v54 = vadd.f32 %v5055_v49, %v3415_v8  ;;  %v2993_v56 = vld [vmem:[#allocation2] sm:$0x3] }
 0x64d   : > { %v3152_v61 = vpop.permute.xlu1 %3151  ;;  %v3147_v62 = vpop.permute.xlu0 %3146 }
 0x64e   : > { %vm3221_vm1 = vcmp.ge.f32.partialorder %v3152_v61, %v7153_v53  ;;  %vm3222_vm2 = vcmp.ge.f32.partialorder %v3152_v61, %v7156_v60  ;;  %vm3219_vm3 = vcmp.ge.f32.partialorder %v3147_v62, %v7153_v53  ;;  %vm3220_vm4 = vcmp.ge.f32.partialorder %v3147_v62, %v7156_v60 }
 0x64f   : > { %v5056_v50 = vsel %vm3219_vm3, 1.0, %v5339_v10  ;;  %v5057_v46 = vsel %vm3220_vm4, 1.0, %v5339_v10  ;;  %v5058_v9 = vsel %vm3221_vm1, 1.0, %v5339_v10  ;;  %v5059_v42 = vsel %vm3222_vm2, 1.0, %v5339_v10 }
 0x650   : > { %v3380_v63 = vadd.f32 %v5056_v50, %v3379_v43  ;;  %v3417_v59 = vadd.f32 %v5057_v46, %v3416_v54 }
 0x652   : > { %v3381_v6 = vadd.f32 %v5058_v9, %v3380_v63  ;;  %v3418_v41 = vadd.f32 %v5059_v42, %v3417_v59 }
 0x654   : > { %v3382_v57 = vrot.slane %v3381_v6, 4  ;;  %v3419_v1 = vrot.slane %v3418_v41, 4 }
 0x656   : > { %v3383_v14 = vadd.f32 %v3382_v57, %v3381_v6  ;;  %v3420_v13 = vadd.f32 %v3419_v1, %v3418_v41 }
 0x658   : > { %v3384_v40 = vrot.slane %v3383_v14, 2  ;;  %v3421_v53 = vrot.slane %v3420_v13, 2 }
 0x65a   : > { %v3385_v48 = vadd.f32 %v3384_v40, %v3383_v14  ;;  %v3422_v60 = vadd.f32 %v3421_v53, %v3420_v13 }
 0x65c   : > { %v3386_v55 = vrot.slane %v3385_v48, 1  ;;  %v3423_v12 = vrot.slane %v3422_v60, 1 }
 0x65e   : > { %v3424_v47 = vadd.f32 %v3423_v12, %v3422_v60  ;;  %v3387_v8 = vadd.f32 %v3386_v55, %v3385_v48 }
 0x660   : > { %v3427_v15 = vrot.slane %v3424_v47, 7 }
 0x662   : > { %v3429_v49 = vsel %vm3428_vm5, %v3387_v8, %v3427_v15 }
 0x663   : > { %v3431_v61 = vadd.f32 %v3429_v49, %v2993_v56 }
 0x665   : > { %3432 = vst.msk [vmem:[#allocation2] sm:$0x3] %vm5452_vm0, %v3431_v61 }
 0x666 PF: > { %p5060_p7 = scmp.gt.s32.totalorder %s5384_s16, 3 }
 0x668   : > { %3436 = sbr.rel (%p5060_p7) target bundleno = 1867 (0x74b), region = 64 }
 0x66d   : > { %v5340_v10 = vmov 0  }
 0x66e   : > { %5257 = vset.pattern.permute.xlu2 %v5340_v10  ;;  %5256 = vset.pattern.permute.xlu1 %v5340_v10 }
 0x66f   : > { %5255 = vset.pattern.permute.xlu0 %v5340_v10  ;;  %3460 = vperm.xlu2 %5257, %v6982_v5  }
 0x670   : > { %3450 = vperm.xlu1 %5256, %v6972_v3   ;;  %3440 = vperm.xlu0 %5255, %v6962_v18  }
 0x677   : > { %3465 = vperm.xlu2 %5257, %v6987_v16   ;;  %v7326_v16 = vperm.slane %v5523_v21, 0 }
 0x678   : > { %3455 = vperm.xlu1 %5256, %v6977_v4   ;;  %3445 = vperm.xlu0 %5255, %v6967_v2  }
 0x67f   : > { %3480 = vperm.xlu2 %5257, %v7002_v20  }
 0x680   : > { %3475 = vperm.xlu1 %5256, %v6997_v19   ;;  %3470 = vperm.xlu0 %5255, %v6992_v17   ;;  %v7329_v17 = vperm.slane %v5523_v21, 1 }
 0x687   : > { %3495 = vperm.xlu2 %5257, %v7017_v24  }
 0x688   : > { %3490 = vperm.xlu1 %5256, %v7012_v23   ;;  %3485 = vperm.xlu0 %5255, %v7007_v22   ;;  %v5341_v22 = vmov 0.0  }
 0x68f   : > { %3510 = vperm.xlu2 %5257, %v7032_v27  }
 0x690   : > { %3505 = vperm.xlu1 %5256, %v7027_v26   ;;  %3500 = vperm.xlu0 %5255, %v7022_v25  }
 0x697   : > { %3525 = vperm.xlu2 %5257, %v7047_v30  }
 0x698   : > { %3520 = vperm.xlu1 %5256, %v7042_v29   ;;  %3515 = vperm.xlu0 %5255, %v7037_v28  }
 0x69f   : > { %3540 = vperm.xlu2 %5257, %v7062_v33  }
 0x6a0   : > { %3535 = vperm.xlu1 %5256, %v7057_v32   ;;  %3530 = vperm.xlu0 %5255, %v7052_v31  }
 0x6a7   : > { %3555 = vperm.xlu2 %5257, %v7077_v36  }
 0x6a8   : > { %3550 = vperm.xlu1 %5256, %v7072_v35   ;;  %3545 = vperm.xlu0 %5255, %v7067_v34  }
 0x6af   : > { %3570 = vperm.xlu2 %5257, %v7092_v44  }
 0x6b0   : > { %3565 = vperm.xlu1 %5256, %v7087_v37   ;;  %3560 = vperm.xlu0 %5255, %v7082_v39  }
 0x6b7   : > { %3585 = vperm.xlu2 %5257, %v7107_v51  }
 0x6b8   : > { %3580 = vperm.xlu1 %5256, %v7102_v52   ;;  %3575 = vperm.xlu0 %5255, %v7097_v38  }
 0x6c0   : > { %3595 = vperm.xlu1 %5256, %v7117_v58   ;;  %3590 = vperm.xlu0 %5255, %v7112_v45  }
 0x6c9   : > { %v3461_v18 = vpop.permute.xlu2 %3460 }
 0x6ca   : > { %vm3611_vm14 = vcmp.gt.f32.partialorder %v3461_v18, %v7326_v16  ;;  %vm3612_vm15 = vcmp.gt.f32.partialorder %v3461_v18, %v7329_v17 }
 0x6cb   : > { %v5069_v38 = vsel %vm3611_vm14, 1.0, %v5341_v22  ;;  %v5070_v52 = vsel %vm3612_vm15, 1.0, %v5341_v22 }
 0x6d1   : > { %v3466_v2 = vpop.permute.xlu2 %3465 }
 0x6d2   : > { %vm3613_vm1 = vcmp.gt.f32.partialorder %v3466_v2, %v7326_v16  ;;  %vm3614_vm2 = vcmp.gt.f32.partialorder %v3466_v2, %v7329_v17 }
 0x6d3   : > { %v5071_v58 = vsel %vm3613_vm1, 1.0, %v5341_v22  ;;  %v5072_v43 = vsel %vm3614_vm2, 1.0, %v5341_v22 }
 0x6d9   : > { %v3481_v5 = vpop.permute.xlu2 %3480 }
 0x6e1   : > { %v7343_v29 = vpop.permute.xlu2 %3495 }
 0x6e2   : > { %v3451_v3 = vpop.permute.xlu1 %3450  ;;  %v3441_v4 = vpop.permute.xlu0 %3440  ;;  %vm3626_vm14 = vcmp.gt.f32.partialorder %v7343_v29, %v7329_v17 }
 0x6e3   : > { %vm3603_vm6 = vcmp.gt.f32.partialorder %v3441_v4, %v7326_v16  ;;  %vm3604_vm7 = vcmp.gt.f32.partialorder %v3441_v4, %v7329_v17  ;;  %vm3607_vm8 = vcmp.gt.f32.partialorder %v3451_v3, %v7326_v16  ;;  %vm3608_vm9 = vcmp.gt.f32.partialorder %v3451_v3, %v7329_v17 }
 0x6e4   : > { %v5061_v23 = vsel %vm3603_vm6, 1.0, %v5341_v22  ;;  %v5062_v24 = vsel %vm3604_vm7, 1.0, %v5341_v22  ;;  %v5065_v30 = vsel %vm3607_vm8, 1.0, %v5341_v22  ;;  %v5066_v31 = vsel %vm3608_vm9, 1.0, %v5341_v22 }
 0x6e5   : > { %vm3619_vm7 = vcmp.gt.f32.partialorder %v3481_v5, %v7326_v16  ;;  %vm3620_vm8 = vcmp.gt.f32.partialorder %v3481_v5, %v7329_v17  ;;  %v5084_v3 = vsel %vm3626_vm14, 1.0, %v5341_v22 }
 0x6e6   : > { %v5077_v13 = vsel %vm3619_vm7, 1.0, %v5341_v22  ;;  %v5078_v40 = vsel %vm3620_vm8, 1.0, %v5341_v22 }
 0x6e9   : > { %v3511_v9 = vpop.permute.xlu2 %3510 }
 0x6ea   : > { %v3456_v19 = vpop.permute.xlu1 %3455  ;;  %v3446_v20 = vpop.permute.xlu0 %3445 }
 0x6eb   : > { %vm3605_vm10 = vcmp.gt.f32.partialorder %v3446_v20, %v7326_v16  ;;  %vm3606_vm11 = vcmp.gt.f32.partialorder %v3446_v20, %v7329_v17  ;;  %vm3609_vm12 = vcmp.gt.f32.partialorder %v3456_v19, %v7326_v16  ;;  %vm3610_vm13 = vcmp.gt.f32.partialorder %v3456_v19, %v7329_v17 }
 0x6ec   : > { %v5063_v25 = vsel %vm3605_vm10, 1.0, %v5341_v22  ;;  %v5064_v26 = vsel %vm3606_vm11, 1.0, %v5341_v22  ;;  %v5067_v34 = vsel %vm3609_vm12, 1.0, %v5341_v22  ;;  %v5068_v35 = vsel %vm3610_vm13, 1.0, %v5341_v22 }
 0x6ed   : > { %v3795_v27 = vadd.f32 %v5063_v25, %v5061_v23  ;;  %v3832_v28 = vadd.f32 %v5064_v26, %v5062_v24  ;;  %vm3625_vm13 = vcmp.gt.f32.partialorder %v7343_v29, %v7326_v16 }
 0x6ee   : > { %v5083_v2 = vsel %vm3625_vm13, 1.0, %v5341_v22 }
 0x6ef   : > { %v3796_v32 = vadd.f32 %v5065_v30, %v3795_v27  ;;  %v3833_v33 = vadd.f32 %v5066_v31, %v3832_v28 }
 0x6f1   : > { %v3797_v36 = vadd.f32 %v5067_v34, %v3796_v32  ;;  %v3834_v39 = vadd.f32 %v5068_v35, %v3833_v33  ;;  %v3526_v18 = vpop.permute.xlu2 %3525 }
 0x6f2   : > { %v3476_v37 = vpop.permute.xlu1 %3475  ;;  %v3471_v44 = vpop.permute.xlu0 %3470 }
 0x6f3   : > { %v3798_v51 = vadd.f32 %v5069_v38, %v3797_v36  ;;  %v3835_v45 = vadd.f32 %v5070_v52, %v3834_v39  ;;  %vm3615_vm3 = vcmp.gt.f32.partialorder %v3471_v44, %v7326_v16  ;;  %vm3616_vm4 = vcmp.gt.f32.partialorder %v3471_v44, %v7329_v17 }
 0x6f4   : > { %vm3617_vm5 = vcmp.gt.f32.partialorder %v3476_v37, %v7326_v16  ;;  %vm3618_vm6 = vcmp.gt.f32.partialorder %v3476_v37, %v7329_v17  ;;  %v5073_v50 = vsel %vm3615_vm3, 1.0, %v5341_v22  ;;  %v5074_v46 = vsel %vm3616_vm4, 1.0, %v5341_v22 }
 0x6f5   : > { %v3799_v54 = vadd.f32 %v5071_v58, %v3798_v51  ;;  %v3836_v62 = vadd.f32 %v5072_v43, %v3835_v45  ;;  %v5075_v42 = vsel %vm3617_vm5, 1.0, %v5341_v22  ;;  %v5076_v6 = vsel %vm3618_vm6, 1.0, %v5341_v22 }
 0x6f6   : > { %vm3631_vm4 = vcmp.gt.f32.partialorder %v3511_v9, %v7326_v16  ;;  %vm3632_vm5 = vcmp.gt.f32.partialorder %v3511_v9, %v7329_v17 }
 0x6f7   : > { %v3800_v63 = vadd.f32 %v5073_v50, %v3799_v54  ;;  %v3837_v59 = vadd.f32 %v5074_v46, %v3836_v62  ;;  %v5089_v31 = vsel %vm3631_vm4, 1.0, %v5341_v22  ;;  %v5090_v32 = vsel %vm3632_vm5, 1.0, %v5341_v22 }
 0x6f9   : > { %v3801_v41 = vadd.f32 %v5075_v42, %v3800_v63  ;;  %v3838_v57 = vadd.f32 %v5076_v6, %v3837_v59  ;;  %v3541_v33 = vpop.permute.xlu2 %3540 }
 0x6fa   : > { %v3491_v1 = vpop.permute.xlu1 %3490  ;;  %v3486_v14 = vpop.permute.xlu0 %3485 }
 0x6fb   : > { %v3802_v53 = vadd.f32 %v5077_v13, %v3801_v41  ;;  %v3839_v48 = vadd.f32 %v5078_v40, %v3838_v57  ;;  %vm3623_vm9 = vcmp.gt.f32.partialorder %v3491_v1, %v7326_v16  ;;  %vm3624_vm10 = vcmp.gt.f32.partialorder %v3491_v1, %v7329_v17 }
 0x6fc   : > { %vm3621_vm11 = vcmp.gt.f32.partialorder %v3486_v14, %v7326_v16  ;;  %vm3622_vm12 = vcmp.gt.f32.partialorder %v3486_v14, %v7329_v17  ;;  %v5081_v56 = vsel %vm3623_vm9, 1.0, %v5341_v22  ;;  %v5082_v8 = vsel %vm3624_vm10, 1.0, %v5341_v22 }
 0x6fd   : > { %v5079_v60 = vsel %vm3621_vm11, 1.0, %v5341_v22  ;;  %v5080_v55 = vsel %vm3622_vm12, 1.0, %v5341_v22  ;;  %vm3637_vm10 = vcmp.gt.f32.partialorder %v3526_v18, %v7326_v16  ;;  %vm3638_vm11 = vcmp.gt.f32.partialorder %v3526_v18, %v7329_v17 }
 0x6fe   : > { %v3803_v12 = vadd.f32 %v5079_v60, %v3802_v53  ;;  %v3840_v47 = vadd.f32 %v5080_v55, %v3839_v48  ;;  %v5095_v54 = vsel %vm3637_vm10, 1.0, %v5341_v22  ;;  %v5096_v62 = vsel %vm3638_vm11, 1.0, %v5341_v22 }
 0x700   : > { %v3804_v15 = vadd.f32 %v5081_v56, %v3803_v12  ;;  %v3841_v49 = vadd.f32 %v5082_v8, %v3840_v47 }
 0x701   : > { %v3556_v9 = vpop.permute.xlu2 %3555 }
 0x702   : > { %v3506_v61 = vpop.permute.xlu1 %3505  ;;  %v3501_v10 = vpop.permute.xlu0 %3500  ;;  %v3805_v4 = vadd.f32 %v5083_v2, %v3804_v15  ;;  %v3842_v5 = vadd.f32 %v5084_v3, %v3841_v49 }
 0x703   : > { %vm3629_vm15 = vcmp.gt.f32.partialorder %v3506_v61, %v7326_v16  ;;  %vm3630_vm1 = vcmp.gt.f32.partialorder %v3506_v61, %v7329_v17  ;;  %vm3627_vm2 = vcmp.gt.f32.partialorder %v3501_v10, %v7326_v16  ;;  %vm3628_vm3 = vcmp.gt.f32.partialorder %v3501_v10, %v7329_v17 }
 0x704   : > { %v5085_v19 = vsel %vm3627_vm2, 1.0, %v5341_v22  ;;  %v5086_v20 = vsel %vm3628_vm3, 1.0, %v5341_v22  ;;  %v5087_v25 = vsel %vm3629_vm15, 1.0, %v5341_v22  ;;  %v5088_v26 = vsel %vm3630_vm1, 1.0, %v5341_v22 }
 0x705   : > { %v3806_v23 = vadd.f32 %v5085_v19, %v3805_v4  ;;  %v3843_v24 = vadd.f32 %v5086_v20, %v3842_v5  ;;  %vm3643_vm1 = vcmp.gt.f32.partialorder %v3541_v33, %v7326_v16  ;;  %vm3644_vm2 = vcmp.gt.f32.partialorder %v3541_v33, %v7329_v17 }
 0x706   : > { %v5101_v53 = vsel %vm3643_vm1, 1.0, %v5341_v22  ;;  %v5102_v48 = vsel %vm3644_vm2, 1.0, %v5341_v22 }
 0x707   : > { %v3807_v27 = vadd.f32 %v5087_v25, %v3806_v23  ;;  %v3844_v28 = vadd.f32 %v5088_v26, %v3843_v24 }
 0x709   : > { %v3808_v34 = vadd.f32 %v5089_v31, %v3807_v27  ;;  %v3845_v35 = vadd.f32 %v5090_v32, %v3844_v28  ;;  %v3571_v3 = vpop.permute.xlu2 %3570 }
 0x70a   : > { %v3521_v29 = vpop.permute.xlu1 %3520  ;;  %v3516_v30 = vpop.permute.xlu0 %3515 }
 0x70b   : > { %vm3635_vm6 = vcmp.gt.f32.partialorder %v3521_v29, %v7326_v16  ;;  %vm3636_vm7 = vcmp.gt.f32.partialorder %v3521_v29, %v7329_v17  ;;  %vm3633_vm8 = vcmp.gt.f32.partialorder %v3516_v30, %v7326_v16  ;;  %vm3634_vm9 = vcmp.gt.f32.partialorder %v3516_v30, %v7329_v17 }
 0x70c   : > { %v5091_v36 = vsel %vm3633_vm8, 1.0, %v5341_v22  ;;  %v5092_v39 = vsel %vm3634_vm9, 1.0, %v5341_v22  ;;  %v5093_v38 = vsel %vm3635_vm6, 1.0, %v5341_v22  ;;  %v5094_v52 = vsel %vm3636_vm7, 1.0, %v5341_v22 }
 0x70d   : > { %v3809_v37 = vadd.f32 %v5091_v36, %v3808_v34  ;;  %v3846_v44 = vadd.f32 %v5092_v39, %v3845_v35  ;;  %vm3649_vm7 = vcmp.gt.f32.partialorder %v3556_v9, %v7326_v16  ;;  %vm3650_vm8 = vcmp.gt.f32.partialorder %v3556_v9, %v7329_v17 }
 0x70e   : > { %v5107_v18 = vsel %vm3649_vm7, 1.0, %v5341_v22  ;;  %v5108_v2 = vsel %vm3650_vm8, 1.0, %v5341_v22 }
 0x70f   : > { %v3810_v51 = vadd.f32 %v5093_v38, %v3809_v37  ;;  %v3847_v45 = vadd.f32 %v5094_v52, %v3846_v44 }
 0x711   : > { %v3811_v50 = vadd.f32 %v5095_v54, %v3810_v51  ;;  %v3848_v46 = vadd.f32 %v5096_v62, %v3847_v45  ;;  %v3586_v39 = vpop.permute.xlu2 %3585 }
 0x712   : > { %v3536_v58 = vpop.permute.xlu1 %3535  ;;  %v3531_v43 = vpop.permute.xlu0 %3530 }
 0x713   : > { %vm3641_vm12 = vcmp.gt.f32.partialorder %v3536_v58, %v7326_v16  ;;  %vm3642_vm13 = vcmp.gt.f32.partialorder %v3536_v58, %v7329_v17  ;;  %vm3639_vm14 = vcmp.gt.f32.partialorder %v3531_v43, %v7326_v16  ;;  %vm3640_vm15 = vcmp.gt.f32.partialorder %v3531_v43, %v7329_v17 }
 0x714   : > { %v5097_v63 = vsel %vm3639_vm14, 1.0, %v5341_v22  ;;  %v5098_v59 = vsel %vm3640_vm15, 1.0, %v5341_v22  ;;  %v5099_v41 = vsel %vm3641_vm12, 1.0, %v5341_v22  ;;  %v5100_v57 = vsel %vm3642_vm13, 1.0, %v5341_v22 }
 0x715   : > { %v3812_v42 = vadd.f32 %v5097_v63, %v3811_v50  ;;  %v3849_v6 = vadd.f32 %v5098_v59, %v3848_v46  ;;  %vm3655_vm13 = vcmp.gt.f32.partialorder %v3571_v3, %v7326_v16  ;;  %vm3656_vm14 = vcmp.gt.f32.partialorder %v3571_v3, %v7329_v17 }
 0x716   : > { %v5113_v31 = vsel %vm3655_vm13, 1.0, %v5341_v22  ;;  %v5114_v32 = vsel %vm3656_vm14, 1.0, %v5341_v22 }
 0x717   : > { %v3813_v1 = vadd.f32 %v5099_v41, %v3812_v42  ;;  %v3850_v14 = vadd.f32 %v5100_v57, %v3849_v6 }
 0x719   : > { %v3814_v60 = vadd.f32 %v5101_v53, %v3813_v1  ;;  %v3851_v55 = vadd.f32 %v5102_v48, %v3850_v14 }
 0x71a   : > { %v3551_v13 = vpop.permute.xlu1 %3550  ;;  %v3546_v40 = vpop.permute.xlu0 %3545 }
 0x71b   : > { %vm3647_vm3 = vcmp.gt.f32.partialorder %v3551_v13, %v7326_v16  ;;  %vm3648_vm4 = vcmp.gt.f32.partialorder %v3551_v13, %v7329_v17  ;;  %vm3645_vm5 = vcmp.gt.f32.partialorder %v3546_v40, %v7326_v16  ;;  %vm3646_vm6 = vcmp.gt.f32.partialorder %v3546_v40, %v7329_v17 }
 0x71c   : > { %v5103_v12 = vsel %vm3645_vm5, 1.0, %v5341_v22  ;;  %v5104_v47 = vsel %vm3646_vm6, 1.0, %v5341_v22  ;;  %v5105_v15 = vsel %vm3647_vm3, 1.0, %v5341_v22  ;;  %v5106_v49 = vsel %vm3648_vm4, 1.0, %v5341_v22 }
 0x71d   : > { %v3815_v56 = vadd.f32 %v5103_v12, %v3814_v60  ;;  %v3852_v8 = vadd.f32 %v5104_v47, %v3851_v55  ;;  %vm3661_vm4 = vcmp.gt.f32.partialorder %v3586_v39, %v7326_v16  ;;  %vm3662_vm5 = vcmp.gt.f32.partialorder %v3586_v39, %v7329_v17 }
 0x71e   : > { %v5119_v54 = vsel %vm3661_vm4, 1.0, %v5341_v22  ;;  %v5120_v62 = vsel %vm3662_vm5, 1.0, %v5341_v22 }
 0x71f   : > { %v3816_v61 = vadd.f32 %v5105_v15, %v3815_v56  ;;  %v3853_v10 = vadd.f32 %v5106_v49, %v3852_v8  ;;  %v3437_v15 = vld [vmem:[#allocation2] sm:$0x3] }
 0x721   : > { %v3817_v5 = vadd.f32 %v5107_v18, %v3816_v61  ;;  %v3854_v19 = vadd.f32 %v5108_v2, %v3853_v10 }
 0x722   : > { %v3566_v4 = vpop.permute.xlu1 %3565  ;;  %v3561_v20 = vpop.permute.xlu0 %3560 }
 0x723   : > { %vm3653_vm9 = vcmp.gt.f32.partialorder %v3566_v4, %v7326_v16  ;;  %vm3654_vm10 = vcmp.gt.f32.partialorder %v3566_v4, %v7329_v17  ;;  %vm3651_vm11 = vcmp.gt.f32.partialorder %v3561_v20, %v7326_v16  ;;  %vm3652_vm12 = vcmp.gt.f32.partialorder %v3561_v20, %v7329_v17 }
 0x724   : > { %v5109_v23 = vsel %vm3651_vm11, 1.0, %v5341_v22  ;;  %v5110_v24 = vsel %vm3652_vm12, 1.0, %v5341_v22  ;;  %v5111_v27 = vsel %vm3653_vm9, 1.0, %v5341_v22  ;;  %v5112_v28 = vsel %vm3654_vm10, 1.0, %v5341_v22 }
 0x725   : > { %v3818_v25 = vadd.f32 %v5109_v23, %v3817_v5  ;;  %v3855_v26 = vadd.f32 %v5110_v24, %v3854_v19  ;;  %vm3872_vm10 = vcmask 1040384  }
 0x727   : > { %v3819_v29 = vadd.f32 %v5111_v27, %v3818_v25  ;;  %v3856_v30 = vadd.f32 %v5112_v28, %v3855_v26 }
 0x729   : > { %v3820_v34 = vadd.f32 %v5113_v31, %v3819_v29  ;;  %v3857_v35 = vadd.f32 %v5114_v32, %v3856_v30 }
 0x72a   : > { %v3581_v33 = vpop.permute.xlu1 %3580  ;;  %v3576_v36 = vpop.permute.xlu0 %3575 }
 0x72b   : > { %vm3659_vm15 = vcmp.gt.f32.partialorder %v3581_v33, %v7326_v16  ;;  %vm3660_vm1 = vcmp.gt.f32.partialorder %v3581_v33, %v7329_v17  ;;  %vm3657_vm2 = vcmp.gt.f32.partialorder %v3576_v36, %v7326_v16  ;;  %vm3658_vm3 = vcmp.gt.f32.partialorder %v3576_v36, %v7329_v17 }
 0x72c   : > { %v5115_v37 = vsel %vm3657_vm2, 1.0, %v5341_v22  ;;  %v5116_v44 = vsel %vm3658_vm3, 1.0, %v5341_v22  ;;  %v5117_v51 = vsel %vm3659_vm15, 1.0, %v5341_v22  ;;  %v5118_v45 = vsel %vm3660_vm1, 1.0, %v5341_v22 }
 0x72d   : > { %v3821_v38 = vadd.f32 %v5115_v37, %v3820_v34  ;;  %v3858_v52 = vadd.f32 %v5116_v44, %v3857_v35 }
 0x72f   : > { %v3822_v58 = vadd.f32 %v5117_v51, %v3821_v38  ;;  %v3859_v43 = vadd.f32 %v5118_v45, %v3858_v52 }
 0x731   : > { %v3823_v46 = vadd.f32 %v5119_v54, %v3822_v58  ;;  %v3860_v63 = vadd.f32 %v5120_v62, %v3859_v43 }
 0x732   : > { %v3596_v50 = vpop.permute.xlu1 %3595  ;;  %v3591_v59 = vpop.permute.xlu0 %3590 }
 0x733   : > { %vm3665_vm6 = vcmp.gt.f32.partialorder %v3596_v50, %v7326_v16  ;;  %vm3666_vm7 = vcmp.gt.f32.partialorder %v3596_v50, %v7329_v17  ;;  %vm3663_vm8 = vcmp.gt.f32.partialorder %v3591_v59, %v7326_v16  ;;  %vm3664_vm9 = vcmp.gt.f32.partialorder %v3591_v59, %v7329_v17 }
 0x734   : > { %v5121_v9 = vsel %vm3663_vm8, 1.0, %v5341_v22  ;;  %v5122_v42 = vsel %vm3664_vm9, 1.0, %v5341_v22  ;;  %v5123_v57 = vsel %vm3665_vm6, 1.0, %v5341_v22  ;;  %v5124_v1 = vsel %vm3666_vm7, 1.0, %v5341_v22 }
 0x735   : > { %v3824_v6 = vadd.f32 %v5121_v9, %v3823_v46  ;;  %v3861_v41 = vadd.f32 %v5122_v42, %v3860_v63 }
 0x737   : > { %v3825_v14 = vadd.f32 %v5123_v57, %v3824_v6  ;;  %v3862_v13 = vadd.f32 %v5124_v1, %v3861_v41 }
 0x739   : > { %v3826_v40 = vrot.slane %v3825_v14, 4  ;;  %v3863_v53 = vrot.slane %v3862_v13, 4 }
 0x73b   : > { %v3827_v48 = vadd.f32 %v3826_v40, %v3825_v14  ;;  %v3864_v60 = vadd.f32 %v3863_v53, %v3862_v13 }
 0x73d   : > { %v3828_v55 = vrot.slane %v3827_v48, 2  ;;  %v3865_v16 = vrot.slane %v3864_v60, 2 }
 0x73f   : > { %v3829_v12 = vadd.f32 %v3828_v55, %v3827_v48  ;;  %v3866_v17 = vadd.f32 %v3865_v16, %v3864_v60 }
 0x741   : > { %v3830_v47 = vrot.slane %v3829_v12, 1  ;;  %v3867_v56 = vrot.slane %v3866_v17, 1 }
 0x743   : > { %v3868_v8 = vadd.f32 %v3867_v56, %v3866_v17  ;;  %v3831_v49 = vadd.f32 %v3830_v47, %v3829_v12 }
 0x745   : > { %v3871_v61 = vrot.slane %v3868_v8, 7 }
 0x747   : > { %v3873_v10 = vsel %vm3872_vm10, %v3831_v49, %v3871_v61 }
 0x748   : > { %v3875_v18 = vadd.f32 %v3873_v10, %v3437_v15 }
 0x74a   : > { %3876 = vst.msk [vmem:[#allocation2] sm:$0x3] %vm5452_vm0, %v3875_v18 }
 0x74b PF: > { %v3881_v22 = vld [vmem:[%s5568_s29 + $0x20] sm:$0xff]  ;;  %v3879_v2 = vld [vmem:[%s5568_s29 + $0x10] sm:$0xff]  ;;  %v5342_v4 = vmov 0   ;;  %v3882_v5 = vld [vmem:[%s5568_s29 + $0x28] sm:$0xff]  ;;  %v7504_v6 = vperm.slane %v5523_v21, 1  ;;  %v7508_v1 = vshrl.u32 %v192_v0, 7  ;;  %s4524_s20 = scalar_lea.hbm %s7816_s3, %s5413_s25 }
 0x74c   : > { %v3877_v3 = vld [vmem:[%s5568_s29] sm:$0xff]  ;;  %5260 = vset.pattern.permute.xlu2 %v5342_v4  ;;  %5259 = vset.pattern.permute.xlu1 %v5342_v4  ;;  %v3880_v19 = vld [vmem:[%s5568_s29 + $0x18] sm:$0xff]  ;;  %v3878_v20 = vld [vmem:[%s5568_s29 + $0x8] sm:$0xff]  ;;  %v7520_v55 = vand.u32 127, %v192_v0  ;;  %v7523_v16 = vperm.slane %v5523_v21, 0  ;;  %s4526_s30 = sshll.u32 %s178_s27, 4  ;;  %s4527_s30 = int_to_ptr.vmem [resolvable:$true] %s4526_s30 }
 0x74d   : > { %5258 = vset.pattern.permute.xlu0 %v5342_v4  ;;  %3967 = vperm.xlu2 %5260, %v3881_v22   ;;  %v3885_v23 = vld [vmem:[%s5568_s29 + $0x40] sm:$0xff]  ;;  %v3884_v24 = vld [vmem:[%s5568_s29 + $0x38] sm:$0xff]  ;;  %v3883_v25 = vld [vmem:[%s5568_s29 + $0x30] sm:$0xff]  ;;  %v3911_v40 = vadd.s32 8, %v7508_v1  ;;  %v3912_v8 = vadd.s32 16, %v7508_v1  ;;  %v3913_v10 = vadd.s32 24, %v7508_v1 }
 0x74e   : > { %3957 = vperm.xlu1 %5259, %v3879_v2   ;;  %3947 = vperm.xlu0 %5258, %v3877_v3   ;;  %v3888_v26 = vld [vmem:[%s5568_s29 + $0x58] sm:$0xff]  ;;  %v3887_v27 = vld [vmem:[%s5568_s29 + $0x50] sm:$0xff]  ;;  %v3886_v28 = vld [vmem:[%s5568_s29 + $0x48] sm:$0xff]  ;;  %vm4174_vm4 = vcmp.lt.s32.totalorder %v7508_v1, %v7520_v55  ;;  %s4528_s26 = sshll.u32 %s4524_s20, 4  ;;  %s4514_s28 = scalar_lea.sflag [#allocation4], %s176_s24  ;;  %s4529_s26 = int_to_ptr.hbm [resolvable:$true] %s4528_s26 }
 0x74f   : > { %v3891_v29 = vld [vmem:[%s5568_s29 + $0x70] sm:$0xff]  ;;  %v3890_v30 = vld [vmem:[%s5568_s29 + $0x68] sm:$0xff]  ;;  %v3889_v31 = vld [vmem:[%s5568_s29 + $0x60] sm:$0xff]  ;;  %vm4176_vm2 = vcmp.lt.s32.totalorder %v3911_v40, %v7520_v55  ;;  %vm4178_vm9 = vcmp.lt.s32.totalorder %v3912_v8, %v7520_v55  ;;  %s5275_s25 = sshra.s32 %s4529_s26, 4  ;;  %s5281_s6 = scalar_lea.hbm %s7816_s3, 8  ;;  %s5276_s25 = int_to_ptr.hbm [resolvable:$true] %s5275_s25 }
 0x750   : > { %v3894_v32 = vld [vmem:[%s5568_s29 + $0x88] sm:$0xff]  ;;  %v3893_v33 = vld [vmem:[%s5568_s29 + $0x80] sm:$0xff]  ;;  %v3892_v34 = vld [vmem:[%s5568_s29 + $0x78] sm:$0xff]  ;;  %s5277_s17 = scalar_lea.hbm %s5276_s25, 2  ;;  %p5282_p11 = scmp.lt.s32.totalorder %s5276_s25, %s7816_s3 }
 0x751   : > { %v3897_v35 = vld [vmem:[%s5568_s29 + $0xa0] sm:$0xff]  ;;  %v3896_v36 = vld [vmem:[%s5568_s29 + $0x98] sm:$0xff]  ;;  %v3895_v39 = vld [vmem:[%s5568_s29 + $0x90] sm:$0xff]  ;;  %p5278_p8 = scmp.ne.s32.totalorder %s5276_s25, %s5277_s17  ;;  %p5283_p12 = scmp.lt.s32.totalorder %s5281_s6, %s5277_s17 }
 0x752   : > { %v3900_v37 = vld [vmem:[%s5568_s29 + $0xb8] sm:$0xff]  ;;  %v3899_v44 = vld [vmem:[%s5568_s29 + $0xb0] sm:$0xff]  ;;  %v3898_v38 = vld [vmem:[%s5568_s29 + $0xa8] sm:$0xff] }
 0x753   : > { %v3903_v52 = vld [vmem:[%s5568_s29 + $0xd0] sm:$0xff]  ;;  %v3902_v51 = vld [vmem:[%s5568_s29 + $0xc8] sm:$0xff]  ;;  %v3901_v45 = vld [vmem:[%s5568_s29 + $0xc0] sm:$0xff]  ;;  %p5279_p9 = pnand %p5278_p8, %p5401_p5  ;;  %p5284_p13 = por %p5283_p12, %p5282_p11 }
 0x754   : > { %v3906_v58 = vld [vmem:[%s5568_s29 + $0xe8] sm:$0xff]  ;;  %v3905_v43 = vld [vmem:[%s5568_s29 + $0xe0] sm:$0xff]  ;;  %v3904_v54 = vld [vmem:[%s5568_s29 + $0xd8] sm:$0xff] }
 0x755   : > { %3972 = vperm.xlu2 %5260, %v3882_v5   ;;  %v3908_v62 = vld [vmem:[%s5568_s29 + $0xf8] sm:$0xff]  ;;  %v3907_v50 = vld [vmem:[%s5568_s29 + $0xf0] sm:$0xff]  ;;  %p5280_p10 = pneg %p5279_p9 }
 0x756   : > { %3962 = vperm.xlu1 %5259, %v3880_v19   ;;  %3952 = vperm.xlu0 %5258, %v3878_v20  }
 0x757   : > { %p5285_p0 = pnand %p5284_p13, %p5280_p10 }
 0x75d   : > { %3987 = vperm.xlu2 %5260, %v3885_v23  }
 0x75e   : > { %3982 = vperm.xlu1 %5259, %v3884_v24   ;;  %3977 = vperm.xlu0 %5258, %v3883_v25   ;;  %v3914_v24 = vadd.s32 32, %v7508_v1 }
 0x765   : > { %4002 = vperm.xlu2 %5260, %v3888_v26  }
 0x766   : > { %3997 = vperm.xlu1 %5259, %v3887_v27   ;;  %3992 = vperm.xlu0 %5258, %v3886_v28  }
 0x76d   : > { %4017 = vperm.xlu2 %5260, %v3891_v29  }
 0x76e   : > { %4012 = vperm.xlu1 %5259, %v3890_v30   ;;  %4007 = vperm.xlu0 %5258, %v3889_v31   ;;  %v3915_v31 = vadd.s32 40, %v7508_v1 }
 0x775   : > { %4032 = vperm.xlu2 %5260, %v3894_v32  }
 0x776   : > { %4027 = vperm.xlu1 %5259, %v3893_v33   ;;  %4022 = vperm.xlu0 %5258, %v3892_v34  }
 0x77d   : > { %4047 = vperm.xlu2 %5260, %v3897_v35  }
 0x77e   : > { %4042 = vperm.xlu1 %5259, %v3896_v36   ;;  %4037 = vperm.xlu0 %5258, %v3895_v39  }
 0x785   : > { %4062 = vperm.xlu2 %5260, %v3900_v37  }
 0x786   : > { %4057 = vperm.xlu1 %5259, %v3899_v44   ;;  %4052 = vperm.xlu0 %5258, %v3898_v38  }
 0x78d   : > { %4077 = vperm.xlu2 %5260, %v3903_v52   ;;  %v3916_v52 = vadd.s32 48, %v7508_v1 }
 0x78e   : > { %4072 = vperm.xlu1 %5259, %v3902_v51   ;;  %4067 = vperm.xlu0 %5258, %v3901_v45  }
 0x795   : > { %4092 = vperm.xlu2 %5260, %v3906_v58   ;;  %v3926_v58 = vadd.s32 128, %v7508_v1 }
 0x796   : > { %4087 = vperm.xlu1 %5259, %v3905_v43   ;;  %4082 = vperm.xlu0 %5258, %v3904_v54  }
 0x79e   : > { %4102 = vperm.xlu1 %5259, %v3908_v62   ;;  %4097 = vperm.xlu0 %5258, %v3907_v50   ;;  %v7600_v62 = vadd.s32 128, %v7520_v55 }
 0x7a7   : > { %v7497_v46 = vpop.permute.xlu2 %3967 }
 0x7a8   : > { %vm4119_vm15 = vcmp.eq.f32.partialorder %v7497_v46, %v7504_v6 }
 0x7a9   : > { %v5134_v21 = vsel %vm4119_vm15, 1.0, %v5325_v11 }
 0x7af   : > { %v7499_v63 = vpop.permute.xlu2 %3972 }
 0x7b0   : > { %vm4121_vm1 = vcmp.eq.f32.partialorder %v7499_v63, %v7504_v6 }
 0x7b1   : > { %v5136_v49 = vsel %vm4121_vm1, 1.0, %v5325_v11 }
 0x7b7   : > { %v7501_v42 = vpop.permute.xlu2 %3987 }
 0x7bf   : > { %v7516_v48 = vpop.permute.xlu2 %4002 }
 0x7c0   : > { %v3958_v59 = vpop.permute.xlu1 %3957  ;;  %v3948_v9 = vpop.permute.xlu0 %3947 }
 0x7c1   : > { %vm4111_vm11 = vcmp.eq.f32.partialorder %v3948_v9, %v7504_v6  ;;  %vm4115_vm12 = vcmp.eq.f32.partialorder %v3958_v59, %v7504_v6  ;;  %vm4110_vm5 = vcmp.eq.f32.partialorder %v3948_v9, %v7523_v16  ;;  %v3927_v9 = vadd.s32 136, %v7508_v1 }
 0x7c2   : > { %v5126_v14 = vsel %vm4111_vm11, 1.0, %v5325_v11  ;;  %v5130_v60 = vsel %vm4115_vm12, 1.0, %v5325_v11  ;;  %vm4238_vm10 = vmand %vm4110_vm5, %vm4174_vm4  ;;  %vm4127_vm11 = vcmp.eq.f32.partialorder %v7501_v42, %v7504_v6  ;;  %vm4114_vm12 = vcmp.eq.f32.partialorder %v3958_v59, %v7523_v16 }
 0x7c3   : > { %v5125_v5 = vsel %vm4238_vm10, 1.0, %v5325_v11  ;;  %v5142_v25 = vsel %vm4127_vm11, 1.0, %v5325_v11  ;;  %vm4182_vm4 = vcmp.lt.s32.totalorder %v3914_v24, %v7520_v55  ;;  %vm4118_vm5 = vcmp.eq.f32.partialorder %v7497_v46, %v7523_v16 }
 0x7c7   : > { %v7553_v3 = vpop.permute.xlu2 %4017 }
 0x7c8   : > { %v3963_v41 = vpop.permute.xlu1 %3962  ;;  %v3953_v57 = vpop.permute.xlu0 %3952 }
 0x7c9   : > { %vm4113_vm13 = vcmp.eq.f32.partialorder %v3953_v57, %v7504_v6  ;;  %vm4117_vm14 = vcmp.eq.f32.partialorder %v3963_v41, %v7504_v6  ;;  %vm4112_vm3 = vcmp.eq.f32.partialorder %v3953_v57, %v7523_v16  ;;  %vm4116_vm15 = vcmp.eq.f32.partialorder %v3963_v41, %v7523_v16 }
 0x7ca   : > { %v5128_v13 = vsel %vm4113_vm13, 1.0, %v5325_v11  ;;  %v5132_v17 = vsel %vm4117_vm14, 1.0, %v5325_v11  ;;  %vm4240_vm7 = vmand %vm4112_vm3, %vm4176_vm2  ;;  %vm4180_vm14 = vcmp.lt.s32.totalorder %v3913_v10, %v7520_v55  ;;  %v3918_v57 = vadd.s32 64, %v7508_v1 }
 0x7cb   : > { %v4468_v53 = vadd.f32 %v5128_v13, %v5126_v14  ;;  %v5127_v22 = vsel %vm4240_vm7, 1.0, %v5325_v11  ;;  %vm4242_vm13 = vmand %vm4114_vm12, %vm4178_vm9  ;;  %vm4120_vm9 = vcmp.eq.f32.partialorder %v7499_v63, %v7523_v16  ;;  %v3917_v63 = vadd.s32 56, %v7508_v1 }
 0x7cc   : > { %v4431_v26 = vadd.f32 %v5127_v22, %v5125_v5  ;;  %v5129_v29 = vsel %vm4242_vm13, 1.0, %v5325_v11  ;;  %vm4244_vm3 = vmand %vm4116_vm15, %vm4180_vm14  ;;  %vm4139_vm13 = vcmp.eq.f32.partialorder %v7553_v3, %v7504_v6  ;;  %vm4186_vm14 = vcmp.lt.s32.totalorder %v3916_v52, %v7520_v55 }
 0x7cd   : > { %v4469_v12 = vadd.f32 %v5130_v60, %v4468_v53  ;;  %v5131_v35 = vsel %vm4244_vm3, 1.0, %v5325_v11  ;;  %vm4246_vm7 = vmand %vm4118_vm5, %vm4182_vm4  ;;  %v5154_v14 = vsel %vm4139_vm13, 1.0, %v5325_v11  ;;  %vm4188_vm5 = vcmp.lt.s32.totalorder %v3917_v63, %v7520_v55 }
 0x7ce   : > { %v4432_v32 = vadd.f32 %v5129_v29, %v4431_v26  ;;  %v5133_v43 = vsel %vm4246_vm7, 1.0, %v5325_v11  ;;  %v3931_v29 = vadd.s32 168, %v7508_v1  ;;  %v3924_v63 = vadd.s32 112, %v7508_v1 }
 0x7cf   : > { %v4470_v47 = vadd.f32 %v5132_v17, %v4469_v12  ;;  %v4033_v38 = vpop.permute.xlu2 %4032  ;;  %v3919_v12 = vadd.s32 72, %v7508_v1 }
 0x7d0   : > { %v7532_v56 = vpop.permute.xlu1 %3982  ;;  %v7534_v0 = vpop.permute.xlu0 %3977  ;;  %v4433_v44 = vadd.f32 %v5131_v35, %v4432_v32 }
 0x7d1   : > { %v4471_v15 = vadd.f32 %v5134_v21, %v4470_v47  ;;  %vm4123_vm6 = vcmp.eq.f32.partialorder %v7534_v0, %v7504_v6  ;;  %vm4125_vm8 = vcmp.eq.f32.partialorder %v7532_v56, %v7504_v6  ;;  %vm4122_vm15 = vcmp.eq.f32.partialorder %v7534_v0, %v7523_v16 }
 0x7d2   : > { %v5138_v18 = vsel %vm4123_vm6, 1.0, %v5325_v11  ;;  %v5140_v4 = vsel %vm4125_vm8, 1.0, %v5325_v11  ;;  %vm4133_vm6 = vcmp.eq.f32.partialorder %v7516_v48, %v7504_v6  ;;  %vm4184_vm8 = vcmp.lt.s32.totalorder %v3915_v31, %v7520_v55 }
 0x7d3   : > { %v4472_v61 = vadd.f32 %v5136_v49, %v4471_v15  ;;  %v5148_v37 = vsel %vm4133_vm6, 1.0, %v5325_v11  ;;  %vm4248_vm12 = vmand %vm4120_vm9, %vm4184_vm8  ;;  %v4434_v50 = vadd.f32 %v5133_v43, %v4433_v44  ;;  %vm4124_vm6 = vcmp.eq.f32.partialorder %v7532_v56, %v7523_v16 }
 0x7d4   : > { %v5135_v41 = vsel %vm4248_vm12, 1.0, %v5325_v11  ;;  %vm4209_vm8 = vcmp.lt.s32.totalorder %v3927_v9, %v7600_v62  ;;  %v3929_v21 = vadd.s32 152, %v7508_v1  ;;  %vm4145_vm9 = vcmp.eq.f32.partialorder %v4033_v38, %v7504_v6  ;;  %vm4252_vm12 = vmand %vm4124_vm6, %vm4188_vm5 }
 0x7d5   : > { %v4473_v2 = vadd.f32 %v5138_v18, %v4472_v61  ;;  %v4435_v53 = vadd.f32 %v5135_v41, %v4434_v50  ;;  %v3928_v49 = vadd.s32 144, %v7508_v1  ;;  %vm4192_vm13 = vcmp.lt.s32.totalorder %v3919_v12, %v7520_v55 }
 0x7d6   : > { %v5139_v10 = vsel %vm4252_vm12, 1.0, %v5325_v11  ;;  %v3930_v18 = vadd.s32 160, %v7508_v1  ;;  %v3935_v43 = vadd.s32 200, %v7508_v1  ;;  %v3936_v41 = vadd.s32 208, %v7508_v1 }
 0x7d7   : > { %v4474_v19 = vadd.f32 %v5140_v4, %v4473_v2  ;;  %v4048_v47 = vpop.permute.xlu2 %4047  ;;  %v3920_v4 = vadd.s32 80, %v7508_v1  ;;  %v3925_v12 = vadd.s32 120, %v7508_v1 }
 0x7d8   : > { %v7557_v20 = vpop.permute.xlu1 %3997  ;;  %v7559_v23 = vpop.permute.xlu0 %3992 }
 0x7d9   : > { %vm4131_vm1 = vcmp.eq.f32.partialorder %v7557_v20, %v7504_v6  ;;  %v4475_v27 = vadd.f32 %v5142_v25, %v4474_v19  ;;  %vm4129_vm2 = vcmp.eq.f32.partialorder %v7559_v23, %v7504_v6  ;;  %v3921_v25 = vadd.s32 88, %v7508_v1 }
 0x7da   : > { %v5144_v28 = vsel %vm4129_vm2, 1.0, %v5325_v11  ;;  %v5146_v33 = vsel %vm4131_vm1, 1.0, %v5325_v11  ;;  %vm4207_vm1 = vcmp.lt.s32.totalorder %v3926_v58, %v7600_v62  ;;  %vm4250_vm2 = vmand %vm4122_vm15, %vm4186_vm14  ;;  %vm4128_vm14 = vcmp.eq.f32.partialorder %v7559_v23, %v7523_v16 }
 0x7db   : > { %v4476_v30 = vadd.f32 %v5144_v28, %v4475_v27  ;;  %v5137_v8 = vsel %vm4250_vm2, 1.0, %v5325_v11  ;;  %vm4273_vm15 = vmand %vm4145_vm9, %vm4209_vm8  ;;  %v3932_v27 = vadd.s32 176, %v7508_v1  ;;  %vm4215_vm9 = vcmp.lt.s32.totalorder %v3930_v18, %v7600_v62 }
 0x7dc   : > { %v4436_v56 = vadd.f32 %v5137_v8, %v4435_v53  ;;  %v5158_v19 = vsel %vm4273_vm15, 1.0, %v5325_v11  ;;  %vm4130_vm12 = vcmp.eq.f32.partialorder %v7557_v20, %v7523_v16  ;;  %vm4196_vm15 = vcmp.lt.s32.totalorder %v3921_v25, %v7520_v55 }
 0x7dd   : > { %v4477_v34 = vadd.f32 %v5146_v33, %v4476_v30 }
 0x7de   : > { %v4437_v2 = vadd.f32 %v5139_v10, %v4436_v56  ;;  %v3938_v56 = vadd.s32 224, %v7508_v1 }
 0x7df   : > { %v4478_v51 = vadd.f32 %v5148_v37, %v4477_v34  ;;  %v4063_v31 = vpop.permute.xlu2 %4062  ;;  %v3922_v34 = vadd.s32 96, %v7508_v1  ;;  %v3933_v37 = vadd.s32 184, %v7508_v1 }
 0x7e0   : > { %v7581_v36 = vpop.permute.xlu1 %4012  ;;  %v7583_v39 = vpop.permute.xlu0 %4007 }
 0x7e1   : > { %vm4137_vm10 = vcmp.eq.f32.partialorder %v7581_v36, %v7504_v6  ;;  %vm4135_vm11 = vcmp.eq.f32.partialorder %v7583_v39, %v7504_v6 }
 0x7e2   : > { %v5150_v45 = vsel %vm4135_vm11, 1.0, %v5325_v11  ;;  %v5152_v46 = vsel %vm4137_vm10, 1.0, %v5325_v11  ;;  %vm4190_vm10 = vcmp.lt.s32.totalorder %v3918_v57, %v7520_v55  ;;  %vm4126_vm11 = vcmp.eq.f32.partialorder %v7501_v42, %v7523_v16 }
 0x7e3   : > { %v4479_v54 = vadd.f32 %v5150_v45, %v4478_v51  ;;  %vm4254_vm2 = vmand %vm4126_vm11, %vm4190_vm10  ;;  %vm4151_vm10 = vcmp.eq.f32.partialorder %v4048_v47, %v7504_v6  ;;  %vm4194_vm11 = vcmp.lt.s32.totalorder %v3920_v4, %v7520_v55  ;;  %v3923_v45 = vadd.s32 104, %v7508_v1 }
 0x7e4   : > { %v5141_v24 = vsel %vm4254_vm2, 1.0, %v5325_v11  ;;  %vm4132_vm2 = vcmp.eq.f32.partialorder %v7516_v48, %v7523_v16 }
 0x7e5   : > { %v4480_v59 = vadd.f32 %v5152_v46, %v4479_v54  ;;  %v4438_v30 = vadd.f32 %v5141_v24, %v4437_v2  ;;  %v3934_v46 = vadd.s32 192, %v7508_v1 }
 0x7e7   : > { %v4481_v60 = vadd.f32 %v5154_v14, %v4480_v59 }
 0x7e8   : > { %v4028_v13 = vpop.permute.xlu1 %4027  ;;  %v7612_v40 = vpop.permute.xlu0 %4022 }
 0x7e9   : > { %vm4143_vm3 = vcmp.eq.f32.partialorder %v4028_v13, %v7504_v6  ;;  %vm4141_vm4 = vcmp.eq.f32.partialorder %v7612_v40, %v7504_v6  ;;  %v4078_v13 = vpop.permute.xlu2 %4077 }
 0x7ea   : > { %vm4271_vm7 = vmand %vm4143_vm3, %vm4207_vm1  ;;  %v5156_v17 = vsel %vm4141_vm4, 1.0, %v5325_v11  ;;  %vm4213_vm1 = vcmp.lt.s32.totalorder %v3929_v21, %v7600_v62  ;;  %vm4211_vm3 = vcmp.lt.s32.totalorder %v3928_v49, %v7600_v62 }
 0x7eb   : > { %v4482_v0 = vadd.f32 %v5156_v17, %v4481_v60  ;;  %v5157_v15 = vsel %vm4271_vm7, 1.0, %v5325_v11  ;;  %vm7641_vm4 = vmand %vm4128_vm14, %vm4192_vm13  ;;  %vm4219_vm14 = vcmp.lt.s32.totalorder %v3932_v27, %v7600_v62  ;;  %v3941_v27 = vadd.s32 248, %v7508_v1 }
 0x7ec   : > { %v5143_v33 = vsel %vm7641_vm4, 1.0, %v5325_v11  ;;  %vm4279_vm13 = vmand %vm4151_vm10, %vm4215_vm9  ;;  %vm4221_vm9 = vcmp.lt.s32.totalorder %v3933_v37, %v7600_v62 }
 0x7ed   : > { %v4483_v61 = vadd.f32 %v5157_v15, %v4482_v0  ;;  %v4439_v52 = vadd.f32 %v5143_v33, %v4438_v30  ;;  %v5161_v51 = vsel %vm4279_vm13, 1.0, %v5325_v11 }
 0x7ef   : > { %v4484_v26 = vadd.f32 %v5158_v19, %v4483_v61  ;;  %v3937_v61 = vadd.s32 216, %v7508_v1 }
 0x7f0   : > { %v4043_v22 = vpop.permute.xlu1 %4042  ;;  %v4038_v42 = vpop.permute.xlu0 %4037 }
 0x7f1   : > { %vm4149_vm5 = vcmp.eq.f32.partialorder %v4043_v22, %v7504_v6  ;;  %vm4147_vm6 = vcmp.eq.f32.partialorder %v4038_v42, %v7504_v6  ;;  %v4093_v5 = vpop.permute.xlu2 %4092 }
 0x7f2   : > { %vm7648_vm7 = vmand %vm4149_vm5, %vm4213_vm1  ;;  %vm4217_vm1 = vcmp.lt.s32.totalorder %v3931_v29, %v7600_v62  ;;  %v3940_v29 = vadd.s32 240, %v7508_v1 }
 0x7f3   : > { %vm4275_vm8 = vmand %vm4147_vm6, %vm4211_vm3  ;;  %v5160_v35 = vsel %vm7648_vm7, 1.0, %v5325_v11  ;;  %vm4198_vm6 = vcmp.lt.s32.totalorder %v3922_v34, %v7520_v55  ;;  %vm4134_vm7 = vcmp.eq.f32.partialorder %v7583_v39, %v7523_v16 }
 0x7f4   : > { %v5159_v28 = vsel %vm4275_vm8, 1.0, %v5325_v11  ;;  %vm4258_vm3 = vmand %vm4130_vm12, %vm4194_vm11  ;;  %vm4157_vm12 = vcmp.eq.f32.partialorder %v4063_v31, %v7504_v6 }
 0x7f5   : > { %v4485_v32 = vadd.f32 %v5159_v28, %v4484_v26  ;;  %vm7692_vm11 = vmand %vm4132_vm2, %vm4196_vm15  ;;  %v5145_v50 = vsel %vm4258_vm3, 1.0, %v5325_v11  ;;  %vm4136_vm15 = vcmp.eq.f32.partialorder %v7581_v36, %v7523_v16  ;;  %vm4225_vm2 = vcmp.lt.s32.totalorder %v3935_v43, %v7600_v62 }
 0x7f6   : > { %v4440_v59 = vadd.f32 %v5145_v50, %v4439_v52  ;;  %vm4262_vm13 = vmand %vm4134_vm7, %vm4198_vm6  ;;  %v5147_v36 = vsel %vm7692_vm11, 1.0, %v5325_v11  ;;  %vm4223_vm3 = vcmp.lt.s32.totalorder %v3934_v46, %v7600_v62  ;;  %vm4202_vm7 = vcmp.lt.s32.totalorder %v3924_v63, %v7520_v55 }
 0x7f7   : > { %v4486_v44 = vadd.f32 %v5160_v35, %v4485_v32  ;;  %v5149_v60 = vsel %vm4262_vm13, 1.0, %v5325_v11  ;;  %vm4163_vm11 = vcmp.eq.f32.partialorder %v4078_v13, %v7504_v6  ;;  %vm4204_vm13 = vcmp.lt.s32.totalorder %v3925_v12, %v7520_v55 }
 0x7f8   : > { %v4058_v38 = vpop.permute.xlu1 %4057  ;;  %v4053_v20 = vpop.permute.xlu0 %4052  ;;  %v4441_v21 = vadd.f32 %v5147_v36, %v4440_v59 }
 0x7f9   : > { %vm4155_vm4 = vcmp.eq.f32.partialorder %v4058_v38, %v7504_v6  ;;  %vm4153_vm5 = vcmp.eq.f32.partialorder %v4053_v20, %v7504_v6  ;;  %v4487_v48 = vadd.f32 %v5161_v51, %v4486_v44 }
 0x7fa   : > { %vm7684_vm8 = vmand %vm4155_vm4, %vm4219_vm14  ;;  %vm4200_vm14 = vcmp.lt.s32.totalorder %v3923_v45, %v7520_v55  ;;  %v4442_v15 = vadd.f32 %v5149_v60, %v4441_v21 }
 0x7fb   : > { %vm4281_vm10 = vmand %vm4153_vm5, %vm4217_vm1  ;;  %v5163_v57 = vsel %vm7684_vm8, 1.0, %v5325_v11  ;;  %vm4138_vm8 = vcmp.eq.f32.partialorder %v7553_v3, %v7523_v16 }
 0x7fc   : > { %v5162_v39 = vsel %vm4281_vm10, 1.0, %v5325_v11  ;;  %vm7710_vm1 = vmand %vm4157_vm12, %vm4221_vm9  ;;  %vm4227_vm9 = vcmp.lt.s32.totalorder %v3936_v41, %v7600_v62 }
 0x7fd   : > { %v4488_v9 = vadd.f32 %v5162_v39, %v4487_v48  ;;  %vm7721_vm4 = vmand %vm4136_vm15, %vm4200_vm14  ;;  %v5164_v8 = vsel %vm7710_vm1, 1.0, %v5325_v11  ;;  %vm4140_vm14 = vcmp.eq.f32.partialorder %v7612_v40, %v7523_v16  ;;  %v3939_v16 = vadd.s32 232, %v7508_v1 }
 0x7fe   : > { %vm7743_vm15 = vmand %vm4138_vm8, %vm4202_vm7  ;;  %v5151_v22 = vsel %vm7721_vm4, 1.0, %v5325_v11 }
 0x7ff   : > { %v4489_v53 = vadd.f32 %v5163_v57, %v4488_v9  ;;  %vm4291_vm1 = vmand %vm4163_vm11, %vm4227_vm9  ;;  %v4443_v55 = vadd.f32 %v5151_v22, %v4442_v15  ;;  %v5153_v19 = vsel %vm7743_vm15, 1.0, %v5325_v11  ;;  %vm4233_vm9 = vcmp.lt.s32.totalorder %v3939_v16, %v7600_v62 }
 0x800   : > { %v4073_v17 = vpop.permute.xlu1 %4072  ;;  %v4068_v47 = vpop.permute.xlu0 %4067  ;;  %v5167_v23 = vsel %vm4291_vm1, 1.0, %v5325_v11 }
 0x801   : > { %vm4161_vm5 = vcmp.eq.f32.partialorder %v4073_v17, %v7504_v6  ;;  %vm4159_vm6 = vcmp.eq.f32.partialorder %v4068_v47, %v7504_v6  ;;  %v4490_v49 = vadd.f32 %v5164_v8, %v4489_v53  ;;  %v4444_v25 = vadd.f32 %v5153_v19, %v4443_v55 }
 0x802   : > { %vm4289_vm10 = vmand %vm4161_vm5, %vm4225_vm2  ;;  %vm4229_vm5 = vcmp.lt.s32.totalorder %v3937_v61, %v7600_v62 }
 0x803   : > { %vm4287_vm12 = vmand %vm4159_vm6, %vm4223_vm3  ;;  %v5166_v42 = vsel %vm4289_vm10, 1.0, %v5325_v11  ;;  %vm4231_vm3 = vcmp.lt.s32.totalorder %v3938_v56, %v7600_v62  ;;  %vm4169_vm10 = vcmp.eq.f32.partialorder %v4093_v5, %v7504_v6 }
 0x804   : > { %v5165_v3 = vsel %vm4287_vm12, 1.0, %v5325_v11  ;;  %vm4268_vm2 = vmand %vm4140_vm14, %vm4204_vm13  ;;  %vm4237_vm12 = vcmp.lt.s32.totalorder %v3941_v27, %v7600_v62  ;;  %vm4235_vm13 = vcmp.lt.s32.totalorder %v3940_v29, %v7600_v62 }
 0x805   : > { %v4491_v18 = vadd.f32 %v5165_v3, %v4490_v49  ;;  %v5155_v24 = vsel %vm4268_vm2, 1.0, %v5325_v11  ;;  %vm4297_vm11 = vmand %vm4169_vm10, %vm4233_vm9 }
 0x806   : > { %v4445_v30 = vadd.f32 %v5155_v24, %v4444_v25  ;;  %v5170_v44 = vsel %vm4297_vm11, 1.0, %v5325_v11 }
 0x807   : > { %v4492_v2 = vadd.f32 %v5166_v42, %v4491_v18 }
 0x808   : > { %v4088_v40 = vpop.permute.xlu1 %4087  ;;  %v4083_v4 = vpop.permute.xlu0 %4082  ;;  %v4462_v37 = vrot.slane %v4445_v30, 4 }
 0x809   : > { %vm4167_vm6 = vcmp.eq.f32.partialorder %v4088_v40, %v7504_v6  ;;  %vm4165_vm7 = vcmp.eq.f32.partialorder %v4083_v4, %v7504_v6  ;;  %v4493_v26 = vadd.f32 %v5167_v23, %v4492_v2 }
 0x80a   : > { %vm4295_vm4 = vmand %vm4167_vm6, %vm4231_vm3  ;;  %v4463_v20 = vadd.f32 %v4462_v37, %v4445_v30  ;;  %vm4508_vm3 = vcmask 1040384  }
 0x80b   : > { %vm4293_vm8 = vmand %vm4165_vm7, %vm4229_vm5  ;;  %v5169_v32 = vsel %vm4295_vm4, 1.0, %v5325_v11 }
 0x80c   : > { %v5168_v28 = vsel %vm4293_vm8, 1.0, %v5325_v11  ;;  %v4464_v45 = vrot.slane %v4463_v20, 2 }
 0x80d   : > { %v4494_v31 = vadd.f32 %v5168_v28, %v4493_v26 }
 0x80e   : > { %v4465_v43 = vadd.f32 %v4464_v45, %v4463_v20 }
 0x80f   : > { %v4495_v33 = vadd.f32 %v5169_v32, %v4494_v31 }
 0x810   : > { %v4103_v34 = vpop.permute.xlu1 %4102  ;;  %v4098_v35 = vpop.permute.xlu0 %4097  ;;  %v4466_v50 = vrot.slane %v4465_v43, 1 }
 0x811   : > { %vm4173_vm14 = vcmp.eq.f32.partialorder %v4103_v34, %v7504_v6  ;;  %vm4171_vm15 = vcmp.eq.f32.partialorder %v4098_v35, %v7504_v6  ;;  %v4496_v1 = vadd.f32 %v5170_v44, %v4495_v33 }
 0x812   : > { %vm4301_vm1 = vmand %vm4173_vm14, %vm4237_vm12  ;;  %v4467_v63 = vadd.f32 %v4466_v50, %v4465_v43 }
 0x813   : > { %vm4299_vm2 = vmand %vm4171_vm15, %vm4235_vm13  ;;  %v5172_v51 = vsel %vm4301_vm1, 1.0, %v5325_v11 }
 0x814   : > { %v5171_v38 = vsel %vm4299_vm2, 1.0, %v5325_v11  ;;  %v4302_v11 = vld [vmem:[#allocation2] sm:$0x3] }
 0x815   : > { %v4497_v52 = vadd.f32 %v5171_v38, %v4496_v1 }
 0x817   : > { %v4498_v62 = vadd.f32 %v5172_v51, %v4497_v52 }
 0x819   : > { %v4499_v58 = vrot.slane %v4498_v62, 4 }
 0x81b   : > { %v4500_v48 = vadd.f32 %v4499_v58, %v4498_v62 }
 0x81d   : > { %v4501_v54 = vrot.slane %v4500_v48, 2 }
 0x81f   : > { %v4502_v6 = vadd.f32 %v4501_v54, %v4500_v48 }
 0x821   : > { %v4503_v39 = vrot.slane %v4502_v6, 1 }
 0x823   : > { %v4504_v46 = vadd.f32 %v4503_v39, %v4502_v6 }
 0x825   : > { %v4507_v59 = vrot.slane %v4504_v46, 7 }
 0x827   : > { %v4509_v9 = vsel %vm4508_vm3, %v4467_v63, %v4507_v59 }
 0x828   : > { %v4511_v41 = vadd.f32 %v4509_v9, %v4302_v11 }
 0x82a   : > { %4512 = vst.msk [vmem:[%s178_s27] sm:$0x3] %vm5452_vm0, %v4511_v41 }
 0x82b   : > { %5288 = shalt.err (!%p5285_p0)
}
 0x82c   : > { %5177 = dma.vmem_to_hbm [thread:$0]  (%p5401_p5), %s4527_s30, 32, %s4529_s26, %s4514_s28  }
 0x82d PF: > { %p5183_p1 = scmp.ge.s32.totalorder %s5323_s15, 2  ;;  %s4540_s24 = sand.u32 1, %s5311_s12  }
 0x82e   : > { %s4541_s5 = scalar_lea.sflag [#allocation4], %s4540_s24 }
 0x82f   : > { %p5180_p2 = pnand %p5183_p1, %p5405_p6 }
 0x831   : > { %p5181_p3 = pneg %p5180_p2 }
 0x833   : > { %5306 = dma.done.wait (%p5181_p3), %s4541_s5, 32  }
 0x834   : > { %5308 = vsyncadd (%p5181_p3), %s4541_s5, 4294967264  ;;  %p13_p4 = scmp.ge.s32.totalorder %s5388_s18, 6   ;;  %s7835_s12 = smov %s5315_s13 }
 0x835   : > { %s7836_s13 = smov %s5319_s14  ;;  %s7837_s14 = smov %s5399_s21 }
 0x836   : > { %s7838_s15 = smov %s5388_s18  ;;  %15 = sbr.rel (!%p13_p4) target bundleno = 3 (0x3), region = 102 }
 0x83b   :  { %4547 = vsyncpa [#allocation4], 1 }
 0x83c   :  { %4549 = vsyncpa [#allocation4 + $0x1], 1 }

</bundles_post_ra>
